<compile_context>
chip_gen: v7x
topology: tpu7x:2x2x1
jax: 0.10.0
libtpu: 0.0.40
codegen_flags: <defaults>
</compile_context>

<pallas_src>
import functools

import jax
import jax.numpy as jnp
from jax import lax
from jax.experimental import pallas as pl
from jax.experimental.pallas import tpu as pltpu


def lstm_recurrent_kernel(x_ref, h0_ref, c0_ref, w_ih_ref, b_ref, w_hh_ref,
                          w_fc_ref, b_fc_ref, out_ref, hn_ref, cn_ref,
                          *, T_total, needs_mask):
    """One grid step == one chunk of Tc time steps over the full batch.

    Everything is in the transposed layout: state h/c are (H, B), gates (4H, B),
    so gate extraction is a sublane (vreg-aligned) slice — no XLU lane shuffles
    on the serial recurrence.  The recurrent state lives in the resident hn/cn
    output blocks (constant index map along the time-chunk grid axis).
    """
    c_idx = pl.program_id(0)          # time-chunk index (sequential, "arbitrary")
    n_chunks = pl.num_programs(0)

    Tc = x_ref.shape[0]               # static: time steps per chunk
    H, B = hn_ref.shape               # static: hidden size, batch
    G = 4 * H

    @pl.when(c_idx == 0)
    def _():                          # initialize the resident state
        hn_ref[...] = h0_ref[...]
        cn_ref[...] = c0_ref[...]

    # Hoisted out of the unrolled loop (incl. the lane-broadcast of the bias:
    # JAX does not CSE broadcast_in_dim, so do it once here).
    w_ih = w_ih_ref[...]              # (4H, I)
    w_hh = w_hh_ref[...]              # (4H, H)
    b = jnp.broadcast_to(b_ref[...], (G, B))   # (4H, B)

    h = hn_ref[...]                   # (H, B)
    cs = cn_ref[...]                  # (H, B)

    # Fully unrolled recurrence over the chunk (static indices -> full LLO
    # scheduling visibility).  The input projection does not depend on h, so
    # the only op on the serial chain is the (4H,H)@(H,B) matmul + gate math.
    for j in range(Tc):
        gx = jnp.dot(w_ih, x_ref[j], preferred_element_type=jnp.float32) + b
        gates = gx + jnp.dot(w_hh, h, preferred_element_type=jnp.float32)  # (4H, B)
        # Sublane slices at offsets 0, H, 2H, 3H (multiples of 8 for H=32):
        i_g = jax.nn.sigmoid(gates[0 * H:1 * H, :])
        f_g = jax.nn.sigmoid(gates[1 * H:2 * H, :])
        g_g = jnp.tanh(gates[2 * H:3 * H, :])
        o_g = jax.nn.sigmoid(gates[3 * H:4 * H, :])
        cs_new = f_g * cs + i_g * g_g
        h_new = o_g * jnp.tanh(cs_new)
        if needs_mask:
            # Tail of a ceil-div grid: padded time steps must be masked out,
            # NOT applied (zero-padded gates are not a no-op for LSTM state).
            valid = (c_idx * Tc + j) < T_total
            cs = jnp.where(valid, cs_new, cs)
            h = jnp.where(valid, h_new, h)
        else:
            cs, h = cs_new, h_new

    hn_ref[...] = h
    cn_ref[...] = cs

    @pl.when(c_idx == n_chunks - 1)
    def _():                          # fc head once, on the final hidden state
        out_ref[...] = (jnp.dot(w_fc_ref[...], h,
                                preferred_element_type=jnp.float32)
                        + b_fc_ref[...])


def _choose_time_chunk(T, I, B, unroll_cap=32, vmem_budget_bytes=4 << 20):
    """Largest time chunk whose double-buffered x slab fits a conservative VMEM
    budget, additionally capped so the fully unrolled body stays small."""
    per_step_bytes = 2 * I * B * 4          # double-buffered f32 x chunk per step
    vmem_cap = max(1, vmem_budget_bytes // per_step_bytes)
    return int(max(1, min(T, unroll_cap, vmem_cap)))


@jax.jit
def lstm_forward(x, params, h0, c0):
    """x: (B, T, I) float32.  Returns (out (B,O), (h_n (1,B,H), c_n (1,B,H)))."""
    B, T, I = x.shape
    H = h0.shape[-1]
    O = params["b_fc"].shape[-1]
    G = 4 * H

    # Time-major, feature-by-batch layout: x (T, I, B).  Streaming x instead of
    # a precomputed gates_x slashes HBM traffic and drops one XLA dispatch.
    x_t = jnp.transpose(x, (1, 2, 0))

    # Pad the contraction dim I up to a sublane multiple (zeros are a no-op).
    w_ih = params["w_ih"]                     # (4H, I)
    Ip = ((I + 7) // 8) * 8
    if Ip != I:
        x_t = jnp.pad(x_t, ((0, 0), (0, Ip - I), (0, 0)))
        w_ih = jnp.pad(w_ih, ((0, 0), (0, Ip - I)))

    # Time chunking: whole sequence in one chunk when it fits the cap.
    Tc = _choose_time_chunk(T, Ip, B)
    nc = -(-T // Tc)
    T_pad = nc * Tc
    needs_mask = T_pad != T
    if needs_mask:
        x_t = jnp.pad(x_t, ((0, T_pad - T), (0, 0), (0, 0)))

    b_sum = (params["b_ih"] + params["b_hh"]).reshape(G, 1)   # (4H, 1)
    b_fc = params["b_fc"].reshape(O, 1)                       # (O, 1)
    h0_t = h0.T                                               # (H, B)
    c0_t = c0.T                                               # (H, B)

    kernel = functools.partial(lstm_recurrent_kernel,
                               T_total=T, needs_mask=needs_mask)

    out_t, hn_t, cn_t = pl.pallas_call(
        kernel,
        out_shape=(
            jax.ShapeDtypeStruct((O, B), jnp.float32),
            jax.ShapeDtypeStruct((H, B), jnp.float32),
            jax.ShapeDtypeStruct((H, B), jnp.float32),
        ),
        grid_spec=pltpu.PrefetchScalarGridSpec(
            num_scalar_prefetch=0,
            grid=(nc,),
            in_specs=[
                pl.BlockSpec((Tc, Ip, B), lambda c: (c, 0, 0)),   # x chunk (time-major)
                pl.BlockSpec((H, B), lambda c: (0, 0)),           # h0^T
                pl.BlockSpec((H, B), lambda c: (0, 0)),           # c0^T
                pl.BlockSpec((G, Ip), lambda c: (0, 0)),          # W_ih
                pl.BlockSpec((G, 1), lambda c: (0, 0)),           # b_ih + b_hh
                pl.BlockSpec((G, H), lambda c: (0, 0)),           # W_hh
                pl.BlockSpec((O, H), lambda c: (0, 0)),           # W_fc
                pl.BlockSpec((O, 1), lambda c: (0, 0)),           # b_fc
            ],
            out_specs=[
                pl.BlockSpec((O, B), lambda c: (0, 0)),           # fc output (transposed)
                pl.BlockSpec((H, B), lambda c: (0, 0)),           # h_n (resident state)
                pl.BlockSpec((H, B), lambda c: (0, 0)),           # c_n (resident state)
            ],
        ),
        compiler_params=pltpu.CompilerParams(
            dimension_semantics=("arbitrary",)),
    )(x_t, h0_t, c0_t, w_ih, b_sum, params["w_hh"], params["w_fc"], b_fc)

    out = out_t.T                     # (B, O)
    h_n = hn_t.T                      # (B, H)
    c_n = cn_t.T                      # (B, H)
    return out, (h_n[None], c_n[None])


def make_params(key, in_size, hidden_size, out_size):
    """Deterministic init mimicking PyTorch's uniform(-1/sqrt(H), 1/sqrt(H))."""
    k = 1.0 / jnp.sqrt(jnp.float32(hidden_size))
    keys = jax.random.split(key, 6)
    u = lambda kk, shape: jax.random.uniform(kk, shape, jnp.float32, -k, k)
    return {
        "w_ih": u(keys[0], (4 * hidden_size, in_size)),
        "w_hh": u(keys[1], (4 * hidden_size, hidden_size)),
        "b_ih": u(keys[2], (4 * hidden_size,)),
        "b_hh": u(keys[3], (4 * hidden_size,)),
        "w_fc": u(keys[4], (out_size, hidden_size)),
        "b_fc": u(keys[5], (out_size,)),
    }


def lstm_reference(x, params, h0, c0):
    """Pure-JAX reference (lax.scan) mirroring torch.nn.LSTM semantics."""
    H = h0.shape[-1]
    w_ih_t = params["w_ih"].T
    w_hh_t = params["w_hh"].T
    b = params["b_ih"] + params["b_hh"]

    def step(carry, x_t):
        h, c = carry
        gates = (x_t @ w_ih_t + b) + h @ w_hh_t
        i = jax.nn.sigmoid(gates[:, 0 * H:1 * H])
        f = jax.nn.sigmoid(gates[:, 1 * H:2 * H])
        g = jnp.tanh(gates[:, 2 * H:3 * H])
        o = jax.nn.sigmoid(gates[:, 3 * H:4 * H])
        c = f * c + i * g
        h = o * jnp.tanh(c)
        return (h, c), h

    (h_n, c_n), _ = lax.scan(step, (h0, c0), jnp.transpose(x, (1, 0, 2)))
    out = h_n @ params["w_fc"].T + params["b_fc"]
    return out, (h_n[None], c_n[None])


if __name__ == "__main__":
    # Small shapes consistent with the module: batch=16, seq=16, in=4, hidden=32, out=1.
    B, T, I, H, O = 16, 16, 4, 32, 1

    key = jax.random.PRNGKey(0)
    kx, kp = jax.random.split(key)
    x = jax.random.normal(kx, (B, T, I), dtype=jnp.float32)
    params = make_params(kp, I, H, O)
    h0 = jnp.zeros((B, H), jnp.float32)
    c0 = jnp.zeros((B, H), jnp.float32)

    out, (h_n, c_n) = lstm_forward(x, params, h0, c0)
    jax.block_until_ready((out, h_n, c_n))

    out_ref, (h_ref, c_ref) = lstm_reference(x, params, h0, c0)
    # f32 summation-order differences compound slightly over T=16 recurrent steps.
    assert jnp.allclose(out, out_ref, atol=1e-4, rtol=1e-4), float(jnp.max(jnp.abs(out - out_ref)))
    assert jnp.allclose(h_n, h_ref, atol=1e-4, rtol=1e-4), float(jnp.max(jnp.abs(h_n - h_ref)))
    assert jnp.allclose(c_n, c_ref, atol=1e-4, rtol=1e-4), float(jnp.max(jnp.abs(c_n - c_ref)))

    print("KERNEL_OK")
</pallas_src>

<mosaic_0001>
module attributes {stable_mosaic.version = 11 : i64} {
  func.func @lstm_recurrent_kernel(%arg0: i32, %arg1: memref<16x8x16xf32, #tpu.memory_space<vmem>>, %arg2: memref<32x16xf32, #tpu.memory_space<vmem>>, %arg3: memref<32x16xf32, #tpu.memory_space<vmem>>, %arg4: memref<128x8xf32, #tpu.memory_space<vmem>>, %arg5: memref<128x1xf32, #tpu.memory_space<vmem>>, %arg6: memref<128x32xf32, #tpu.memory_space<vmem>>, %arg7: memref<1x32xf32, #tpu.memory_space<vmem>>, %arg8: memref<1x1xf32, #tpu.memory_space<vmem>>, %arg9: memref<1x16xf32, #tpu.memory_space<vmem>>, %arg10: memref<32x16xf32, #tpu.memory_space<vmem>>, %arg11: memref<32x16xf32, #tpu.memory_space<vmem>>) attributes {dimension_semantics = [#tpu.dimension_semantics<arbitrary>], iteration_bounds = array<i64: 1>, scalar_prefetch = 0 : i64, scratch_operands = 0 : i64, tpu.core_type = #tpu.core_type<tc>, window_params = [{transform_indices = @transform_0, window_bounds = array<i64: 16, 8, 16>}, {pipeline_mode = #tpu.pipeline_mode<synchronous>, transform_indices = @transform_1, window_bounds = array<i64: 32, 16>}, {pipeline_mode = #tpu.pipeline_mode<synchronous>, transform_indices = @transform_2, window_bounds = array<i64: 32, 16>}, {pipeline_mode = #tpu.pipeline_mode<synchronous>, transform_indices = @transform_3, window_bounds = array<i64: 128, 8>}, {pipeline_mode = #tpu.pipeline_mode<synchronous>, transform_indices = @transform_4, window_bounds = array<i64: 128, 1>}, {pipeline_mode = #tpu.pipeline_mode<synchronous>, transform_indices = @transform_5, window_bounds = array<i64: 128, 32>}, {pipeline_mode = #tpu.pipeline_mode<synchronous>, transform_indices = @transform_6, window_bounds = array<i64: 1, 32>}, {pipeline_mode = #tpu.pipeline_mode<synchronous>, transform_indices = @transform_7, window_bounds = array<i64: 1, 1>}, {pipeline_mode = #tpu.pipeline_mode<synchronous>, transform_indices = @transform_8, window_bounds = array<i64: 1, 16>}, {pipeline_mode = #tpu.pipeline_mode<synchronous>, transform_indices = @transform_9, window_bounds = array<i64: 32, 16>}, {pipeline_mode = #tpu.pipeline_mode<synchronous>, transform_indices = @transform_10, window_bounds = array<i64: 32, 16>}]} {
    %c0_i32 = arith.constant 0 : i32
    %0 = arith.cmpi eq, %arg0, %c0_i32 : i32
    %1 = arith.extui %0 : i1 to i32
    %c0_i32_0 = arith.constant 0 : i32
    %2 = arith.cmpi ne, %1, %c0_i32_0 : i32
    scf.if %2 {
      %c0_128 = arith.constant 0 : index
      %c0_129 = arith.constant 0 : index
      %511 = vector.load %arg2[%c0_128, %c0_129] : memref<32x16xf32, #tpu.memory_space<vmem>>, vector<32x16xf32>
      %c0_130 = arith.constant 0 : index
      %c0_131 = arith.constant 0 : index
      %512 = vector.load %arg10[%c0_130, %c0_131] : memref<32x16xf32, #tpu.memory_space<vmem>>, vector<32x16xf32>
      tpu.vector_store %arg10[%c0_130, %c0_131], %511 {strides = array<i32>} : memref<32x16xf32, #tpu.memory_space<vmem>>, vector<32x16xf32>,
      %c0_132 = arith.constant 0 : index
      %c0_133 = arith.constant 0 : index
      %513 = vector.load %arg3[%c0_132, %c0_133] : memref<32x16xf32, #tpu.memory_space<vmem>>, vector<32x16xf32>
      %c0_134 = arith.constant 0 : index
      %c0_135 = arith.constant 0 : index
      %514 = vector.load %arg11[%c0_134, %c0_135] : memref<32x16xf32, #tpu.memory_space<vmem>>, vector<32x16xf32>
      tpu.vector_store %arg11[%c0_134, %c0_135], %513 {strides = array<i32>} : memref<32x16xf32, #tpu.memory_space<vmem>>, vector<32x16xf32>,
    } else {
    }
    %c0 = arith.constant 0 : index
    %c0_1 = arith.constant 0 : index
    %3 = vector.load %arg4[%c0, %c0_1] : memref<128x8xf32, #tpu.memory_space<vmem>>, vector<128x8xf32>
    %c0_2 = arith.constant 0 : index
    %c0_3 = arith.constant 0 : index
    %4 = vector.load %arg6[%c0_2, %c0_3] : memref<128x32xf32, #tpu.memory_space<vmem>>, vector<128x32xf32>
    %c0_4 = arith.constant 0 : index
    %c0_5 = arith.constant 0 : index
    %5 = vector.load %arg5[%c0_4, %c0_5] : memref<128x1xf32, #tpu.memory_space<vmem>>, vector<128x1xf32>
    %6 = vector.shape_cast %5 : vector<128x1xf32> to vector<128x1xf32>
    %7 = vector.broadcast %6 : vector<128x1xf32> to vector<128x16xf32>
    %c0_6 = arith.constant 0 : index
    %c0_7 = arith.constant 0 : index
    %8 = vector.load %arg10[%c0_6, %c0_7] : memref<32x16xf32, #tpu.memory_space<vmem>>, vector<32x16xf32>
    %c0_8 = arith.constant 0 : index
    %c0_9 = arith.constant 0 : index
    %9 = vector.load %arg11[%c0_8, %c0_9] : memref<32x16xf32, #tpu.memory_space<vmem>>, vector<32x16xf32>
    %c0_10 = arith.constant 0 : index
    %c0_11 = arith.constant 0 : index
    %c0_12 = arith.constant 0 : index
    %10 = vector.load %arg1[%c0_10, %c0_11, %c0_12] : memref<16x8x16xf32, #tpu.memory_space<vmem>>, vector<1x8x16xf32>
    %11 = vector.shape_cast %10 : vector<1x8x16xf32> to vector<8x16xf32>
    %cst = arith.constant dense<0.000000e+00> : vector<128x16xf32>
    %12 = tpu.matmul %3, %11, %cst {dimension_numbers = #tpu.dot_dimension_numbers<[1], [0], [0], [1], [0, 0, 1, 1], [], []>} : vector<128x8xf32>, vector<8x16xf32>, vector<128x16xf32> -> vector<128x16xf32>
    %13 = arith.addf %12, %7 : vector<128x16xf32>
    %cst_13 = arith.constant dense<0.000000e+00> : vector<128x16xf32>
    %14 = tpu.matmul %4, %8, %cst_13 {dimension_numbers = #tpu.dot_dimension_numbers<[1], [0], [0], [1], [0, 0, 1, 1], [], []>} : vector<128x32xf32>, vector<32x16xf32>, vector<128x16xf32> -> vector<128x16xf32>
    %15 = arith.addf %13, %14 : vector<128x16xf32>
    %16 = vector.extract_strided_slice %15 {offsets = [0, 0], sizes = [32, 16], strides = [1, 1]} : vector<128x16xf32> to vector<32x16xf32>
    %17 = arith.negf %16 : vector<32x16xf32>
    %18 = math.exp %17 : vector<32x16xf32>
    %cst_14 = arith.constant 1.000000e+00 : f32
    %19 = vector.broadcast %cst_14 : f32 to vector<32x16xf32>
    %20 = arith.addf %19, %18 : vector<32x16xf32>
    %21 = arith.divf %19, %20 : vector<32x16xf32>
    %22 = vector.extract_strided_slice %15 {offsets = [32, 0], sizes = [32, 16], strides = [1, 1]} : vector<128x16xf32> to vector<32x16xf32>
    %23 = arith.negf %22 : vector<32x16xf32>
    %24 = math.exp %23 : vector<32x16xf32>
    %cst_15 = arith.constant 1.000000e+00 : f32
    %25 = vector.broadcast %cst_15 : f32 to vector<32x16xf32>
    %26 = arith.addf %25, %24 : vector<32x16xf32>
    %27 = arith.divf %25, %26 : vector<32x16xf32>
    %28 = vector.extract_strided_slice %15 {offsets = [64, 0], sizes = [32, 16], strides = [1, 1]} : vector<128x16xf32> to vector<32x16xf32>
    %29 = math.tanh %28 : vector<32x16xf32>
    %30 = vector.extract_strided_slice %15 {offsets = [96, 0], sizes = [32, 16], strides = [1, 1]} : vector<128x16xf32> to vector<32x16xf32>
    %31 = arith.negf %30 : vector<32x16xf32>
    %32 = math.exp %31 : vector<32x16xf32>
    %cst_16 = arith.constant 1.000000e+00 : f32
    %33 = vector.broadcast %cst_16 : f32 to vector<32x16xf32>
    %34 = arith.addf %33, %32 : vector<32x16xf32>
    %35 = arith.divf %33, %34 : vector<32x16xf32>
    %36 = arith.mulf %27, %9 : vector<32x16xf32>
    %37 = arith.mulf %21, %29 : vector<32x16xf32>
    %38 = arith.addf %36, %37 : vector<32x16xf32>
    %39 = math.tanh %38 : vector<32x16xf32>
    %40 = arith.mulf %35, %39 : vector<32x16xf32>
    %c1 = arith.constant 1 : index
    %c0_17 = arith.constant 0 : index
    %c0_18 = arith.constant 0 : index
    %41 = vector.load %arg1[%c1, %c0_17, %c0_18] : memref<16x8x16xf32, #tpu.memory_space<vmem>>, vector<1x8x16xf32>
    %42 = vector.shape_cast %41 : vector<1x8x16xf32> to vector<8x16xf32>
    %cst_19 = arith.constant dense<0.000000e+00> : vector<128x16xf32>
    %43 = tpu.matmul %3, %42, %cst_19 {dimension_numbers = #tpu.dot_dimension_numbers<[1], [0], [0], [1], [0, 0, 1, 1], [], []>} : vector<128x8xf32>, vector<8x16xf32>, vector<128x16xf32> -> vector<128x16xf32>
    %44 = arith.addf %43, %7 : vector<128x16xf32>
    %cst_20 = arith.constant dense<0.000000e+00> : vector<128x16xf32>
    %45 = tpu.matmul %4, %40, %cst_20 {dimension_numbers = #tpu.dot_dimension_numbers<[1], [0], [0], [1], [0, 0, 1, 1], [], []>} : vector<128x32xf32>, vector<32x16xf32>, vector<128x16xf32> -> vector<128x16xf32>
    %46 = arith.addf %44, %45 : vector<128x16xf32>
    %47 = vector.extract_strided_slice %46 {offsets = [0, 0], sizes = [32, 16], strides = [1, 1]} : vector<128x16xf32> to vector<32x16xf32>
    %48 = arith.negf %47 : vector<32x16xf32>
    %49 = math.exp %48 : vector<32x16xf32>
    %cst_21 = arith.constant 1.000000e+00 : f32
    %50 = vector.broadcast %cst_21 : f32 to vector<32x16xf32>
    %51 = arith.addf %50, %49 : vector<32x16xf32>
    %52 = arith.divf %50, %51 : vector<32x16xf32>
    %53 = vector.extract_strided_slice %46 {offsets = [32, 0], sizes = [32, 16], strides = [1, 1]} : vector<128x16xf32> to vector<32x16xf32>
    %54 = arith.negf %53 : vector<32x16xf32>
    %55 = math.exp %54 : vector<32x16xf32>
    %cst_22 = arith.constant 1.000000e+00 : f32
    %56 = vector.broadcast %cst_22 : f32 to vector<32x16xf32>
    %57 = arith.addf %56, %55 : vector<32x16xf32>
    %58 = arith.divf %56, %57 : vector<32x16xf32>
    %59 = vector.extract_strided_slice %46 {offsets = [64, 0], sizes = [32, 16], strides = [1, 1]} : vector<128x16xf32> to vector<32x16xf32>
    %60 = math.tanh %59 : vector<32x16xf32>
    %61 = vector.extract_strided_slice %46 {offsets = [96, 0], sizes = [32, 16], strides = [1, 1]} : vector<128x16xf32> to vector<32x16xf32>
    %62 = arith.negf %61 : vector<32x16xf32>
    %63 = math.exp %62 : vector<32x16xf32>
    %cst_23 = arith.constant 1.000000e+00 : f32
    %64 = vector.broadcast %cst_23 : f32 to vector<32x16xf32>
    %65 = arith.addf %64, %63 : vector<32x16xf32>
    %66 = arith.divf %64, %65 : vector<32x16xf32>
    %67 = arith.mulf %58, %38 : vector<32x16xf32>
    %68 = arith.mulf %52, %60 : vector<32x16xf32>
    %69 = arith.addf %67, %68 : vector<32x16xf32>
    %70 = math.tanh %69 : vector<32x16xf32>
    %71 = arith.mulf %66, %70 : vector<32x16xf32>
    %c2 = arith.constant 2 : index
    %c0_24 = arith.constant 0 : index
    %c0_25 = arith.constant 0 : index
    %72 = vector.load %arg1[%c2, %c0_24, %c0_25] : memref<16x8x16xf32, #tpu.memory_space<vmem>>, vector<1x8x16xf32>
    %73 = vector.shape_cast %72 : vector<1x8x16xf32> to vector<8x16xf32>
    %cst_26 = arith.constant dense<0.000000e+00> : vector<128x16xf32>
    %74 = tpu.matmul %3, %73, %cst_26 {dimension_numbers = #tpu.dot_dimension_numbers<[1], [0], [0], [1], [0, 0, 1, 1], [], []>} : vector<128x8xf32>, vector<8x16xf32>, vector<128x16xf32> -> vector<128x16xf32>
    %75 = arith.addf %74, %7 : vector<128x16xf32>
    %cst_27 = arith.constant dense<0.000000e+00> : vector<128x16xf32>
    %76 = tpu.matmul %4, %71, %cst_27 {dimension_numbers = #tpu.dot_dimension_numbers<[1], [0], [0], [1], [0, 0, 1, 1], [], []>} : vector<128x32xf32>, vector<32x16xf32>, vector<128x16xf32> -> vector<128x16xf32>
    %77 = arith.addf %75, %76 : vector<128x16xf32>
    %78 = vector.extract_strided_slice %77 {offsets = [0, 0], sizes = [32, 16], strides = [1, 1]} : vector<128x16xf32> to vector<32x16xf32>
    %79 = arith.negf %78 : vector<32x16xf32>
    %80 = math.exp %79 : vector<32x16xf32>
    %cst_28 = arith.constant 1.000000e+00 : f32
    %81 = vector.broadcast %cst_28 : f32 to vector<32x16xf32>
    %82 = arith.addf %81, %80 : vector<32x16xf32>
    %83 = arith.divf %81, %82 : vector<32x16xf32>
    %84 = vector.extract_strided_slice %77 {offsets = [32, 0], sizes = [32, 16], strides = [1, 1]} : vector<128x16xf32> to vector<32x16xf32>
    %85 = arith.negf %84 : vector<32x16xf32>
    %86 = math.exp %85 : vector<32x16xf32>
    %cst_29 = arith.constant 1.000000e+00 : f32
    %87 = vector.broadcast %cst_29 : f32 to vector<32x16xf32>
    %88 = arith.addf %87, %86 : vector<32x16xf32>
    %89 = arith.divf %87, %88 : vector<32x16xf32>
    %90 = vector.extract_strided_slice %77 {offsets = [64, 0], sizes = [32, 16], strides = [1, 1]} : vector<128x16xf32> to vector<32x16xf32>
    %91 = math.tanh %90 : vector<32x16xf32>
    %92 = vector.extract_strided_slice %77 {offsets = [96, 0], sizes = [32, 16], strides = [1, 1]} : vector<128x16xf32> to vector<32x16xf32>
    %93 = arith.negf %92 : vector<32x16xf32>
    %94 = math.exp %93 : vector<32x16xf32>
    %cst_30 = arith.constant 1.000000e+00 : f32
    %95 = vector.broadcast %cst_30 : f32 to vector<32x16xf32>
    %96 = arith.addf %95, %94 : vector<32x16xf32>
    %97 = arith.divf %95, %96 : vector<32x16xf32>
    %98 = arith.mulf %89, %69 : vector<32x16xf32>
    %99 = arith.mulf %83, %91 : vector<32x16xf32>
    %100 = arith.addf %98, %99 : vector<32x16xf32>
    %101 = math.tanh %100 : vector<32x16xf32>
    %102 = arith.mulf %97, %101 : vector<32x16xf32>
    %c3 = arith.constant 3 : index
    %c0_31 = arith.constant 0 : index
    %c0_32 = arith.constant 0 : index
    %103 = vector.load %arg1[%c3, %c0_31, %c0_32] : memref<16x8x16xf32, #tpu.memory_space<vmem>>, vector<1x8x16xf32>
    %104 = vector.shape_cast %103 : vector<1x8x16xf32> to vector<8x16xf32>
    %cst_33 = arith.constant dense<0.000000e+00> : vector<128x16xf32>
    %105 = tpu.matmul %3, %104, %cst_33 {dimension_numbers = #tpu.dot_dimension_numbers<[1], [0], [0], [1], [0, 0, 1, 1], [], []>} : vector<128x8xf32>, vector<8x16xf32>, vector<128x16xf32> -> vector<128x16xf32>
    %106 = arith.addf %105, %7 : vector<128x16xf32>
    %cst_34 = arith.constant dense<0.000000e+00> : vector<128x16xf32>
    %107 = tpu.matmul %4, %102, %cst_34 {dimension_numbers = #tpu.dot_dimension_numbers<[1], [0], [0], [1], [0, 0, 1, 1], [], []>} : vector<128x32xf32>, vector<32x16xf32>, vector<128x16xf32> -> vector<128x16xf32>
    %108 = arith.addf %106, %107 : vector<128x16xf32>
    %109 = vector.extract_strided_slice %108 {offsets = [0, 0], sizes = [32, 16], strides = [1, 1]} : vector<128x16xf32> to vector<32x16xf32>
    %110 = arith.negf %109 : vector<32x16xf32>
    %111 = math.exp %110 : vector<32x16xf32>
    %cst_35 = arith.constant 1.000000e+00 : f32
    %112 = vector.broadcast %cst_35 : f32 to vector<32x16xf32>
    %113 = arith.addf %112, %111 : vector<32x16xf32>
    %114 = arith.divf %112, %113 : vector<32x16xf32>
    %115 = vector.extract_strided_slice %108 {offsets = [32, 0], sizes = [32, 16], strides = [1, 1]} : vector<128x16xf32> to vector<32x16xf32>
    %116 = arith.negf %115 : vector<32x16xf32>
    %117 = math.exp %116 : vector<32x16xf32>
    %cst_36 = arith.constant 1.000000e+00 : f32
    %118 = vector.broadcast %cst_36 : f32 to vector<32x16xf32>
    %119 = arith.addf %118, %117 : vector<32x16xf32>
    %120 = arith.divf %118, %119 : vector<32x16xf32>
    %121 = vector.extract_strided_slice %108 {offsets = [64, 0], sizes = [32, 16], strides = [1, 1]} : vector<128x16xf32> to vector<32x16xf32>
    %122 = math.tanh %121 : vector<32x16xf32>
    %123 = vector.extract_strided_slice %108 {offsets = [96, 0], sizes = [32, 16], strides = [1, 1]} : vector<128x16xf32> to vector<32x16xf32>
    %124 = arith.negf %123 : vector<32x16xf32>
    %125 = math.exp %124 : vector<32x16xf32>
    %cst_37 = arith.constant 1.000000e+00 : f32
    %126 = vector.broadcast %cst_37 : f32 to vector<32x16xf32>
    %127 = arith.addf %126, %125 : vector<32x16xf32>
    %128 = arith.divf %126, %127 : vector<32x16xf32>
    %129 = arith.mulf %120, %100 : vector<32x16xf32>
    %130 = arith.mulf %114, %122 : vector<32x16xf32>
    %131 = arith.addf %129, %130 : vector<32x16xf32>
    %132 = math.tanh %131 : vector<32x16xf32>
    %133 = arith.mulf %128, %132 : vector<32x16xf32>
    %c4 = arith.constant 4 : index
    %c0_38 = arith.constant 0 : index
    %c0_39 = arith.constant 0 : index
    %134 = vector.load %arg1[%c4, %c0_38, %c0_39] : memref<16x8x16xf32, #tpu.memory_space<vmem>>, vector<1x8x16xf32>
    %135 = vector.shape_cast %134 : vector<1x8x16xf32> to vector<8x16xf32>
    %cst_40 = arith.constant dense<0.000000e+00> : vector<128x16xf32>
    %136 = tpu.matmul %3, %135, %cst_40 {dimension_numbers = #tpu.dot_dimension_numbers<[1], [0], [0], [1], [0, 0, 1, 1], [], []>} : vector<128x8xf32>, vector<8x16xf32>, vector<128x16xf32> -> vector<128x16xf32>
    %137 = arith.addf %136, %7 : vector<128x16xf32>
    %cst_41 = arith.constant dense<0.000000e+00> : vector<128x16xf32>
    %138 = tpu.matmul %4, %133, %cst_41 {dimension_numbers = #tpu.dot_dimension_numbers<[1], [0], [0], [1], [0, 0, 1, 1], [], []>} : vector<128x32xf32>, vector<32x16xf32>, vector<128x16xf32> -> vector<128x16xf32>
    %139 = arith.addf %137, %138 : vector<128x16xf32>
    %140 = vector.extract_strided_slice %139 {offsets = [0, 0], sizes = [32, 16], strides = [1, 1]} : vector<128x16xf32> to vector<32x16xf32>
    %141 = arith.negf %140 : vector<32x16xf32>
    %142 = math.exp %141 : vector<32x16xf32>
    %cst_42 = arith.constant 1.000000e+00 : f32
    %143 = vector.broadcast %cst_42 : f32 to vector<32x16xf32>
    %144 = arith.addf %143, %142 : vector<32x16xf32>
    %145 = arith.divf %143, %144 : vector<32x16xf32>
    %146 = vector.extract_strided_slice %139 {offsets = [32, 0], sizes = [32, 16], strides = [1, 1]} : vector<128x16xf32> to vector<32x16xf32>
    %147 = arith.negf %146 : vector<32x16xf32>
    %148 = math.exp %147 : vector<32x16xf32>
    %cst_43 = arith.constant 1.000000e+00 : f32
    %149 = vector.broadcast %cst_43 : f32 to vector<32x16xf32>
    %150 = arith.addf %149, %148 : vector<32x16xf32>
    %151 = arith.divf %149, %150 : vector<32x16xf32>
    %152 = vector.extract_strided_slice %139 {offsets = [64, 0], sizes = [32, 16], strides = [1, 1]} : vector<128x16xf32> to vector<32x16xf32>
    %153 = math.tanh %152 : vector<32x16xf32>
    %154 = vector.extract_strided_slice %139 {offsets = [96, 0], sizes = [32, 16], strides = [1, 1]} : vector<128x16xf32> to vector<32x16xf32>
    %155 = arith.negf %154 : vector<32x16xf32>
    %156 = math.exp %155 : vector<32x16xf32>
    %cst_44 = arith.constant 1.000000e+00 : f32
    %157 = vector.broadcast %cst_44 : f32 to vector<32x16xf32>
    %158 = arith.addf %157, %156 : vector<32x16xf32>
    %159 = arith.divf %157, %158 : vector<32x16xf32>
    %160 = arith.mulf %151, %131 : vector<32x16xf32>
    %161 = arith.mulf %145, %153 : vector<32x16xf32>
    %162 = arith.addf %160, %161 : vector<32x16xf32>
    %163 = math.tanh %162 : vector<32x16xf32>
    %164 = arith.mulf %159, %163 : vector<32x16xf32>
    %c5 = arith.constant 5 : index
    %c0_45 = arith.constant 0 : index
    %c0_46 = arith.constant 0 : index
    %165 = vector.load %arg1[%c5, %c0_45, %c0_46] : memref<16x8x16xf32, #tpu.memory_space<vmem>>, vector<1x8x16xf32>
    %166 = vector.shape_cast %165 : vector<1x8x16xf32> to vector<8x16xf32>
    %cst_47 = arith.constant dense<0.000000e+00> : vector<128x16xf32>
    %167 = tpu.matmul %3, %166, %cst_47 {dimension_numbers = #tpu.dot_dimension_numbers<[1], [0], [0], [1], [0, 0, 1, 1], [], []>} : vector<128x8xf32>, vector<8x16xf32>, vector<128x16xf32> -> vector<128x16xf32>
    %168 = arith.addf %167, %7 : vector<128x16xf32>
    %cst_48 = arith.constant dense<0.000000e+00> : vector<128x16xf32>
    %169 = tpu.matmul %4, %164, %cst_48 {dimension_numbers = #tpu.dot_dimension_numbers<[1], [0], [0], [1], [0, 0, 1, 1], [], []>} : vector<128x32xf32>, vector<32x16xf32>, vector<128x16xf32> -> vector<128x16xf32>
    %170 = arith.addf %168, %169 : vector<128x16xf32>
    %171 = vector.extract_strided_slice %170 {offsets = [0, 0], sizes = [32, 16], strides = [1, 1]} : vector<128x16xf32> to vector<32x16xf32>
    %172 = arith.negf %171 : vector<32x16xf32>
    %173 = math.exp %172 : vector<32x16xf32>
    %cst_49 = arith.constant 1.000000e+00 : f32
    %174 = vector.broadcast %cst_49 : f32 to vector<32x16xf32>
    %175 = arith.addf %174, %173 : vector<32x16xf32>
    %176 = arith.divf %174, %175 : vector<32x16xf32>
    %177 = vector.extract_strided_slice %170 {offsets = [32, 0], sizes = [32, 16], strides = [1, 1]} : vector<128x16xf32> to vector<32x16xf32>
    %178 = arith.negf %177 : vector<32x16xf32>
    %179 = math.exp %178 : vector<32x16xf32>
    %cst_50 = arith.constant 1.000000e+00 : f32
    %180 = vector.broadcast %cst_50 : f32 to vector<32x16xf32>
    %181 = arith.addf %180, %179 : vector<32x16xf32>
    %182 = arith.divf %180, %181 : vector<32x16xf32>
    %183 = vector.extract_strided_slice %170 {offsets = [64, 0], sizes = [32, 16], strides = [1, 1]} : vector<128x16xf32> to vector<32x16xf32>
    %184 = math.tanh %183 : vector<32x16xf32>
    %185 = vector.extract_strided_slice %170 {offsets = [96, 0], sizes = [32, 16], strides = [1, 1]} : vector<128x16xf32> to vector<32x16xf32>
    %186 = arith.negf %185 : vector<32x16xf32>
    %187 = math.exp %186 : vector<32x16xf32>
    %cst_51 = arith.constant 1.000000e+00 : f32
    %188 = vector.broadcast %cst_51 : f32 to vector<32x16xf32>
    %189 = arith.addf %188, %187 : vector<32x16xf32>
    %190 = arith.divf %188, %189 : vector<32x16xf32>
    %191 = arith.mulf %182, %162 : vector<32x16xf32>
    %192 = arith.mulf %176, %184 : vector<32x16xf32>
    %193 = arith.addf %191, %192 : vector<32x16xf32>
    %194 = math.tanh %193 : vector<32x16xf32>
    %195 = arith.mulf %190, %194 : vector<32x16xf32>
    %c6 = arith.constant 6 : index
    %c0_52 = arith.constant 0 : index
    %c0_53 = arith.constant 0 : index
    %196 = vector.load %arg1[%c6, %c0_52, %c0_53] : memref<16x8x16xf32, #tpu.memory_space<vmem>>, vector<1x8x16xf32>
    %197 = vector.shape_cast %196 : vector<1x8x16xf32> to vector<8x16xf32>
    %cst_54 = arith.constant dense<0.000000e+00> : vector<128x16xf32>
    %198 = tpu.matmul %3, %197, %cst_54 {dimension_numbers = #tpu.dot_dimension_numbers<[1], [0], [0], [1], [0, 0, 1, 1], [], []>} : vector<128x8xf32>, vector<8x16xf32>, vector<128x16xf32> -> vector<128x16xf32>
    %199 = arith.addf %198, %7 : vector<128x16xf32>
    %cst_55 = arith.constant dense<0.000000e+00> : vector<128x16xf32>
    %200 = tpu.matmul %4, %195, %cst_55 {dimension_numbers = #tpu.dot_dimension_numbers<[1], [0], [0], [1], [0, 0, 1, 1], [], []>} : vector<128x32xf32>, vector<32x16xf32>, vector<128x16xf32> -> vector<128x16xf32>
    %201 = arith.addf %199, %200 : vector<128x16xf32>
    %202 = vector.extract_strided_slice %201 {offsets = [0, 0], sizes = [32, 16], strides = [1, 1]} : vector<128x16xf32> to vector<32x16xf32>
    %203 = arith.negf %202 : vector<32x16xf32>
    %204 = math.exp %203 : vector<32x16xf32>
    %cst_56 = arith.constant 1.000000e+00 : f32
    %205 = vector.broadcast %cst_56 : f32 to vector<32x16xf32>
    %206 = arith.addf %205, %204 : vector<32x16xf32>
    %207 = arith.divf %205, %206 : vector<32x16xf32>
    %208 = vector.extract_strided_slice %201 {offsets = [32, 0], sizes = [32, 16], strides = [1, 1]} : vector<128x16xf32> to vector<32x16xf32>
    %209 = arith.negf %208 : vector<32x16xf32>
    %210 = math.exp %209 : vector<32x16xf32>
    %cst_57 = arith.constant 1.000000e+00 : f32
    %211 = vector.broadcast %cst_57 : f32 to vector<32x16xf32>
    %212 = arith.addf %211, %210 : vector<32x16xf32>
    %213 = arith.divf %211, %212 : vector<32x16xf32>
    %214 = vector.extract_strided_slice %201 {offsets = [64, 0], sizes = [32, 16], strides = [1, 1]} : vector<128x16xf32> to vector<32x16xf32>
    %215 = math.tanh %214 : vector<32x16xf32>
    %216 = vector.extract_strided_slice %201 {offsets = [96, 0], sizes = [32, 16], strides = [1, 1]} : vector<128x16xf32> to vector<32x16xf32>
    %217 = arith.negf %216 : vector<32x16xf32>
    %218 = math.exp %217 : vector<32x16xf32>
    %cst_58 = arith.constant 1.000000e+00 : f32
    %219 = vector.broadcast %cst_58 : f32 to vector<32x16xf32>
    %220 = arith.addf %219, %218 : vector<32x16xf32>
    %221 = arith.divf %219, %220 : vector<32x16xf32>
    %222 = arith.mulf %213, %193 : vector<32x16xf32>
    %223 = arith.mulf %207, %215 : vector<32x16xf32>
    %224 = arith.addf %222, %223 : vector<32x16xf32>
    %225 = math.tanh %224 : vector<32x16xf32>
    %226 = arith.mulf %221, %225 : vector<32x16xf32>
    %c7 = arith.constant 7 : index
    %c0_59 = arith.constant 0 : index
    %c0_60 = arith.constant 0 : index
    %227 = vector.load %arg1[%c7, %c0_59, %c0_60] : memref<16x8x16xf32, #tpu.memory_space<vmem>>, vector<1x8x16xf32>
    %228 = vector.shape_cast %227 : vector<1x8x16xf32> to vector<8x16xf32>
    %cst_61 = arith.constant dense<0.000000e+00> : vector<128x16xf32>
    %229 = tpu.matmul %3, %228, %cst_61 {dimension_numbers = #tpu.dot_dimension_numbers<[1], [0], [0], [1], [0, 0, 1, 1], [], []>} : vector<128x8xf32>, vector<8x16xf32>, vector<128x16xf32> -> vector<128x16xf32>
    %230 = arith.addf %229, %7 : vector<128x16xf32>
    %cst_62 = arith.constant dense<0.000000e+00> : vector<128x16xf32>
    %231 = tpu.matmul %4, %226, %cst_62 {dimension_numbers = #tpu.dot_dimension_numbers<[1], [0], [0], [1], [0, 0, 1, 1], [], []>} : vector<128x32xf32>, vector<32x16xf32>, vector<128x16xf32> -> vector<128x16xf32>
    %232 = arith.addf %230, %231 : vector<128x16xf32>
    %233 = vector.extract_strided_slice %232 {offsets = [0, 0], sizes = [32, 16], strides = [1, 1]} : vector<128x16xf32> to vector<32x16xf32>
    %234 = arith.negf %233 : vector<32x16xf32>
    %235 = math.exp %234 : vector<32x16xf32>
    %cst_63 = arith.constant 1.000000e+00 : f32
    %236 = vector.broadcast %cst_63 : f32 to vector<32x16xf32>
    %237 = arith.addf %236, %235 : vector<32x16xf32>
    %238 = arith.divf %236, %237 : vector<32x16xf32>
    %239 = vector.extract_strided_slice %232 {offsets = [32, 0], sizes = [32, 16], strides = [1, 1]} : vector<128x16xf32> to vector<32x16xf32>
    %240 = arith.negf %239 : vector<32x16xf32>
    %241 = math.exp %240 : vector<32x16xf32>
    %cst_64 = arith.constant 1.000000e+00 : f32
    %242 = vector.broadcast %cst_64 : f32 to vector<32x16xf32>
    %243 = arith.addf %242, %241 : vector<32x16xf32>
    %244 = arith.divf %242, %243 : vector<32x16xf32>
    %245 = vector.extract_strided_slice %232 {offsets = [64, 0], sizes = [32, 16], strides = [1, 1]} : vector<128x16xf32> to vector<32x16xf32>
    %246 = math.tanh %245 : vector<32x16xf32>
    %247 = vector.extract_strided_slice %232 {offsets = [96, 0], sizes = [32, 16], strides = [1, 1]} : vector<128x16xf32> to vector<32x16xf32>
    %248 = arith.negf %247 : vector<32x16xf32>
    %249 = math.exp %248 : vector<32x16xf32>
    %cst_65 = arith.constant 1.000000e+00 : f32
    %250 = vector.broadcast %cst_65 : f32 to vector<32x16xf32>
    %251 = arith.addf %250, %249 : vector<32x16xf32>
    %252 = arith.divf %250, %251 : vector<32x16xf32>
    %253 = arith.mulf %244, %224 : vector<32x16xf32>
    %254 = arith.mulf %238, %246 : vector<32x16xf32>
    %255 = arith.addf %253, %254 : vector<32x16xf32>
    %256 = math.tanh %255 : vector<32x16xf32>
    %257 = arith.mulf %252, %256 : vector<32x16xf32>
    %c8 = arith.constant 8 : index
    %c0_66 = arith.constant 0 : index
    %c0_67 = arith.constant 0 : index
    %258 = vector.load %arg1[%c8, %c0_66, %c0_67] : memref<16x8x16xf32, #tpu.memory_space<vmem>>, vector<1x8x16xf32>
    %259 = vector.shape_cast %258 : vector<1x8x16xf32> to vector<8x16xf32>
    %cst_68 = arith.constant dense<0.000000e+00> : vector<128x16xf32>
    %260 = tpu.matmul %3, %259, %cst_68 {dimension_numbers = #tpu.dot_dimension_numbers<[1], [0], [0], [1], [0, 0, 1, 1], [], []>} : vector<128x8xf32>, vector<8x16xf32>, vector<128x16xf32> -> vector<128x16xf32>
    %261 = arith.addf %260, %7 : vector<128x16xf32>
    %cst_69 = arith.constant dense<0.000000e+00> : vector<128x16xf32>
    %262 = tpu.matmul %4, %257, %cst_69 {dimension_numbers = #tpu.dot_dimension_numbers<[1], [0], [0], [1], [0, 0, 1, 1], [], []>} : vector<128x32xf32>, vector<32x16xf32>, vector<128x16xf32> -> vector<128x16xf32>
    %263 = arith.addf %261, %262 : vector<128x16xf32>
    %264 = vector.extract_strided_slice %263 {offsets = [0, 0], sizes = [32, 16], strides = [1, 1]} : vector<128x16xf32> to vector<32x16xf32>
    %265 = arith.negf %264 : vector<32x16xf32>
    %266 = math.exp %265 : vector<32x16xf32>
    %cst_70 = arith.constant 1.000000e+00 : f32
    %267 = vector.broadcast %cst_70 : f32 to vector<32x16xf32>
    %268 = arith.addf %267, %266 : vector<32x16xf32>
    %269 = arith.divf %267, %268 : vector<32x16xf32>
    %270 = vector.extract_strided_slice %263 {offsets = [32, 0], sizes = [32, 16], strides = [1, 1]} : vector<128x16xf32> to vector<32x16xf32>
    %271 = arith.negf %270 : vector<32x16xf32>
    %272 = math.exp %271 : vector<32x16xf32>
    %cst_71 = arith.constant 1.000000e+00 : f32
    %273 = vector.broadcast %cst_71 : f32 to vector<32x16xf32>
    %274 = arith.addf %273, %272 : vector<32x16xf32>
    %275 = arith.divf %273, %274 : vector<32x16xf32>
    %276 = vector.extract_strided_slice %263 {offsets = [64, 0], sizes = [32, 16], strides = [1, 1]} : vector<128x16xf32> to vector<32x16xf32>
    %277 = math.tanh %276 : vector<32x16xf32>
    %278 = vector.extract_strided_slice %263 {offsets = [96, 0], sizes = [32, 16], strides = [1, 1]} : vector<128x16xf32> to vector<32x16xf32>
    %279 = arith.negf %278 : vector<32x16xf32>
    %280 = math.exp %279 : vector<32x16xf32>
    %cst_72 = arith.constant 1.000000e+00 : f32
    %281 = vector.broadcast %cst_72 : f32 to vector<32x16xf32>
    %282 = arith.addf %281, %280 : vector<32x16xf32>
    %283 = arith.divf %281, %282 : vector<32x16xf32>
    %284 = arith.mulf %275, %255 : vector<32x16xf32>
    %285 = arith.mulf %269, %277 : vector<32x16xf32>
    %286 = arith.addf %284, %285 : vector<32x16xf32>
    %287 = math.tanh %286 : vector<32x16xf32>
    %288 = arith.mulf %283, %287 : vector<32x16xf32>
    %c9 = arith.constant 9 : index
    %c0_73 = arith.constant 0 : index
    %c0_74 = arith.constant 0 : index
    %289 = vector.load %arg1[%c9, %c0_73, %c0_74] : memref<16x8x16xf32, #tpu.memory_space<vmem>>, vector<1x8x16xf32>
    %290 = vector.shape_cast %289 : vector<1x8x16xf32> to vector<8x16xf32>
    %cst_75 = arith.constant dense<0.000000e+00> : vector<128x16xf32>
    %291 = tpu.matmul %3, %290, %cst_75 {dimension_numbers = #tpu.dot_dimension_numbers<[1], [0], [0], [1], [0, 0, 1, 1], [], []>} : vector<128x8xf32>, vector<8x16xf32>, vector<128x16xf32> -> vector<128x16xf32>
    %292 = arith.addf %291, %7 : vector<128x16xf32>
    %cst_76 = arith.constant dense<0.000000e+00> : vector<128x16xf32>
    %293 = tpu.matmul %4, %288, %cst_76 {dimension_numbers = #tpu.dot_dimension_numbers<[1], [0], [0], [1], [0, 0, 1, 1], [], []>} : vector<128x32xf32>, vector<32x16xf32>, vector<128x16xf32> -> vector<128x16xf32>
    %294 = arith.addf %292, %293 : vector<128x16xf32>
    %295 = vector.extract_strided_slice %294 {offsets = [0, 0], sizes = [32, 16], strides = [1, 1]} : vector<128x16xf32> to vector<32x16xf32>
    %296 = arith.negf %295 : vector<32x16xf32>
    %297 = math.exp %296 : vector<32x16xf32>
    %cst_77 = arith.constant 1.000000e+00 : f32
    %298 = vector.broadcast %cst_77 : f32 to vector<32x16xf32>
    %299 = arith.addf %298, %297 : vector<32x16xf32>
    %300 = arith.divf %298, %299 : vector<32x16xf32>
    %301 = vector.extract_strided_slice %294 {offsets = [32, 0], sizes = [32, 16], strides = [1, 1]} : vector<128x16xf32> to vector<32x16xf32>
    %302 = arith.negf %301 : vector<32x16xf32>
    %303 = math.exp %302 : vector<32x16xf32>
    %cst_78 = arith.constant 1.000000e+00 : f32
    %304 = vector.broadcast %cst_78 : f32 to vector<32x16xf32>
    %305 = arith.addf %304, %303 : vector<32x16xf32>
    %306 = arith.divf %304, %305 : vector<32x16xf32>
    %307 = vector.extract_strided_slice %294 {offsets = [64, 0], sizes = [32, 16], strides = [1, 1]} : vector<128x16xf32> to vector<32x16xf32>
    %308 = math.tanh %307 : vector<32x16xf32>
    %309 = vector.extract_strided_slice %294 {offsets = [96, 0], sizes = [32, 16], strides = [1, 1]} : vector<128x16xf32> to vector<32x16xf32>
    %310 = arith.negf %309 : vector<32x16xf32>
    %311 = math.exp %310 : vector<32x16xf32>
    %cst_79 = arith.constant 1.000000e+00 : f32
    %312 = vector.broadcast %cst_79 : f32 to vector<32x16xf32>
    %313 = arith.addf %312, %311 : vector<32x16xf32>
    %314 = arith.divf %312, %313 : vector<32x16xf32>
    %315 = arith.mulf %306, %286 : vector<32x16xf32>
    %316 = arith.mulf %300, %308 : vector<32x16xf32>
    %317 = arith.addf %315, %316 : vector<32x16xf32>
    %318 = math.tanh %317 : vector<32x16xf32>
    %319 = arith.mulf %314, %318 : vector<32x16xf32>
    %c10 = arith.constant 10 : index
    %c0_80 = arith.constant 0 : index
    %c0_81 = arith.constant 0 : index
    %320 = vector.load %arg1[%c10, %c0_80, %c0_81] : memref<16x8x16xf32, #tpu.memory_space<vmem>>, vector<1x8x16xf32>
    %321 = vector.shape_cast %320 : vector<1x8x16xf32> to vector<8x16xf32>
    %cst_82 = arith.constant dense<0.000000e+00> : vector<128x16xf32>
    %322 = tpu.matmul %3, %321, %cst_82 {dimension_numbers = #tpu.dot_dimension_numbers<[1], [0], [0], [1], [0, 0, 1, 1], [], []>} : vector<128x8xf32>, vector<8x16xf32>, vector<128x16xf32> -> vector<128x16xf32>
    %323 = arith.addf %322, %7 : vector<128x16xf32>
    %cst_83 = arith.constant dense<0.000000e+00> : vector<128x16xf32>
    %324 = tpu.matmul %4, %319, %cst_83 {dimension_numbers = #tpu.dot_dimension_numbers<[1], [0], [0], [1], [0, 0, 1, 1], [], []>} : vector<128x32xf32>, vector<32x16xf32>, vector<128x16xf32> -> vector<128x16xf32>
    %325 = arith.addf %323, %324 : vector<128x16xf32>
    %326 = vector.extract_strided_slice %325 {offsets = [0, 0], sizes = [32, 16], strides = [1, 1]} : vector<128x16xf32> to vector<32x16xf32>
    %327 = arith.negf %326 : vector<32x16xf32>
    %328 = math.exp %327 : vector<32x16xf32>
    %cst_84 = arith.constant 1.000000e+00 : f32
    %329 = vector.broadcast %cst_84 : f32 to vector<32x16xf32>
    %330 = arith.addf %329, %328 : vector<32x16xf32>
    %331 = arith.divf %329, %330 : vector<32x16xf32>
    %332 = vector.extract_strided_slice %325 {offsets = [32, 0], sizes = [32, 16], strides = [1, 1]} : vector<128x16xf32> to vector<32x16xf32>
    %333 = arith.negf %332 : vector<32x16xf32>
    %334 = math.exp %333 : vector<32x16xf32>
    %cst_85 = arith.constant 1.000000e+00 : f32
    %335 = vector.broadcast %cst_85 : f32 to vector<32x16xf32>
    %336 = arith.addf %335, %334 : vector<32x16xf32>
    %337 = arith.divf %335, %336 : vector<32x16xf32>
    %338 = vector.extract_strided_slice %325 {offsets = [64, 0], sizes = [32, 16], strides = [1, 1]} : vector<128x16xf32> to vector<32x16xf32>
    %339 = math.tanh %338 : vector<32x16xf32>
    %340 = vector.extract_strided_slice %325 {offsets = [96, 0], sizes = [32, 16], strides = [1, 1]} : vector<128x16xf32> to vector<32x16xf32>
    %341 = arith.negf %340 : vector<32x16xf32>
    %342 = math.exp %341 : vector<32x16xf32>
    %cst_86 = arith.constant 1.000000e+00 : f32
    %343 = vector.broadcast %cst_86 : f32 to vector<32x16xf32>
    %344 = arith.addf %343, %342 : vector<32x16xf32>
    %345 = arith.divf %343, %344 : vector<32x16xf32>
    %346 = arith.mulf %337, %317 : vector<32x16xf32>
    %347 = arith.mulf %331, %339 : vector<32x16xf32>
    %348 = arith.addf %346, %347 : vector<32x16xf32>
    %349 = math.tanh %348 : vector<32x16xf32>
    %350 = arith.mulf %345, %349 : vector<32x16xf32>
    %c11 = arith.constant 11 : index
    %c0_87 = arith.constant 0 : index
    %c0_88 = arith.constant 0 : index
    %351 = vector.load %arg1[%c11, %c0_87, %c0_88] : memref<16x8x16xf32, #tpu.memory_space<vmem>>, vector<1x8x16xf32>
    %352 = vector.shape_cast %351 : vector<1x8x16xf32> to vector<8x16xf32>
    %cst_89 = arith.constant dense<0.000000e+00> : vector<128x16xf32>
    %353 = tpu.matmul %3, %352, %cst_89 {dimension_numbers = #tpu.dot_dimension_numbers<[1], [0], [0], [1], [0, 0, 1, 1], [], []>} : vector<128x8xf32>, vector<8x16xf32>, vector<128x16xf32> -> vector<128x16xf32>
    %354 = arith.addf %353, %7 : vector<128x16xf32>
    %cst_90 = arith.constant dense<0.000000e+00> : vector<128x16xf32>
    %355 = tpu.matmul %4, %350, %cst_90 {dimension_numbers = #tpu.dot_dimension_numbers<[1], [0], [0], [1], [0, 0, 1, 1], [], []>} : vector<128x32xf32>, vector<32x16xf32>, vector<128x16xf32> -> vector<128x16xf32>
    %356 = arith.addf %354, %355 : vector<128x16xf32>
    %357 = vector.extract_strided_slice %356 {offsets = [0, 0], sizes = [32, 16], strides = [1, 1]} : vector<128x16xf32> to vector<32x16xf32>
    %358 = arith.negf %357 : vector<32x16xf32>
    %359 = math.exp %358 : vector<32x16xf32>
    %cst_91 = arith.constant 1.000000e+00 : f32
    %360 = vector.broadcast %cst_91 : f32 to vector<32x16xf32>
    %361 = arith.addf %360, %359 : vector<32x16xf32>
    %362 = arith.divf %360, %361 : vector<32x16xf32>
    %363 = vector.extract_strided_slice %356 {offsets = [32, 0], sizes = [32, 16], strides = [1, 1]} : vector<128x16xf32> to vector<32x16xf32>
    %364 = arith.negf %363 : vector<32x16xf32>
    %365 = math.exp %364 : vector<32x16xf32>
    %cst_92 = arith.constant 1.000000e+00 : f32
    %366 = vector.broadcast %cst_92 : f32 to vector<32x16xf32>
    %367 = arith.addf %366, %365 : vector<32x16xf32>
    %368 = arith.divf %366, %367 : vector<32x16xf32>
    %369 = vector.extract_strided_slice %356 {offsets = [64, 0], sizes = [32, 16], strides = [1, 1]} : vector<128x16xf32> to vector<32x16xf32>
    %370 = math.tanh %369 : vector<32x16xf32>
    %371 = vector.extract_strided_slice %356 {offsets = [96, 0], sizes = [32, 16], strides = [1, 1]} : vector<128x16xf32> to vector<32x16xf32>
    %372 = arith.negf %371 : vector<32x16xf32>
    %373 = math.exp %372 : vector<32x16xf32>
    %cst_93 = arith.constant 1.000000e+00 : f32
    %374 = vector.broadcast %cst_93 : f32 to vector<32x16xf32>
    %375 = arith.addf %374, %373 : vector<32x16xf32>
    %376 = arith.divf %374, %375 : vector<32x16xf32>
    %377 = arith.mulf %368, %348 : vector<32x16xf32>
    %378 = arith.mulf %362, %370 : vector<32x16xf32>
    %379 = arith.addf %377, %378 : vector<32x16xf32>
    %380 = math.tanh %379 : vector<32x16xf32>
    %381 = arith.mulf %376, %380 : vector<32x16xf32>
    %c12 = arith.constant 12 : index
    %c0_94 = arith.constant 0 : index
    %c0_95 = arith.constant 0 : index
    %382 = vector.load %arg1[%c12, %c0_94, %c0_95] : memref<16x8x16xf32, #tpu.memory_space<vmem>>, vector<1x8x16xf32>
    %383 = vector.shape_cast %382 : vector<1x8x16xf32> to vector<8x16xf32>
    %cst_96 = arith.constant dense<0.000000e+00> : vector<128x16xf32>
    %384 = tpu.matmul %3, %383, %cst_96 {dimension_numbers = #tpu.dot_dimension_numbers<[1], [0], [0], [1], [0, 0, 1, 1], [], []>} : vector<128x8xf32>, vector<8x16xf32>, vector<128x16xf32> -> vector<128x16xf32>
    %385 = arith.addf %384, %7 : vector<128x16xf32>
    %cst_97 = arith.constant dense<0.000000e+00> : vector<128x16xf32>
    %386 = tpu.matmul %4, %381, %cst_97 {dimension_numbers = #tpu.dot_dimension_numbers<[1], [0], [0], [1], [0, 0, 1, 1], [], []>} : vector<128x32xf32>, vector<32x16xf32>, vector<128x16xf32> -> vector<128x16xf32>
    %387 = arith.addf %385, %386 : vector<128x16xf32>
    %388 = vector.extract_strided_slice %387 {offsets = [0, 0], sizes = [32, 16], strides = [1, 1]} : vector<128x16xf32> to vector<32x16xf32>
    %389 = arith.negf %388 : vector<32x16xf32>
    %390 = math.exp %389 : vector<32x16xf32>
    %cst_98 = arith.constant 1.000000e+00 : f32
    %391 = vector.broadcast %cst_98 : f32 to vector<32x16xf32>
    %392 = arith.addf %391, %390 : vector<32x16xf32>
    %393 = arith.divf %391, %392 : vector<32x16xf32>
    %394 = vector.extract_strided_slice %387 {offsets = [32, 0], sizes = [32, 16], strides = [1, 1]} : vector<128x16xf32> to vector<32x16xf32>
    %395 = arith.negf %394 : vector<32x16xf32>
    %396 = math.exp %395 : vector<32x16xf32>
    %cst_99 = arith.constant 1.000000e+00 : f32
    %397 = vector.broadcast %cst_99 : f32 to vector<32x16xf32>
    %398 = arith.addf %397, %396 : vector<32x16xf32>
    %399 = arith.divf %397, %398 : vector<32x16xf32>
    %400 = vector.extract_strided_slice %387 {offsets = [64, 0], sizes = [32, 16], strides = [1, 1]} : vector<128x16xf32> to vector<32x16xf32>
    %401 = math.tanh %400 : vector<32x16xf32>
    %402 = vector.extract_strided_slice %387 {offsets = [96, 0], sizes = [32, 16], strides = [1, 1]} : vector<128x16xf32> to vector<32x16xf32>
    %403 = arith.negf %402 : vector<32x16xf32>
    %404 = math.exp %403 : vector<32x16xf32>
    %cst_100 = arith.constant 1.000000e+00 : f32
    %405 = vector.broadcast %cst_100 : f32 to vector<32x16xf32>
    %406 = arith.addf %405, %404 : vector<32x16xf32>
    %407 = arith.divf %405, %406 : vector<32x16xf32>
    %408 = arith.mulf %399, %379 : vector<32x16xf32>
    %409 = arith.mulf %393, %401 : vector<32x16xf32>
    %410 = arith.addf %408, %409 : vector<32x16xf32>
    %411 = math.tanh %410 : vector<32x16xf32>
    %412 = arith.mulf %407, %411 : vector<32x16xf32>
    %c13 = arith.constant 13 : index
    %c0_101 = arith.constant 0 : index
    %c0_102 = arith.constant 0 : index
    %413 = vector.load %arg1[%c13, %c0_101, %c0_102] : memref<16x8x16xf32, #tpu.memory_space<vmem>>, vector<1x8x16xf32>
    %414 = vector.shape_cast %413 : vector<1x8x16xf32> to vector<8x16xf32>
    %cst_103 = arith.constant dense<0.000000e+00> : vector<128x16xf32>
    %415 = tpu.matmul %3, %414, %cst_103 {dimension_numbers = #tpu.dot_dimension_numbers<[1], [0], [0], [1], [0, 0, 1, 1], [], []>} : vector<128x8xf32>, vector<8x16xf32>, vector<128x16xf32> -> vector<128x16xf32>
    %416 = arith.addf %415, %7 : vector<128x16xf32>
    %cst_104 = arith.constant dense<0.000000e+00> : vector<128x16xf32>
    %417 = tpu.matmul %4, %412, %cst_104 {dimension_numbers = #tpu.dot_dimension_numbers<[1], [0], [0], [1], [0, 0, 1, 1], [], []>} : vector<128x32xf32>, vector<32x16xf32>, vector<128x16xf32> -> vector<128x16xf32>
    %418 = arith.addf %416, %417 : vector<128x16xf32>
    %419 = vector.extract_strided_slice %418 {offsets = [0, 0], sizes = [32, 16], strides = [1, 1]} : vector<128x16xf32> to vector<32x16xf32>
    %420 = arith.negf %419 : vector<32x16xf32>
    %421 = math.exp %420 : vector<32x16xf32>
    %cst_105 = arith.constant 1.000000e+00 : f32
    %422 = vector.broadcast %cst_105 : f32 to vector<32x16xf32>
    %423 = arith.addf %422, %421 : vector<32x16xf32>
    %424 = arith.divf %422, %423 : vector<32x16xf32>
    %425 = vector.extract_strided_slice %418 {offsets = [32, 0], sizes = [32, 16], strides = [1, 1]} : vector<128x16xf32> to vector<32x16xf32>
    %426 = arith.negf %425 : vector<32x16xf32>
    %427 = math.exp %426 : vector<32x16xf32>
    %cst_106 = arith.constant 1.000000e+00 : f32
    %428 = vector.broadcast %cst_106 : f32 to vector<32x16xf32>
    %429 = arith.addf %428, %427 : vector<32x16xf32>
    %430 = arith.divf %428, %429 : vector<32x16xf32>
    %431 = vector.extract_strided_slice %418 {offsets = [64, 0], sizes = [32, 16], strides = [1, 1]} : vector<128x16xf32> to vector<32x16xf32>
    %432 = math.tanh %431 : vector<32x16xf32>
    %433 = vector.extract_strided_slice %418 {offsets = [96, 0], sizes = [32, 16], strides = [1, 1]} : vector<128x16xf32> to vector<32x16xf32>
    %434 = arith.negf %433 : vector<32x16xf32>
    %435 = math.exp %434 : vector<32x16xf32>
    %cst_107 = arith.constant 1.000000e+00 : f32
    %436 = vector.broadcast %cst_107 : f32 to vector<32x16xf32>
    %437 = arith.addf %436, %435 : vector<32x16xf32>
    %438 = arith.divf %436, %437 : vector<32x16xf32>
    %439 = arith.mulf %430, %410 : vector<32x16xf32>
    %440 = arith.mulf %424, %432 : vector<32x16xf32>
    %441 = arith.addf %439, %440 : vector<32x16xf32>
    %442 = math.tanh %441 : vector<32x16xf32>
    %443 = arith.mulf %438, %442 : vector<32x16xf32>
    %c14 = arith.constant 14 : index
    %c0_108 = arith.constant 0 : index
    %c0_109 = arith.constant 0 : index
    %444 = vector.load %arg1[%c14, %c0_108, %c0_109] : memref<16x8x16xf32, #tpu.memory_space<vmem>>, vector<1x8x16xf32>
    %445 = vector.shape_cast %444 : vector<1x8x16xf32> to vector<8x16xf32>
    %cst_110 = arith.constant dense<0.000000e+00> : vector<128x16xf32>
    %446 = tpu.matmul %3, %445, %cst_110 {dimension_numbers = #tpu.dot_dimension_numbers<[1], [0], [0], [1], [0, 0, 1, 1], [], []>} : vector<128x8xf32>, vector<8x16xf32>, vector<128x16xf32> -> vector<128x16xf32>
    %447 = arith.addf %446, %7 : vector<128x16xf32>
    %cst_111 = arith.constant dense<0.000000e+00> : vector<128x16xf32>
    %448 = tpu.matmul %4, %443, %cst_111 {dimension_numbers = #tpu.dot_dimension_numbers<[1], [0], [0], [1], [0, 0, 1, 1], [], []>} : vector<128x32xf32>, vector<32x16xf32>, vector<128x16xf32> -> vector<128x16xf32>
    %449 = arith.addf %447, %448 : vector<128x16xf32>
    %450 = vector.extract_strided_slice %449 {offsets = [0, 0], sizes = [32, 16], strides = [1, 1]} : vector<128x16xf32> to vector<32x16xf32>
    %451 = arith.negf %450 : vector<32x16xf32>
    %452 = math.exp %451 : vector<32x16xf32>
    %cst_112 = arith.constant 1.000000e+00 : f32
    %453 = vector.broadcast %cst_112 : f32 to vector<32x16xf32>
    %454 = arith.addf %453, %452 : vector<32x16xf32>
    %455 = arith.divf %453, %454 : vector<32x16xf32>
    %456 = vector.extract_strided_slice %449 {offsets = [32, 0], sizes = [32, 16], strides = [1, 1]} : vector<128x16xf32> to vector<32x16xf32>
    %457 = arith.negf %456 : vector<32x16xf32>
    %458 = math.exp %457 : vector<32x16xf32>
    %cst_113 = arith.constant 1.000000e+00 : f32
    %459 = vector.broadcast %cst_113 : f32 to vector<32x16xf32>
    %460 = arith.addf %459, %458 : vector<32x16xf32>
    %461 = arith.divf %459, %460 : vector<32x16xf32>
    %462 = vector.extract_strided_slice %449 {offsets = [64, 0], sizes = [32, 16], strides = [1, 1]} : vector<128x16xf32> to vector<32x16xf32>
    %463 = math.tanh %462 : vector<32x16xf32>
    %464 = vector.extract_strided_slice %449 {offsets = [96, 0], sizes = [32, 16], strides = [1, 1]} : vector<128x16xf32> to vector<32x16xf32>
    %465 = arith.negf %464 : vector<32x16xf32>
    %466 = math.exp %465 : vector<32x16xf32>
    %cst_114 = arith.constant 1.000000e+00 : f32
    %467 = vector.broadcast %cst_114 : f32 to vector<32x16xf32>
    %468 = arith.addf %467, %466 : vector<32x16xf32>
    %469 = arith.divf %467, %468 : vector<32x16xf32>
    %470 = arith.mulf %461, %441 : vector<32x16xf32>
    %471 = arith.mulf %455, %463 : vector<32x16xf32>
    %472 = arith.addf %470, %471 : vector<32x16xf32>
    %473 = math.tanh %472 : vector<32x16xf32>
    %474 = arith.mulf %469, %473 : vector<32x16xf32>
    %c15 = arith.constant 15 : index
    %c0_115 = arith.constant 0 : index
    %c0_116 = arith.constant 0 : index
    %475 = vector.load %arg1[%c15, %c0_115, %c0_116] : memref<16x8x16xf32, #tpu.memory_space<vmem>>, vector<1x8x16xf32>
    %476 = vector.shape_cast %475 : vector<1x8x16xf32> to vector<8x16xf32>
    %cst_117 = arith.constant dense<0.000000e+00> : vector<128x16xf32>
    %477 = tpu.matmul %3, %476, %cst_117 {dimension_numbers = #tpu.dot_dimension_numbers<[1], [0], [0], [1], [0, 0, 1, 1], [], []>} : vector<128x8xf32>, vector<8x16xf32>, vector<128x16xf32> -> vector<128x16xf32>
    %478 = arith.addf %477, %7 : vector<128x16xf32>
    %cst_118 = arith.constant dense<0.000000e+00> : vector<128x16xf32>
    %479 = tpu.matmul %4, %474, %cst_118 {dimension_numbers = #tpu.dot_dimension_numbers<[1], [0], [0], [1], [0, 0, 1, 1], [], []>} : vector<128x32xf32>, vector<32x16xf32>, vector<128x16xf32> -> vector<128x16xf32>
    %480 = arith.addf %478, %479 : vector<128x16xf32>
    %481 = vector.extract_strided_slice %480 {offsets = [0, 0], sizes = [32, 16], strides = [1, 1]} : vector<128x16xf32> to vector<32x16xf32>
    %482 = arith.negf %481 : vector<32x16xf32>
    %483 = math.exp %482 : vector<32x16xf32>
    %cst_119 = arith.constant 1.000000e+00 : f32
    %484 = vector.broadcast %cst_119 : f32 to vector<32x16xf32>
    %485 = arith.addf %484, %483 : vector<32x16xf32>
    %486 = arith.divf %484, %485 : vector<32x16xf32>
    %487 = vector.extract_strided_slice %480 {offsets = [32, 0], sizes = [32, 16], strides = [1, 1]} : vector<128x16xf32> to vector<32x16xf32>
    %488 = arith.negf %487 : vector<32x16xf32>
    %489 = math.exp %488 : vector<32x16xf32>
    %cst_120 = arith.constant 1.000000e+00 : f32
    %490 = vector.broadcast %cst_120 : f32 to vector<32x16xf32>
    %491 = arith.addf %490, %489 : vector<32x16xf32>
    %492 = arith.divf %490, %491 : vector<32x16xf32>
    %493 = vector.extract_strided_slice %480 {offsets = [64, 0], sizes = [32, 16], strides = [1, 1]} : vector<128x16xf32> to vector<32x16xf32>
    %494 = math.tanh %493 : vector<32x16xf32>
    %495 = vector.extract_strided_slice %480 {offsets = [96, 0], sizes = [32, 16], strides = [1, 1]} : vector<128x16xf32> to vector<32x16xf32>
    %496 = arith.negf %495 : vector<32x16xf32>
    %497 = math.exp %496 : vector<32x16xf32>
    %cst_121 = arith.constant 1.000000e+00 : f32
    %498 = vector.broadcast %cst_121 : f32 to vector<32x16xf32>
    %499 = arith.addf %498, %497 : vector<32x16xf32>
    %500 = arith.divf %498, %499 : vector<32x16xf32>
    %501 = arith.mulf %492, %472 : vector<32x16xf32>
    %502 = arith.mulf %486, %494 : vector<32x16xf32>
    %503 = arith.addf %501, %502 : vector<32x16xf32>
    %504 = math.tanh %503 : vector<32x16xf32>
    %505 = arith.mulf %500, %504 : vector<32x16xf32>
    %c0_122 = arith.constant 0 : index
    %c0_123 = arith.constant 0 : index
    %506 = vector.load %arg10[%c0_122, %c0_123] : memref<32x16xf32, #tpu.memory_space<vmem>>, vector<32x16xf32>
    tpu.vector_store %arg10[%c0_122, %c0_123], %505 {strides = array<i32>} : memref<32x16xf32, #tpu.memory_space<vmem>>, vector<32x16xf32>,
    %c0_124 = arith.constant 0 : index
    %c0_125 = arith.constant 0 : index
    %507 = vector.load %arg11[%c0_124, %c0_125] : memref<32x16xf32, #tpu.memory_space<vmem>>, vector<32x16xf32>
    tpu.vector_store %arg11[%c0_124, %c0_125], %503 {strides = array<i32>} : memref<32x16xf32, #tpu.memory_space<vmem>>, vector<32x16xf32>,
    %c0_i32_126 = arith.constant 0 : i32
    %508 = arith.cmpi eq, %arg0, %c0_i32_126 : i32
    %509 = arith.extui %508 : i1 to i32
    %c0_i32_127 = arith.constant 0 : i32
    %510 = arith.cmpi ne, %509, %c0_i32_127 : i32
    scf.if %510 {
      %c0_128 = arith.constant 0 : index
      %c0_129 = arith.constant 0 : index
      %511 = vector.load %arg7[%c0_128, %c0_129] : memref<1x32xf32, #tpu.memory_space<vmem>>, vector<1x32xf32>
      %cst_130 = arith.constant dense<0.000000e+00> : vector<1x16xf32>
      %512 = tpu.matmul %511, %505, %cst_130 {dimension_numbers = #tpu.dot_dimension_numbers<[1], [0], [0], [1], [0, 0, 1, 1], [], []>} : vector<1x32xf32>, vector<32x16xf32>, vector<1x16xf32> -> vector<1x16xf32>
      %c0_131 = arith.constant 0 : index
      %c0_132 = arith.constant 0 : index
      %513 = vector.load %arg8[%c0_131, %c0_132] : memref<1x1xf32, #tpu.memory_space<vmem>>, vector<1x1xf32>
      %514 = vector.broadcast %513 : vector<1x1xf32> to vector<1x16xf32>
      %515 = arith.addf %512, %514 : vector<1x16xf32>
      %c0_133 = arith.constant 0 : index
      %c0_134 = arith.constant 0 : index
      %516 = vector.load %arg9[%c0_133, %c0_134] : memref<1x16xf32, #tpu.memory_space<vmem>>, vector<1x16xf32>
      tpu.vector_store %arg9[%c0_133, %c0_134], %515 {strides = array<i32>} : memref<1x16xf32, #tpu.memory_space<vmem>>, vector<1x16xf32>,
    } else {
    }
    return
  }
  func.func @transform_0(%arg0: i32) -> (i32, i32, i32) {
    %c0_i32 = arith.constant 0 : i32
    %c0_i32_0 = arith.constant 0 : i32
    %c0_i32_1 = arith.constant 0 : i32
    return %arg0, %c0_i32, %c0_i32_0 : i32, i32, i32
  }
  func.func @transform_1(%arg0: i32) -> (i32, i32) {
    %c0_i32 = arith.constant 0 : i32
    %c0_i32_0 = arith.constant 0 : i32
    %c0_i32_1 = arith.constant 0 : i32
    return %c0_i32, %c0_i32_0 : i32, i32
  }
  func.func @transform_2(%arg0: i32) -> (i32, i32) {
    %c0_i32 = arith.constant 0 : i32
    %c0_i32_0 = arith.constant 0 : i32
    %c0_i32_1 = arith.constant 0 : i32
    return %c0_i32, %c0_i32_0 : i32, i32
  }
  func.func @transform_3(%arg0: i32) -> (i32, i32) {
    %c0_i32 = arith.constant 0 : i32
    %c0_i32_0 = arith.constant 0 : i32
    %c0_i32_1 = arith.constant 0 : i32
    return %c0_i32, %c0_i32_0 : i32, i32
  }
  func.func @transform_4(%arg0: i32) -> (i32, i32) {
    %c0_i32 = arith.constant 0 : i32
    %c0_i32_0 = arith.constant 0 : i32
    %c0_i32_1 = arith.constant 0 : i32
    return %c0_i32, %c0_i32_0 : i32, i32
  }
  func.func @transform_5(%arg0: i32) -> (i32, i32) {
    %c0_i32 = arith.constant 0 : i32
    %c0_i32_0 = arith.constant 0 : i32
    %c0_i32_1 = arith.constant 0 : i32
    return %c0_i32, %c0_i32_0 : i32, i32
  }
  func.func @transform_6(%arg0: i32) -> (i32, i32) {
    %c0_i32 = arith.constant 0 : i32
    %c0_i32_0 = arith.constant 0 : i32
    %c0_i32_1 = arith.constant 0 : i32
    return %c0_i32, %c0_i32_0 : i32, i32
  }
  func.func @transform_7(%arg0: i32) -> (i32, i32) {
    %c0_i32 = arith.constant 0 : i32
    %c0_i32_0 = arith.constant 0 : i32
    %c0_i32_1 = arith.constant 0 : i32
    return %c0_i32, %c0_i32_0 : i32, i32
  }
  func.func @transform_8(%arg0: i32) -> (i32, i32) {
    %c0_i32 = arith.constant 0 : i32
    %c0_i32_0 = arith.constant 0 : i32
    %c0_i32_1 = arith.constant 0 : i32
    return %c0_i32, %c0_i32_0 : i32, i32
  }
  func.func @transform_9(%arg0: i32) -> (i32, i32) {
    %c0_i32 = arith.constant 0 : i32
    %c0_i32_0 = arith.constant 0 : i32
    %c0_i32_1 = arith.constant 0 : i32
    return %c0_i32, %c0_i32_0 : i32, i32
  }
  func.func @transform_10(%arg0: i32) -> (i32, i32) {
    %c0_i32 = arith.constant 0 : i32
    %c0_i32_0 = arith.constant 0 : i32
    %c0_i32_1 = arith.constant 0 : i32
    return %c0_i32, %c0_i32_0 : i32, i32
  }
}

</mosaic_0001>

<bundles_post_ra>
// kernel: lstm_forward.1
= control target key start
LH: loop header
LB: loop body
LE: loop exit
PB: predicated region body
PF: predicated region fallthrough
CT: control target
= control target key end

     0   :  { %s13644_s0 = inlined_call_operand.vmem [shape: f32[16,8,16], index: 0, kind: input, shape index: {}]   ;;  %s13645_s1 = inlined_call_operand.vmem [shape: f32[32,16], index: 1, kind: input, shape index: {}]   ;;  %s13646_s2 = inlined_call_operand.vmem [shape: f32[32,16], index: 2, kind: input, shape index: {}]   ;;  %s13647_s3 = inlined_call_operand.vmem [shape: f32[128,8], index: 3, kind: input, shape index: {}]   ;;  %s13648_s4 = inlined_call_operand.vmem [shape: f32[128,1], index: 4, kind: input, shape index: {}]   ;;  %s13649_s5 = inlined_call_operand.vmem [shape: f32[128,32], index: 5, kind: input, shape index: {}]   ;;  %s13650_s6 = inlined_call_operand.vmem [shape: f32[1,32], index: 6, kind: input, shape index: {}]   ;;  %s13651_s7 = inlined_call_operand.<no memory space> [shape: f32[1,1], index: 7, kind: input, shape index: {}]   ;;  %s13652_s8 = inlined_call_operand.hbm [shape: f32[1,16], index: 8, kind: output, shape index: {0}]   ;;  %s13653_s9 = inlined_call_operand.vmem [shape: f32[32,16], index: 9, kind: output, shape index: {1}]   ;;  %s13654_s10 = inlined_call_operand.vmem [shape: f32[32,16], index: 10, kind: output, shape index: {2}]  }
   0x1   :  { %v16_v0 = vstv %s13651_s7 }
   0x2   :  { %17 = vst [vmem:[#allocation2] sm:$0x1] %v16_v0 }
   0x3   :  { %v192_v1 = vld [vmem:[%s13644_s0] sm:$0xff]  ;;  %vm193_vm0 = vcmask 64512   ;;  %v11047_v3 = vld [vmem:[%s13647_s3 + $0x8] sm:$0xff]  ;;  %v11054_v4 = vld [vmem:[%s13647_s3 + $0x10] sm:$0xff]  ;;  %v10973_v5 = vmov 0   ;;  %vm43_vm1 = vcmask 130048  }
   0x4   :  { %v11042_v2 = vld [vmem:[%s13647_s3] sm:$0xff]  ;;  %8190 = vmatprep.subr.mxu0 %v192_v1  ;;  %9780 = vset.pattern.permute.xlu0 %v10973_v5  ;;  %v11063_v6 = vld [vmem:[%s13647_s3 + $0x18] sm:$0xff]  ;;  %v40_v9 = vld [vmem:[%s13645_s1 + $0x8] sm:$0xff] }
   0x5   :  { %8192 = vmatprep.mubr.msk.f32.mxu0 %vm193_vm0, %v11042_v2  ;;  %8191 = vmatpush3.msra.mxu0 %v192_v1  ;;  %v11070_v7 = vld [vmem:[%s13647_s3 + $0x20] sm:$0xff]  ;;  %45 = vst.msk [vmem:[%s13653_s9 + $0x8] sm:$0xff] %vm43_vm1, %v40_v9  ;;  %v41_v10 = vld [vmem:[%s13645_s1 + $0x10] sm:$0xff]  ;;  %v42_v11 = vld [vmem:[%s13645_s1 + $0x18] sm:$0xff] }
   0x6   :  { %8193 = vmatmul.mubr.msk.f32.vlgmr.msra.gmra.mrb[0].mxu0 %vm193_vm0, %v11047_v3  ;;  %9781 = vset.pattern.permute.xlu1 %v10973_v5  ;;  %v39_v8 = vld [vmem:[%s13645_s1] sm:$0xff]  ;;  %46 = vst.msk [vmem:[%s13653_s9 + $0x10] sm:$0xff] %vm43_vm1, %v41_v10  ;;  %47 = vst.msk [vmem:[%s13653_s9 + $0x18] sm:$0xff] %vm43_vm1, %v42_v11  ;;  %v11107_v12 = vld [vmem:[%s13647_s3 + $0x28] sm:$0xff] }
   0x7   :  { %8195 = vmatprep.mubr.msk.f32.mxu0 %vm193_vm0, %v11054_v4  ;;  %8250 = vmatprep.mubr.msk.f32.mxu1 %vm193_vm0, %v11042_v2  ;;  %44 = vst.msk [vmem:[%s13653_s9] sm:$0xff] %vm43_vm1, %v39_v8  ;;  %v11112_v13 = vld [vmem:[%s13647_s3 + $0x30] sm:$0xff]  ;;  %v11121_v14 = vld [vmem:[%s13647_s3 + $0x38] sm:$0xff]  ;;  %v88_v15 = vld [vmem:[%s13648_s4] sm:$0xff] }
   0x8   :  { %v92_v16 = vld [vmem:[%s13648_s4 + $0x20] sm:$0xff]  ;;  %106 = vperm.xlu0 %9780, %v88_v15   ;;  %v89_v23 = vld [vmem:[%s13648_s4 + $0x8] sm:$0xff]  ;;  %v11164_v27 = vld [vmem:[%s13647_s3 + $0x50] sm:$0xff] }
   0x9   :  { %v11132_v17 = vld [vmem:[%s13647_s3 + $0x40] sm:$0xff]  ;;  %126 = vperm.xlu1 %9781, %v92_v16   ;;  %v93_v25 = vld [vmem:[%s13648_s4 + $0x28] sm:$0xff]  ;;  %v90_v28 = vld [vmem:[%s13648_s4 + $0x10] sm:$0xff] }
   0xa   :  { %8196 = vmatmul.mubr.msk.f32.gmra.mrb[2].mxu0 %vm193_vm0, %v11063_v6  ;;  %v11159_v26 = vld [vmem:[%s13647_s3 + $0x48] sm:$0xff]  ;;  %v91_v29 = vld [vmem:[%s13648_s4 + $0x18] sm:$0xff] }
   0xb   :  { %8198 = vmatprep.mubr.msk.f32.mxu0 %vm193_vm0, %v11070_v7 }
   0xc   :  { %v185_v19 = vld [vmem:[%s13653_s9 + $0x8] sm:$0xff]  ;;  %111 = vperm.xlu0 %9780, %v89_v23  }
   0xd   :  { %v186_v21 = vld [vmem:[%s13653_s9 + $0x10] sm:$0xff]  ;;  %v187_v22 = vld [vmem:[%s13653_s9 + $0x18] sm:$0xff]  ;;  %131 = vperm.xlu1 %9781, %v93_v25  }
   0xe   :  { %8199 = vmatmul.mubr.msk.f32.gmra.mrb[4].mxu0 %vm193_vm0, %v11107_v12  ;;  %v184_v18 = vld [vmem:[%s13653_s9] sm:$0xff]  ;;  %v9133_v24 = vpack.c.bf16 %v187_v22, %v186_v21 }
   0xf   :  { %8201 = vmatprep.mubr.msk.f32.mxu0 %vm193_vm0, %v11112_v13  ;;  %v9129_v20 = vpack.c.bf16 %v185_v19, %v184_v18 }
  0x11   :  { %9130 = vmatprep.subr.bf16.mxu0 %v9129_v20 }
  0x12   :  { %8202 = vmatmul.mubr.msk.f32.gmra.mrb[6].mxu0 %vm193_vm0, %v11121_v14 }
  0x13   :  { %8204 = vmatprep.mubr.msk.f32.mxu0 %vm193_vm0, %v11132_v17  ;;  %9132 = vmatpush3.bf16.msra.mxu0 %v9129_v20 }
  0x14   :  { %9134 = vmatprep.subr.bf16.mxu0 %v9133_v24 }
  0x16   :  { %8205 = vmatmul.mubr.msk.f32.gmra.mrb[8].mxu0 %vm193_vm0, %v11159_v26 }
  0x17   :  { %18 = vsyncpa [#allocation4], 0  ;;  %8207 = vmatprep.mubr.msk.f32.mxu0 %vm193_vm0, %v11164_v27  ;;  %v11179_v30 = vld [vmem:[%s13647_s3 + $0x58] sm:$0xff]  ;;  %v11184_v31 = vld [vmem:[%s13647_s3 + $0x60] sm:$0xff]  ;;  %9136 = vmatpush3.bf16.msra.mxu0 %v9133_v24  ;;  %vm387_vm2 = vcmask 261120   ;;  %vm10975_vm3 = vmmov 0  }
  0x18   :  { %116 = vperm.xlu0 %9780, %v90_v28   ;;  %121 = vperm.xlu1 %9781, %v91_v29   ;;  %v94_v32 = vld [vmem:[%s13648_s4 + $0x30] sm:$0xff]  ;;  %v95_v33 = vld [vmem:[%s13648_s4 + $0x38] sm:$0xff]  ;;  %v11199_v34 = vld [vmem:[%s13647_s3 + $0x68] sm:$0xff]  ;;  %s10977_s20 = smov [#allocation3]   ;;  %vm6849_vm4 = vcmask 122880  }
  0x19   :  { %v11204_v35 = vld [vmem:[%s13647_s3 + $0x70] sm:$0xff]  ;;  %v96_v36 = vld [vmem:[%s13648_s4 + $0x40] sm:$0xff]  ;;  %v97_v37 = vld [vmem:[%s13648_s4 + $0x48] sm:$0xff]  ;;  %s6857_s7 = sshll.u32 %s10977_s20, 4  ;;  %s6858_s7 = int_to_ptr.vmem [resolvable:$true] %s6857_s7 }
  0x1a   :  { %8208 = vmatmul.mubr.msk.f32.gmra.mrb[10].mxu0 %vm193_vm0, %v11179_v30  ;;  %v11219_v38 = vld [vmem:[%s13647_s3 + $0x78] sm:$0xff]  ;;  %v11224_v39 = vld [vmem:[%s13649_s5] sm:$0xff]  ;;  %v101_v41 = vld [vmem:[%s13648_s4 + $0x68] sm:$0xff]  ;;  %p10954_p1 = scmp.lt.s32.totalorder %s6858_s7, %s6858_s7 }
  0x1b   :  { %8210 = vmatprep.mubr.msk.f32.mxu0 %vm193_vm0, %v11184_v31  ;;  %v100_v40 = vld [vmem:[%s13648_s4 + $0x60] sm:$0xff]  ;;  %v11239_v42 = vld [vmem:[%s13649_s5 + $0x8] sm:$0xff]  ;;  %v11244_v43 = vld [vmem:[%s13649_s5 + $0x10] sm:$0xff] }
  0x1c   :  { %136 = vperm.xlu0 %9780, %v94_v32   ;;  %141 = vperm.xlu1 %9781, %v95_v33   ;;  %v98_v44 = vld [vmem:[%s13648_s4 + $0x50] sm:$0xff]  ;;  %v99_v45 = vld [vmem:[%s13648_s4 + $0x58] sm:$0xff]  ;;  %v11264_v47 = vld [vmem:[%s13649_s5 + $0x20] sm:$0xff] }
  0x1d   :  { %v11259_v46 = vld [vmem:[%s13649_s5 + $0x18] sm:$0xff]  ;;  %v102_v48 = vld [vmem:[%s13648_s4 + $0x70] sm:$0xff]  ;;  %v11279_v50 = vld [vmem:[%s13649_s5 + $0x28] sm:$0xff] }
  0x1e   :  { %8211 = vmatmul.mubr.msk.f32.gmra.mrb[12].mxu0 %vm193_vm0, %v11199_v34  ;;  %v103_v49 = vld [vmem:[%s13648_s4 + $0x78] sm:$0xff]  ;;  %v11284_v51 = vld [vmem:[%s13649_s5 + $0x30] sm:$0xff]  ;;  %v6766_v52 = vld [vmem:[#allocation2] sm:$0x1] }
  0x1f   :  { %8213 = vmatprep.mubr.msk.f32.mxu0 %vm193_vm0, %v11204_v35  ;;  %v11293_v53 = vld [vmem:[%s13649_s5 + $0x38] sm:$0xff]  ;;  %v11298_v54 = vld [vmem:[%s13649_s5 + $0x40] sm:$0xff]  ;;  %v11307_v55 = vld [vmem:[%s13649_s5 + $0x48] sm:$0xff] }
  0x20   :  { %146 = vperm.xlu0 %9780, %v96_v36   ;;  %151 = vperm.xlu1 %9781, %v97_v37   ;;  %v11312_v56 = vld [vmem:[%s13649_s5 + $0x50] sm:$0xff]  ;;  %v11321_v57 = vld [vmem:[%s13649_s5 + $0x58] sm:$0xff]  ;;  %v11326_v58 = vld [vmem:[%s13649_s5 + $0x60] sm:$0xff] }
  0x21   :  { %v11335_v59 = vld [vmem:[%s13649_s5 + $0x68] sm:$0xff]  ;;  %v11340_v60 = vld [vmem:[%s13649_s5 + $0x70] sm:$0xff]  ;;  %v11349_v61 = vld [vmem:[%s13649_s5 + $0x78] sm:$0xff] }
  0x22   :  { %8214 = vmatmul.mubr.msk.f32.gmra.mrb[14].mxu0 %vm193_vm0, %v11219_v38  ;;  %v49_v62 = vld [vmem:[%s13646_s2 + $0x8] sm:$0xff]  ;;  %v48_v63 = vld [vmem:[%s13646_s2] sm:$0xff]  ;;  %v51_v0 = vld [vmem:[%s13646_s2 + $0x18] sm:$0xff] }
  0x23   :  { %8224 = vmatprep.mubr.msk.f32.mxu0 %vm387_vm2, %v11224_v39  ;;  %53 = vst.msk [vmem:[%s13654_s10 + $0x8] sm:$0xff] %vm43_vm1, %v49_v62  ;;  %52 = vst.msk [vmem:[%s13654_s10] sm:$0xff] %vm43_vm1, %v48_v63  ;;  %v50_v1 = vld [vmem:[%s13646_s2 + $0x10] sm:$0xff]  ;;  %v6917_v5 = vld [vmem:[%s13644_s0 + $0x8] sm:$0xff] }
  0x24   :  { %166 = vperm.xlu0 %9780, %v100_v40   ;;  %171 = vperm.xlu1 %9781, %v101_v41   ;;  %55 = vst.msk [vmem:[%s13654_s10 + $0x18] sm:$0xff] %vm43_vm1, %v51_v0  ;;  %54 = vst.msk [vmem:[%s13654_s10 + $0x10] sm:$0xff] %vm43_vm1, %v50_v1 }
  0x25   :  { %8248 = vmatprep.subr.mxu1 %v6917_v5 }
  0x26   :  { %8225 = vmatmul.mubr.msk.f32.vlgmr.msra.gmra.mrb[0].mxu0 %vm387_vm2, %v11239_v42  ;;  %8249 = vmatpush3.msra.mxu1 %v6917_v5 }
  0x27   :  { %8227 = vmatprep.mubr.msk.f32.mxu0 %vm387_vm2, %v11244_v43  ;;  %8251 = vmatmul.mubr.msk.f32.vlgmr.msra.gmra.mrb[0].mxu1 %vm193_vm0, %v11047_v3 }
  0x28   :  { %156 = vperm.xlu0 %9780, %v98_v44   ;;  %161 = vperm.xlu1 %9781, %v99_v45  }
  0x29   :  { %8253 = vmatprep.mubr.msk.f32.mxu1 %vm193_vm0, %v11054_v4 }
  0x2a   :  { %8228 = vmatmul.mubr.msk.f32.gmra.mrb[2].mxu0 %vm387_vm2, %v11259_v46 }
  0x2b   :  { %8230 = vmatprep.mubr.msk.f32.mxu0 %vm387_vm2, %v11264_v47  ;;  %8254 = vmatmul.mubr.msk.f32.gmra.mrb[2].mxu1 %vm193_vm0, %v11063_v6 }
  0x2c   :  { %176 = vperm.xlu0 %9780, %v102_v48   ;;  %181 = vperm.xlu1 %9781, %v103_v49  }
  0x2d   :  { %8256 = vmatprep.mubr.msk.f32.mxu1 %vm193_vm0, %v11070_v7 }
  0x2e   :  { %8231 = vmatmul.mubr.msk.f32.gmra.mrb[4].mxu0 %vm387_vm2, %v11279_v50 }
  0x2f   :  { %8233 = vmatprep.mubr.msk.f32.mxu0 %vm387_vm2, %v11284_v51  ;;  %8257 = vmatmul.mubr.msk.f32.gmra.mrb[4].mxu1 %vm193_vm0, %v11107_v12 }
  0x30   :  { %6769 = vperm.xlu0 %9780, %v6766_v52   ;;  %8259 = vmatprep.mubr.msk.f32.mxu1 %vm193_vm0, %v11112_v13 }
  0x32   :  { %8234 = vmatmul.mubr.msk.f32.gmra.mrb[6].mxu0 %vm387_vm2, %v11293_v53 }
  0x33   :  { %8236 = vmatprep.mubr.msk.f32.mxu0 %vm387_vm2, %v11298_v54  ;;  %8260 = vmatmul.mubr.msk.f32.gmra.mrb[6].mxu1 %vm193_vm0, %v11121_v14 }
  0x34   :  { %8262 = vmatprep.mubr.msk.f32.mxu1 %vm193_vm0, %v11132_v17 }
  0x36   :  { %8237 = vmatmul.mubr.msk.f32.gmra.mrb[8].mxu0 %vm387_vm2, %v11307_v55 }
  0x37   :  { %8239 = vmatprep.mubr.msk.f32.mxu0 %vm387_vm2, %v11312_v56  ;;  %8263 = vmatmul.mubr.msk.f32.gmra.mrb[8].mxu1 %vm193_vm0, %v11159_v26 }
  0x38   :  { %8265 = vmatprep.mubr.msk.f32.mxu1 %vm193_vm0, %v11164_v27 }
  0x3a   :  { %8240 = vmatmul.mubr.msk.f32.gmra.mrb[10].mxu0 %vm387_vm2, %v11321_v57 }
  0x3b   :  { %8242 = vmatprep.mubr.msk.f32.mxu0 %vm387_vm2, %v11326_v58  ;;  %8266 = vmatmul.mubr.msk.f32.gmra.mrb[10].mxu1 %vm193_vm0, %v11179_v30 }
  0x3c   :  { %8268 = vmatprep.mubr.msk.f32.mxu1 %vm193_vm0, %v11184_v31 }
  0x3e   :  { %8243 = vmatmul.mubr.msk.f32.gmra.mrb[12].mxu0 %vm387_vm2, %v11335_v59 }
  0x3f   :  { %8245 = vmatprep.mubr.msk.f32.mxu0 %vm387_vm2, %v11340_v60  ;;  %8269 = vmatmul.mubr.msk.f32.gmra.mrb[12].mxu1 %vm193_vm0, %v11199_v34 }
  0x40   :  { %8271 = vmatprep.mubr.msk.f32.mxu1 %vm193_vm0, %v11204_v35 }
  0x42   :  { %8246 = vmatmul.mubr.msk.f32.gmra.mrb[14].mxu0 %vm387_vm2, %v11349_v61 }
  0x43   :  { %8308 = vmatprep.mubr.msk.f32.mxu0 %vm193_vm0, %v11042_v2  ;;  %8272 = vmatmul.mubr.msk.f32.gmra.mrb[14].mxu1 %vm193_vm0, %v11219_v38 }
  0x44   :  { %8282 = vmatprep.mubr.msk.f32.mxu1 %vm387_vm2, %v11224_v39 }
  0x87   :  { %v11420_v9 = vpop.permute.xlu0 %106 }
  0x88   :  { %v11418_v8 = vpop.permute.xlu1 %126  ;;  %13738 = vst [vmem:[#allocation6_spill] sm:$0xff] %v11420_v9 }
  0x8b   :  { %v11424_v11 = vpop.permute.xlu0 %111 }
  0x8c   :  { %v11422_v10 = vpop.permute.xlu1 %131 }
  0x8d   :  { %13739 = vst [vmem:[#allocation7_spill] sm:$0xff] %v11422_v10 }
  0x97   :  { %v11426_v15 = vpop.permute.xlu1 %121  ;;  %v11428_v16 = vpop.permute.xlu0 %116 }
  0x98   :  { %13740 = vst [vmem:[#allocation8_spill] sm:$0xff] %v11428_v16 }
  0x9b   :  { %v11431_v21 = vpop.permute.xlu1 %141  ;;  %v11434_v28 = vpop.permute.xlu0 %136 }
  0x9c   :  { %13741 = vst [vmem:[#allocation9_spill] sm:$0xff] %v11431_v21  ;;  %13742 = vst [vmem:[#allocation10_spill] sm:$0xff] %v11434_v28 }
  0x9f   :  { %v11438_v37 = vpop.permute.xlu1 %151  ;;  %v11442_v49 = vpop.permute.xlu0 %146 }
  0xa0   :  { %13743 = vst [vmem:[#allocation11_spill] sm:$0xff] %v11438_v37  ;;  %13744 = vst [vmem:[#allocation12_spill] sm:$0xff] %v11442_v49 }
  0xa3   :  { %v11445_v5 = vpop.permute.xlu1 %171 }
  0xa4   :  { %13745 = vst [vmem:[#allocation13_spill] sm:$0xff] %v11445_v5 }
  0xf9   :  { %v8226_v18 = vpop.f32.mrb[0].mxu0 }
  0xfa   :  { %v9263_v19 = vadd.f32 %v8226_v18, %v11424_v11  ;;  %v502_v20 = vpop.f32.mrb[1].mxu0 }
  0xfb   :  { %v9264_v22 = vadd.f32 %v502_v20, %v11420_v9 }
  0xfc   :  { %v6906_v23 = vmul.f32 -1.442695, %v9263_v19 }
  0xfd   :  { %v6905_v24 = vmul.f32 -1.442695, %v9264_v22  ;;  %v8229_v25 = vpop.f32.mrb[2].mxu0 }
  0xfe   :  { %9782 = vpow2.f32 %v6906_v23  ;;  %v9265_v29 = vadd.f32 %v8229_v25, %v11426_v15  ;;  %v512_v32 = vpop.f32.mrb[3].mxu0 }
  0xff   :  { %9784 = vpow2.f32 %v6905_v24  ;;  %v9266_v33 = vadd.f32 %v512_v32, %v11428_v16 }
 0x100   :  { %v6908_v36 = vmul.f32 -1.442695, %v9265_v29  ;;  %v11448_v29 = vpop.permute.xlu0 %166 }
 0x101   :  { %v6907_v40 = vmul.f32 -1.442695, %v9266_v33  ;;  %v8232_v41 = vpop.f32.mrb[4].mxu0  ;;  %13746 = vst [vmem:[#allocation14_spill] sm:$0xff] %v11448_v29 }
 0x102   :  { %9786 = vpow2.f32 %v6908_v36  ;;  %v9267_v44 = vadd.f32 %v8232_v41, %v11422_v10  ;;  %v522_v45 = vpop.f32.mrb[5].mxu0 }
 0x103   :  { %9788 = vpow2.f32 %v6907_v40  ;;  %v9268_v48 = vadd.f32 %v522_v45, %v11418_v8 }
 0x104   :  { %v6910_v52 = vmul.f32 -1.442695, %v9267_v44  ;;  %v11451_v44 = vpop.permute.xlu1 %161 }
 0x105   :  { %v6909_v62 = vmul.f32 -1.442695, %v9268_v48  ;;  %v8235_v63 = vpop.f32.mrb[6].mxu0  ;;  %13747 = vst [vmem:[#allocation15_spill] sm:$0xff] %v11451_v44 }
 0x106   :  { %9790 = vpow2.f32 %v6910_v52  ;;  %v9269_v0 = vadd.f32 %v8235_v63, %v11431_v21  ;;  %v532_v1 = vpop.f32.mrb[7].mxu0 }
 0x107   :  { %9792 = vpow2.f32 %v6909_v62  ;;  %v9270_v18 = vadd.f32 %v532_v1, %v11434_v28 }
 0x108   :  { %v9783_v19 = vpop.eup %9782  ;;  %v6912_v20 = vmul.f32 -1.442695, %v9269_v0 }
 0x109   :  { %v9785_v22 = vpop.eup %9784  ;;  %v610_v23 = vadd.f32 1.0, %v9783_v19  ;;  %v6911_v24 = vmul.f32 -1.442695, %v9270_v18  ;;  %v8238_v25 = vpop.f32.mrb[8].mxu0 }
 0x10a   :  { %v609_v32 = vadd.f32 1.0, %v9785_v22  ;;  %9794 = vpow2.f32 %v6912_v20  ;;  %v9271_v33 = vadd.f32 %v8238_v25, %v11438_v37  ;;  %v542_v36 = vpop.f32.mrb[9].mxu0  ;;  %v11455_v18 = vpop.permute.xlu0 %156 }
 0x10b   :  { %9796 = vrcp.f32 %v610_v23  ;;  %v9272_v48 = vadd.f32 %v542_v36, %v11442_v49  ;;  %13748 = vst [vmem:[#allocation16_spill] sm:$0xff] %v11455_v18 }
 0x10c   :  { %v9787_v40 = vpop.eup %9786  ;;  %9798 = vrcp.f32 %v609_v32 }
 0x10d   :  { %v9789_v41 = vpop.eup %9788  ;;  %v612_v45 = vadd.f32 1.0, %v9787_v40  ;;  %9800 = vpow2.f32 %v6911_v24  ;;  %v8241_v52 = vpop.f32.mrb[10].mxu0 }
 0x10e   :  { %v611_v62 = vadd.f32 1.0, %v9789_v41  ;;  %9802 = vtanh.f32 %v9271_v33  ;;  %v9273_v63 = vadd.f32 %v8241_v52, %v11451_v44  ;;  %v552_v0 = vpop.f32.mrb[11].mxu0 }
 0x10f   :  { %9804 = vrcp.f32 %v612_v45  ;;  %v9274_v22 = vadd.f32 %v552_v0, %v11455_v18  ;;  %v11460_v45 = vpop.permute.xlu1 %181 }
 0x110   :  { %v9791_v1 = vpop.eup %9790  ;;  %9806 = vrcp.f32 %v611_v62  ;;  %13749 = vst [vmem:[#allocation17_spill] sm:$0xff] %v11460_v45 }
 0x111   :  { %v9793_v19 = vpop.eup %9792  ;;  %v634_v20 = vadd.f32 1.0, %v9791_v1  ;;  %9808 = vtanh.f32 %v9272_v48  ;;  %v8244_v23 = vpop.f32.mrb[12].mxu0 }
 0x112   :  { %v633_v24 = vadd.f32 1.0, %v9793_v19  ;;  %9810 = vtanh.f32 %v9273_v63  ;;  %v9275_v25 = vadd.f32 %v8244_v23, %v11445_v5  ;;  %v562_v32 = vpop.f32.mrb[13].mxu0  ;;  %v11462_v1 = vpop.permute.xlu0 %176 }
 0x113   :  { %9812 = vrcp.f32 %v634_v20  ;;  %v9276_v33 = vadd.f32 %v562_v32, %v11448_v29  ;;  %13750 = vst [vmem:[#allocation18_spill] sm:$0xff] %v11462_v1 }
 0x114   :  { %v9795_v36 = vpop.eup %9794  ;;  %9814 = vrcp.f32 %v633_v24  ;;  %v6914_v40 = vmul.f32 -1.442695, %v9275_v25 }
 0x115   :  { %v9797_v41 = vpop.eup %9796  ;;  %v636_v52 = vadd.f32 1.0, %v9795_v36  ;;  %9816 = vtanh.f32 %v9274_v22  ;;  %v6913_v48 = vmul.f32 -1.442695, %v9276_v33  ;;  %v8247_v62 = vpop.f32.mrb[14].mxu0 }
 0x116   :  { %v9799_v0 = vpop.eup %9798  ;;  %9818 = vpow2.f32 %v6914_v40  ;;  %v9277_v63 = vadd.f32 %v8247_v62, %v11460_v45  ;;  %v572_v19 = vpop.f32.mrb[15].mxu0  ;;  %v189_v40 = vld [vmem:[%s13654_s10 + $0x8] sm:$0xff] }
 0x117   :  { %v9801_v20 = vpop.eup %9800  ;;  %9820 = vrcp.f32 %v636_v52  ;;  %v9278_v23 = vadd.f32 %v572_v19, %v11462_v1  ;;  %v188_v52 = vld [vmem:[%s13654_s10] sm:$0xff] }
 0x118   :  { %v9803_v24 = vpop.eup %9802  ;;  %v635_v25 = vadd.f32 1.0, %v9801_v20  ;;  %9822 = vpow2.f32 %v6913_v48  ;;  %v6916_v32 = vmul.f32 -1.442695, %v9277_v63 }
 0x119   :  { %v9805_v29 = vpop.eup %9804  ;;  %v678_v36 = vmul.f32 %v9803_v24, %v9797_v41  ;;  %v6915_v22 = vmul.f32 -1.442695, %v9278_v23 }
 0x11a   :  { %v9807_v33 = vpop.eup %9806  ;;  %9824 = vrcp.f32 %v635_v25  ;;  %v191_v25 = vld [vmem:[%s13654_s10 + $0x18] sm:$0xff] }
 0x11b   :  { %v9809_v5 = vpop.eup %9808  ;;  %9826 = vpow2.f32 %v6916_v32 }
 0x11c   :  { %v9811_v62 = vpop.eup %9810  ;;  %v677_v19 = vmul.f32 %v9809_v5, %v9799_v0  ;;  %9828 = vpow2.f32 %v6915_v22 }
 0x11d   :  { %v9813_v48 = vpop.eup %9812  ;;  %v680_v63 = vmul.f32 %v9811_v62, %v9805_v29  ;;  %v190_v29 = vld [vmem:[%s13654_s10 + $0x10] sm:$0xff] }
 0x11e   :  { %v9815_v20 = vpop.eup %9814  ;;  %v674_v41 = vmul.f32 %v9813_v48, %v189_v40 }
 0x11f   :  { %v9817_v23 = vpop.eup %9816  ;;  %v673_v24 = vmul.f32 %v9815_v20, %v188_v52 }
 0x120   :  { %v9819_v1 = vpop.eup %9818  ;;  %v11475_v45 = vadd.f32 %v678_v36, %v674_v41  ;;  %v679_v32 = vmul.f32 %v9817_v23, %v9807_v33 }
 0x121   :  { %v9821_v18 = vpop.eup %9820  ;;  %v11477_v44 = vadd.f32 %v677_v19, %v673_v24  ;;  %v662_v49 = vadd.f32 1.0, %v9819_v1 }
 0x122   :  { %v9823_v5 = vpop.eup %9822  ;;  %v676_v0 = vmul.f32 %v9821_v18, %v191_v25  ;;  %9830 = vtanh.f32 %v11475_v45 }
 0x123   :  { %9832 = vtanh.f32 %v11477_v44  ;;  %v661_v22 = vadd.f32 1.0, %v9823_v5 }
 0x124   :  { %v9825_v40 = vpop.eup %9824  ;;  %v11484_v62 = vadd.f32 %v680_v63, %v676_v0  ;;  %9834 = vrcp.f32 %v662_v49 }
 0x125   :  { %v9827_v36 = vpop.eup %9826  ;;  %v675_v33 = vmul.f32 %v9825_v40, %v190_v29  ;;  %9836 = vrcp.f32 %v661_v22 }
 0x126   :  { %v9829_v52 = vpop.eup %9828  ;;  %9838 = vtanh.f32 %v11484_v62  ;;  %v664_v18 = vadd.f32 1.0, %v9827_v36  ;;  %v6962_v36 = vld [vmem:[%s13644_s0 + $0x10] sm:$0xff] }
 0x127   :  { %v11487_v1 = vadd.f32 %v679_v32, %v675_v33  ;;  %v663_v19 = vadd.f32 1.0, %v9829_v52  ;;  %8306 = vmatprep.subr.mxu0 %v6962_v36 }
 0x128   :  { %9840 = vrcp.f32 %v664_v18  ;;  %8307 = vmatpush3.msra.mxu0 %v6962_v36 }
 0x129   :  { %9842 = vtanh.f32 %v11487_v1  ;;  %8309 = vmatmul.mubr.msk.f32.vlgmr.msra.gmra.mrb[16].mxu0 %vm193_vm0, %v11047_v3 }
 0x12a   :  { %9844 = vrcp.f32 %v663_v19  ;;  %8311 = vmatprep.mubr.msk.f32.mxu0 %vm193_vm0, %v11054_v4 }
 0x12c   :  { %v9831_v48 = vpop.eup %9830 }
 0x12d   :  { %v9833_v20 = vpop.eup %9832  ;;  %8312 = vmatmul.mubr.msk.f32.gmra.mrb[18].mxu0 %vm193_vm0, %v11063_v6 }
 0x12e   :  { %v9835_v41 = vpop.eup %9834  ;;  %8314 = vmatprep.mubr.msk.f32.mxu0 %vm193_vm0, %v11070_v7 }
 0x12f   :  { %v9837_v63 = vpop.eup %9836  ;;  %v690_v23 = vmul.f32 %v9835_v41, %v9831_v48 }
 0x130   :  { %v9839_v49 = vpop.eup %9838  ;;  %v689_v24 = vmul.f32 %v9837_v63, %v9833_v20 }
 0x131   :  { %8315 = vmatmul.mubr.msk.f32.gmra.mrb[20].mxu0 %vm193_vm0, %v11107_v12 }
 0x132   :  { %v9841_v25 = vpop.eup %9840  ;;  %v9137_v5 = vpack.c.bf16 %v690_v23, %v689_v24  ;;  %8317 = vmatprep.mubr.msk.f32.mxu0 %vm193_vm0, %v11112_v13 }
 0x133   :  { %v9843_v0 = vpop.eup %9842  ;;  %v692_v29 = vmul.f32 %v9841_v25, %v9839_v49 }
 0x134   :  { %v9845_v22 = vpop.eup %9844  ;;  %9138 = vmatprep.subr.bf16.mxu1 %v9137_v5 }
 0x135   :  { %9140 = vmatpush3.bf16.msra.mxu1 %v9137_v5  ;;  %v691_v32 = vmul.f32 %v9845_v22, %v9843_v0  ;;  %8318 = vmatmul.mubr.msk.f32.gmra.mrb[22].mxu0 %vm193_vm0, %v11121_v14 }
 0x136   :  { %8320 = vmatprep.mubr.msk.f32.mxu0 %vm193_vm0, %v11132_v17 }
 0x137   :  { %v9141_v40 = vpack.c.bf16 %v692_v29, %v691_v32 }
 0x139   :  { %9142 = vmatprep.subr.bf16.mxu1 %v9141_v40  ;;  %8321 = vmatmul.mubr.msk.f32.gmra.mrb[24].mxu0 %vm193_vm0, %v11159_v26 }
 0x13a   :  { %9144 = vmatpush3.bf16.msra.mxu1 %v9141_v40  ;;  %8323 = vmatprep.mubr.msk.f32.mxu0 %vm193_vm0, %v11164_v27 }
 0x13d   :  { %8283 = vmatmul.mubr.msk.f32.vlgmr.msra.gmra.mrb[0].mxu1 %vm387_vm2, %v11239_v42  ;;  %8324 = vmatmul.mubr.msk.f32.gmra.mrb[26].mxu0 %vm193_vm0, %v11179_v30 }
 0x13e   :  { %8285 = vmatprep.mubr.msk.f32.mxu1 %vm387_vm2, %v11244_v43  ;;  %8326 = vmatprep.mubr.msk.f32.mxu0 %vm193_vm0, %v11184_v31 }
 0x141   :  { %8286 = vmatmul.mubr.msk.f32.gmra.mrb[2].mxu1 %vm387_vm2, %v11259_v46  ;;  %8327 = vmatmul.mubr.msk.f32.gmra.mrb[28].mxu0 %vm193_vm0, %v11199_v34 }
 0x142   :  { %8288 = vmatprep.mubr.msk.f32.mxu1 %vm387_vm2, %v11264_v47  ;;  %8329 = vmatprep.mubr.msk.f32.mxu0 %vm193_vm0, %v11204_v35 }
 0x145   :  { %8289 = vmatmul.mubr.msk.f32.gmra.mrb[4].mxu1 %vm387_vm2, %v11279_v50  ;;  %8330 = vmatmul.mubr.msk.f32.gmra.mrb[30].mxu0 %vm193_vm0, %v11219_v38 }
 0x146   :  { %8291 = vmatprep.mubr.msk.f32.mxu1 %vm387_vm2, %v11284_v51  ;;  %8340 = vmatprep.mubr.msk.f32.mxu0 %vm387_vm2, %v11224_v39 }
 0x149   :  { %8292 = vmatmul.mubr.msk.f32.gmra.mrb[6].mxu1 %vm387_vm2, %v11293_v53 }
 0x14a   :  { %8294 = vmatprep.mubr.msk.f32.mxu1 %vm387_vm2, %v11298_v54 }
 0x14d   :  { %8295 = vmatmul.mubr.msk.f32.gmra.mrb[8].mxu1 %vm387_vm2, %v11307_v55 }
 0x14e   :  { %8297 = vmatprep.mubr.msk.f32.mxu1 %vm387_vm2, %v11312_v56 }
 0x151   :  { %8298 = vmatmul.mubr.msk.f32.gmra.mrb[10].mxu1 %vm387_vm2, %v11321_v57 }
 0x152   :  { %8300 = vmatprep.mubr.msk.f32.mxu1 %vm387_vm2, %v11326_v58 }
 0x155   :  { %8301 = vmatmul.mubr.msk.f32.gmra.mrb[12].mxu1 %vm387_vm2, %v11335_v59 }
 0x156   :  { %8303 = vmatprep.mubr.msk.f32.mxu1 %vm387_vm2, %v11340_v60 }
 0x159   :  { %8304 = vmatmul.mubr.msk.f32.gmra.mrb[14].mxu1 %vm387_vm2, %v11349_v61 }
 0x15a   :  { %8366 = vmatprep.mubr.msk.f32.mxu1 %vm193_vm0, %v11042_v2 }
 0x210   :  { %v8284_v33 = vpop.f32.mrb[0].mxu1 }
 0x211   :  { %v9279_v52 = vadd.f32 %v8284_v33, %v11424_v11  ;;  %v906_v18 = vpop.f32.mrb[1].mxu1 }
 0x212   :  { %v9280_v19 = vadd.f32 %v906_v18, %v11420_v9 }
 0x213   :  { %v6951_v48 = vmul.f32 -1.442695, %v9279_v52 }
 0x214   :  { %v6950_v20 = vmul.f32 -1.442695, %v9280_v19  ;;  %v8287_v41 = vpop.f32.mrb[2].mxu1 }
 0x215   :  { %9846 = vpow2.f32 %v6951_v48  ;;  %v9281_v63 = vadd.f32 %v8287_v41, %v11426_v15  ;;  %v916_v23 = vpop.f32.mrb[3].mxu1 }
 0x216   :  { %9848 = vpow2.f32 %v6950_v20  ;;  %v9282_v49 = vadd.f32 %v916_v23, %v11428_v16 }
 0x217   :  { %v6953_v24 = vmul.f32 -1.442695, %v9281_v63 }
 0x218   :  { %v6952_v25 = vmul.f32 -1.442695, %v9282_v49  ;;  %v8290_v5 = vpop.f32.mrb[4].mxu1 }
 0x219   :  { %9850 = vpow2.f32 %v6953_v24  ;;  %v9283_v0 = vadd.f32 %v8290_v5, %v11422_v10  ;;  %v926_v29 = vpop.f32.mrb[5].mxu1 }
 0x21a   :  { %9852 = vpow2.f32 %v6952_v25  ;;  %v9284_v22 = vadd.f32 %v926_v29, %v11418_v8 }
 0x21b   :  { %v6955_v32 = vmul.f32 -1.442695, %v9283_v0 }
 0x21c   :  { %v6954_v40 = vmul.f32 -1.442695, %v9284_v22  ;;  %v8293_v36 = vpop.f32.mrb[6].mxu1  ;;  %v13751_v22 = vld [vmem:[#allocation12_spill] sm:$0xff] }
 0x21d   :  { %9854 = vpow2.f32 %v6955_v32  ;;  %v9285_v33 = vadd.f32 %v8293_v36, %v11431_v21  ;;  %v936_v52 = vpop.f32.mrb[7].mxu1 }
 0x21e   :  { %9856 = vpow2.f32 %v6954_v40  ;;  %v9286_v18 = vadd.f32 %v936_v52, %v11434_v28 }
 0x21f   :  { %v9847_v19 = vpop.eup %9846  ;;  %v6957_v48 = vmul.f32 -1.442695, %v9285_v33  ;;  %v13752_v33 = vld [vmem:[#allocation15_spill] sm:$0xff] }
 0x220   :  { %v9849_v20 = vpop.eup %9848  ;;  %v1014_v41 = vadd.f32 1.0, %v9847_v19  ;;  %v6956_v63 = vmul.f32 -1.442695, %v9286_v18  ;;  %v8296_v23 = vpop.f32.mrb[8].mxu1 }
 0x221   :  { %v1013_v49 = vadd.f32 1.0, %v9849_v20  ;;  %9858 = vpow2.f32 %v6957_v48  ;;  %v9287_v24 = vadd.f32 %v8296_v23, %v11438_v37  ;;  %v946_v25 = vpop.f32.mrb[9].mxu1 }
 0x222   :  { %9860 = vrcp.f32 %v1014_v41  ;;  %v9288_v32 = vadd.f32 %v946_v25, %v13751_v22  ;;  %v13753_v41 = vld [vmem:[#allocation16_spill] sm:$0xff] }
 0x223   :  { %v9851_v5 = vpop.eup %9850  ;;  %9862 = vrcp.f32 %v1013_v49 }
 0x224   :  { %v9853_v0 = vpop.eup %9852  ;;  %v1016_v29 = vadd.f32 1.0, %v9851_v5  ;;  %9864 = vpow2.f32 %v6956_v63  ;;  %v8299_v40 = vpop.f32.mrb[10].mxu1  ;;  %v13754_v63 = vld [vmem:[#allocation13_spill] sm:$0xff] }
 0x225   :  { %v1015_v36 = vadd.f32 1.0, %v9853_v0  ;;  %9866 = vtanh.f32 %v9287_v24  ;;  %v9289_v52 = vadd.f32 %v8299_v40, %v13752_v33  ;;  %v956_v18 = vpop.f32.mrb[11].mxu1  ;;  %v13755_v0 = vld [vmem:[#allocation14_spill] sm:$0xff] }
 0x226   :  { %9868 = vrcp.f32 %v1016_v29  ;;  %v9290_v23 = vadd.f32 %v956_v18, %v13753_v41  ;;  %v13756_v18 = vld [vmem:[#allocation17_spill] sm:$0xff] }
 0x227   :  { %v9855_v19 = vpop.eup %9854  ;;  %9870 = vrcp.f32 %v1015_v36 }
 0x228   :  { %v9857_v48 = vpop.eup %9856  ;;  %v1038_v20 = vadd.f32 1.0, %v9855_v19  ;;  %9872 = vtanh.f32 %v9288_v32  ;;  %v8302_v49 = vpop.f32.mrb[12].mxu1 }
 0x229   :  { %v1037_v37 = vadd.f32 1.0, %v9857_v48  ;;  %9874 = vtanh.f32 %v9289_v52  ;;  %v9291_v5 = vadd.f32 %v8302_v49, %v13754_v63  ;;  %v966_v25 = vpop.f32.mrb[13].mxu1  ;;  %v13757_v49 = vld [vmem:[#allocation18_spill] sm:$0xff] }
 0x22a   :  { %9876 = vrcp.f32 %v1038_v20  ;;  %v9292_v24 = vadd.f32 %v966_v25, %v13755_v0 }
 0x22b   :  { %v9859_v22 = vpop.eup %9858  ;;  %9878 = vrcp.f32 %v1037_v37  ;;  %v6959_v40 = vmul.f32 -1.442695, %v9291_v5 }
 0x22c   :  { %v9861_v29 = vpop.eup %9860  ;;  %v1040_v33 = vadd.f32 1.0, %v9859_v22  ;;  %9880 = vtanh.f32 %v9290_v23  ;;  %v6958_v36 = vmul.f32 -1.442695, %v9292_v24  ;;  %v8305_v19 = vpop.f32.mrb[14].mxu1 }
 0x22d   :  { %v9863_v32 = vpop.eup %9862  ;;  %9882 = vpow2.f32 %v6959_v40  ;;  %v9293_v41 = vadd.f32 %v8305_v19, %v13756_v18  ;;  %v976_v48 = vpop.f32.mrb[15].mxu1 }
 0x22e   :  { %v9865_v52 = vpop.eup %9864  ;;  %9884 = vrcp.f32 %v1040_v33  ;;  %v9294_v63 = vadd.f32 %v976_v48, %v13757_v49 }
 0x22f   :  { %v9867_v20 = vpop.eup %9866  ;;  %v1039_v28 = vadd.f32 1.0, %v9865_v52  ;;  %9886 = vpow2.f32 %v6958_v36  ;;  %v6961_v25 = vmul.f32 -1.442695, %v9293_v41 }
 0x230   :  { %v9869_v37 = vpop.eup %9868  ;;  %v1082_v5 = vmul.f32 %v9867_v20, %v9861_v29  ;;  %v6960_v0 = vmul.f32 -1.442695, %v9294_v63 }
 0x231   :  { %v9871_v22 = vpop.eup %9870  ;;  %9888 = vrcp.f32 %v1039_v28 }
 0x232   :  { %v9873_v23 = vpop.eup %9872  ;;  %9890 = vpow2.f32 %v6961_v25 }
 0x233   :  { %v9875_v24 = vpop.eup %9874  ;;  %v1081_v40 = vmul.f32 %v9873_v23, %v9863_v32  ;;  %9892 = vpow2.f32 %v6960_v0 }
 0x234   :  { %v9877_v19 = vpop.eup %9876  ;;  %v1084_v18 = vmul.f32 %v9875_v24, %v9869_v37 }
 0x235   :  { %v9879_v21 = vpop.eup %9878  ;;  %v1078_v33 = vmul.f32 %v9877_v19, %v11475_v45 }
 0x236   :  { %v9881_v48 = vpop.eup %9880  ;;  %v1077_v52 = vmul.f32 %v9879_v21, %v11477_v44 }
 0x237   :  { %v9883_v36 = vpop.eup %9882  ;;  %v11575_v41 = vadd.f32 %v1082_v5, %v1078_v33  ;;  %v1083_v29 = vmul.f32 %v9881_v48, %v9871_v22 }
 0x238   :  { %v9885_v63 = vpop.eup %9884  ;;  %v11577_v20 = vadd.f32 %v1081_v40, %v1077_v52  ;;  %v1066_v28 = vadd.f32 1.0, %v9883_v36 }
 0x239   :  { %v9887_v25 = vpop.eup %9886  ;;  %v1080_v32 = vmul.f32 %v9885_v63, %v11484_v62  ;;  %9894 = vtanh.f32 %v11575_v41 }
 0x23a   :  { %9896 = vtanh.f32 %v11577_v20  ;;  %v1065_v0 = vadd.f32 1.0, %v9887_v25 }
 0x23b   :  { %v9889_v45 = vpop.eup %9888  ;;  %v11582_v37 = vadd.f32 %v1084_v18, %v1080_v32  ;;  %9898 = vrcp.f32 %v1066_v28 }
 0x23c   :  { %v9891_v21 = vpop.eup %9890  ;;  %v1079_v44 = vmul.f32 %v9889_v45, %v11487_v1  ;;  %9900 = vrcp.f32 %v1065_v0  ;;  %v13760_v0 = vld [vmem:[#allocation11_spill] sm:$0xff] }
 0x23d   :  { %v9893_v5 = vpop.eup %9892  ;;  %9902 = vtanh.f32 %v11582_v37  ;;  %v1068_v22 = vadd.f32 1.0, %v9891_v21 }
 0x23e   :  { %v11586_v23 = vadd.f32 %v1083_v29, %v1079_v44  ;;  %v1067_v62 = vadd.f32 1.0, %v9893_v5 }
 0x23f   :  { %9904 = vrcp.f32 %v1068_v22 }
 0x240   :  { %9906 = vtanh.f32 %v11586_v23 }
 0x241   :  { %9908 = vrcp.f32 %v1067_v62  ;;  %v13761_v62 = vld [vmem:[#allocation12_spill] sm:$0xff] }
 0x243   :  { %v9895_v24 = vpop.eup %9894 }
 0x244   :  { %v9897_v40 = vpop.eup %9896 }
 0x245   :  { %v9899_v18 = vpop.eup %9898 }
 0x246   :  { %v9901_v19 = vpop.eup %9900  ;;  %v1094_v33 = vmul.f32 %v9899_v18, %v9895_v24 }
 0x247   :  { %v9903_v48 = vpop.eup %9902  ;;  %v1093_v52 = vmul.f32 %v9901_v19, %v9897_v40  ;;  %v13762_v19 = vld [vmem:[#allocation15_spill] sm:$0xff] }
 0x249   :  { %v9905_v1 = vpop.eup %9904  ;;  %v9145_v36 = vpack.c.bf16 %v1094_v33, %v1093_v52 }
 0x24a   :  { %v9907_v63 = vpop.eup %9906  ;;  %v1096_v28 = vmul.f32 %v9905_v1, %v9903_v48 }
 0x24b   :  { %v9909_v25 = vpop.eup %9908  ;;  %9146 = vmatprep.subr.bf16.mxu0 %v9145_v36 }
 0x24c   :  { %9148 = vmatpush3.bf16.msra.mxu0 %v9145_v36  ;;  %v1095_v29 = vmul.f32 %v9909_v25, %v9907_v63  ;;  %v13763_v63 = vld [vmem:[#allocation16_spill] sm:$0xff] }
 0x24e   :  { %v9149_v32 = vpack.c.bf16 %v1096_v28, %v1095_v29 }
 0x250   :  { %9150 = vmatprep.subr.bf16.mxu0 %v9149_v32 }
 0x251   :  { %9152 = vmatpush3.bf16.msra.mxu0 %v9149_v32  ;;  %v13764_v32 = vld [vmem:[#allocation13_spill] sm:$0xff] }
 0x254   :  { %8341 = vmatmul.mubr.msk.f32.vlgmr.msra.gmra.mrb[16].mxu0 %vm387_vm2, %v11239_v42  ;;  %v7007_v42 = vld [vmem:[%s13644_s0 + $0x18] sm:$0xff] }
 0x255   :  { %8343 = vmatprep.mubr.msk.f32.mxu0 %vm387_vm2, %v11244_v43  ;;  %8364 = vmatprep.subr.mxu1 %v7007_v42 }
 0x256   :  { %8365 = vmatpush3.msra.mxu1 %v7007_v42 }
 0x257   :  { %8367 = vmatmul.mubr.msk.f32.vlgmr.msra.gmra.mrb[16].mxu1 %vm193_vm0, %v11047_v3 }
 0x258   :  { %8344 = vmatmul.mubr.msk.f32.gmra.mrb[18].mxu0 %vm387_vm2, %v11259_v46  ;;  %8369 = vmatprep.mubr.msk.f32.mxu1 %vm193_vm0, %v11054_v4 }
 0x259   :  { %8346 = vmatprep.mubr.msk.f32.mxu0 %vm387_vm2, %v11264_v47  ;;  %v13758_v47 = vld [vmem:[#allocation9_spill] sm:$0xff] }
 0x25b   :  { %8370 = vmatmul.mubr.msk.f32.gmra.mrb[18].mxu1 %vm193_vm0, %v11063_v6 }
 0x25c   :  { %8347 = vmatmul.mubr.msk.f32.gmra.mrb[20].mxu0 %vm387_vm2, %v11279_v50  ;;  %8372 = vmatprep.mubr.msk.f32.mxu1 %vm193_vm0, %v11070_v7 }
 0x25d   :  { %8349 = vmatprep.mubr.msk.f32.mxu0 %vm387_vm2, %v11284_v51 }
 0x25f   :  { %8373 = vmatmul.mubr.msk.f32.gmra.mrb[20].mxu1 %vm193_vm0, %v11107_v12 }
 0x260   :  { %8350 = vmatmul.mubr.msk.f32.gmra.mrb[22].mxu0 %vm387_vm2, %v11293_v53  ;;  %8375 = vmatprep.mubr.msk.f32.mxu1 %vm193_vm0, %v11112_v13  ;;  %v13759_v53 = vld [vmem:[#allocation10_spill] sm:$0xff] }
 0x261   :  { %8352 = vmatprep.mubr.msk.f32.mxu0 %vm387_vm2, %v11298_v54 }
 0x263   :  { %8376 = vmatmul.mubr.msk.f32.gmra.mrb[22].mxu1 %vm193_vm0, %v11121_v14 }
 0x264   :  { %8353 = vmatmul.mubr.msk.f32.gmra.mrb[24].mxu0 %vm387_vm2, %v11307_v55  ;;  %8378 = vmatprep.mubr.msk.f32.mxu1 %vm193_vm0, %v11132_v17 }
 0x265   :  { %8355 = vmatprep.mubr.msk.f32.mxu0 %vm387_vm2, %v11312_v56 }
 0x267   :  { %8379 = vmatmul.mubr.msk.f32.gmra.mrb[24].mxu1 %vm193_vm0, %v11159_v26 }
 0x268   :  { %8356 = vmatmul.mubr.msk.f32.gmra.mrb[26].mxu0 %vm387_vm2, %v11321_v57  ;;  %8381 = vmatprep.mubr.msk.f32.mxu1 %vm193_vm0, %v11164_v27 }
 0x269   :  { %8358 = vmatprep.mubr.msk.f32.mxu0 %vm387_vm2, %v11326_v58 }
 0x26b   :  { %8382 = vmatmul.mubr.msk.f32.gmra.mrb[26].mxu1 %vm193_vm0, %v11179_v30 }
 0x26c   :  { %8359 = vmatmul.mubr.msk.f32.gmra.mrb[28].mxu0 %vm387_vm2, %v11335_v59  ;;  %8384 = vmatprep.mubr.msk.f32.mxu1 %vm193_vm0, %v11184_v31 }
 0x26d   :  { %8361 = vmatprep.mubr.msk.f32.mxu0 %vm387_vm2, %v11340_v60 }
 0x26f   :  { %8385 = vmatmul.mubr.msk.f32.gmra.mrb[28].mxu1 %vm193_vm0, %v11199_v34 }
 0x270   :  { %8362 = vmatmul.mubr.msk.f32.gmra.mrb[30].mxu0 %vm387_vm2, %v11349_v61  ;;  %8387 = vmatprep.mubr.msk.f32.mxu1 %vm193_vm0, %v11204_v35 }
 0x271   :  { %8424 = vmatprep.mubr.msk.f32.mxu0 %vm193_vm0, %v11042_v2 }
 0x273   :  { %8388 = vmatmul.mubr.msk.f32.gmra.mrb[30].mxu1 %vm193_vm0, %v11219_v38 }
 0x274   :  { %8398 = vmatprep.mubr.msk.f32.mxu1 %vm387_vm2, %v11224_v39 }
 0x327   :  { %v8342_v2 = vpop.f32.mrb[16].mxu0 }
 0x328   :  { %v9295_v3 = vadd.f32 %v8342_v2, %v11424_v11  ;;  %v1310_v4 = vpop.f32.mrb[17].mxu0 }
 0x329   :  { %v9296_v6 = vadd.f32 %v1310_v4, %v11420_v9 }
 0x32a   :  { %v6996_v7 = vmul.f32 -1.442695, %v9295_v3  ;;  %v13765_v3 = vld [vmem:[#allocation14_spill] sm:$0xff] }
 0x32b   :  { %v6995_v12 = vmul.f32 -1.442695, %v9296_v6  ;;  %v8345_v13 = vpop.f32.mrb[18].mxu0 }
 0x32c   :  { %9910 = vpow2.f32 %v6996_v7  ;;  %v9297_v14 = vadd.f32 %v8345_v13, %v11426_v15  ;;  %v1320_v17 = vpop.f32.mrb[19].mxu0 }
 0x32d   :  { %9912 = vpow2.f32 %v6995_v12  ;;  %v9298_v26 = vadd.f32 %v1320_v17, %v11428_v16 }
 0x32e   :  { %v6998_v27 = vmul.f32 -1.442695, %v9297_v14 }
 0x32f   :  { %v6997_v30 = vmul.f32 -1.442695, %v9298_v26  ;;  %v8348_v31 = vpop.f32.mrb[20].mxu0 }
 0x330   :  { %9914 = vpow2.f32 %v6998_v27  ;;  %v9299_v34 = vadd.f32 %v8348_v31, %v11422_v10  ;;  %v1330_v35 = vpop.f32.mrb[21].mxu0  ;;  %v13766_v27 = vld [vmem:[#allocation17_spill] sm:$0xff] }
 0x331   :  { %9916 = vpow2.f32 %v6997_v30  ;;  %v9300_v38 = vadd.f32 %v1330_v35, %v11418_v8 }
 0x332   :  { %v7000_v39 = vmul.f32 -1.442695, %v9299_v34 }
 0x333   :  { %v6999_v43 = vmul.f32 -1.442695, %v9300_v38  ;;  %v8351_v46 = vpop.f32.mrb[22].mxu0 }
 0x334   :  { %9918 = vpow2.f32 %v7000_v39  ;;  %v9301_v50 = vadd.f32 %v8351_v46, %v13758_v47  ;;  %v1340_v51 = vpop.f32.mrb[23].mxu0 }
 0x335   :  { %9920 = vpow2.f32 %v6999_v43  ;;  %v9302_v54 = vadd.f32 %v1340_v51, %v13759_v53 }
 0x336   :  { %v9911_v55 = vpop.eup %9910  ;;  %v7002_v56 = vmul.f32 -1.442695, %v9301_v50 }
 0x337   :  { %v9913_v57 = vpop.eup %9912  ;;  %v1418_v58 = vadd.f32 1.0, %v9911_v55  ;;  %v7001_v59 = vmul.f32 -1.442695, %v9302_v54  ;;  %v8354_v60 = vpop.f32.mrb[24].mxu0 }
 0x338   :  { %v1417_v61 = vadd.f32 1.0, %v9913_v57  ;;  %9922 = vpow2.f32 %v7002_v56  ;;  %v9303_v45 = vadd.f32 %v8354_v60, %v13760_v0  ;;  %v1350_v21 = vpop.f32.mrb[25].mxu0 }
 0x339   :  { %9924 = vrcp.f32 %v1418_v58  ;;  %v9304_v24 = vadd.f32 %v1350_v21, %v13761_v62 }
 0x33a   :  { %v9915_v44 = vpop.eup %9914  ;;  %9926 = vrcp.f32 %v1417_v61 }
 0x33b   :  { %v9917_v5 = vpop.eup %9916  ;;  %v1420_v22 = vadd.f32 1.0, %v9915_v44  ;;  %9928 = vpow2.f32 %v7001_v59  ;;  %v8357_v40 = vpop.f32.mrb[26].mxu0 }
 0x33c   :  { %v1419_v18 = vadd.f32 1.0, %v9917_v5  ;;  %9930 = vtanh.f32 %v9303_v45  ;;  %v9305_v33 = vadd.f32 %v8357_v40, %v13762_v19  ;;  %v1360_v48 = vpop.f32.mrb[27].mxu0 }
 0x33d   :  { %9932 = vrcp.f32 %v1420_v22  ;;  %v9306_v28 = vadd.f32 %v1360_v48, %v13763_v63 }
 0x33e   :  { %v9919_v52 = vpop.eup %9918  ;;  %9934 = vrcp.f32 %v1419_v18 }
 0x33f   :  { %v9921_v1 = vpop.eup %9920  ;;  %v1442_v36 = vadd.f32 1.0, %v9919_v52  ;;  %9936 = vtanh.f32 %v9304_v24  ;;  %v8360_v25 = vpop.f32.mrb[28].mxu0 }
 0x340   :  { %v1441_v29 = vadd.f32 1.0, %v9921_v1  ;;  %9938 = vtanh.f32 %v9305_v33  ;;  %v9307_v42 = vadd.f32 %v8360_v25, %v13764_v32  ;;  %v1370_v2 = vpop.f32.mrb[29].mxu0 }
 0x341   :  { %9940 = vrcp.f32 %v1442_v36  ;;  %v9308_v4 = vadd.f32 %v1370_v2, %v13765_v3 }
 0x342   :  { %v9923_v6 = vpop.eup %9922  ;;  %9942 = vrcp.f32 %v1441_v29  ;;  %v7004_v7 = vmul.f32 -1.442695, %v9307_v42 }
 0x343   :  { %v9925_v12 = vpop.eup %9924  ;;  %v1444_v13 = vadd.f32 1.0, %v9923_v6  ;;  %9944 = vtanh.f32 %v9306_v28  ;;  %v7003_v14 = vmul.f32 -1.442695, %v9308_v4  ;;  %v8363_v17 = vpop.f32.mrb[30].mxu0 }
 0x344   :  { %v9927_v26 = vpop.eup %9926  ;;  %9946 = vpow2.f32 %v7004_v7  ;;  %v9309_v30 = vadd.f32 %v8363_v17, %v13766_v27  ;;  %v1380_v31 = vpop.f32.mrb[31].mxu0 }
 0x345   :  { %v9929_v34 = vpop.eup %9928  ;;  %9948 = vrcp.f32 %v1444_v13  ;;  %v9310_v35 = vadd.f32 %v1380_v31, %v13757_v49 }
 0x346   :  { %v9931_v38 = vpop.eup %9930  ;;  %v1443_v39 = vadd.f32 1.0, %v9929_v34  ;;  %9950 = vpow2.f32 %v7003_v14  ;;  %v7006_v43 = vmul.f32 -1.442695, %v9309_v30 }
 0x347   :  { %v9933_v46 = vpop.eup %9932  ;;  %v1486_v50 = vmul.f32 %v9931_v38, %v9925_v12  ;;  %v7005_v51 = vmul.f32 -1.442695, %v9310_v35  ;;  %v11691_v35 = vld [vmem:[%s13649_s5 + $0x8] sm:$0xff]  ;;  %v11698_v38 = vld [vmem:[%s13649_s5 + $0x10] sm:$0xff] }
 0x348   :  { %v9935_v54 = vpop.eup %9934  ;;  %9952 = vrcp.f32 %v1443_v39  ;;  %v11705_v39 = vld [vmem:[%s13649_s5 + $0x18] sm:$0xff] }
 0x349   :  { %v9937_v55 = vpop.eup %9936  ;;  %9954 = vpow2.f32 %v7006_v43  ;;  %v11712_v43 = vld [vmem:[%s13649_s5 + $0x20] sm:$0xff] }
 0x34a   :  { %v9939_v56 = vpop.eup %9938  ;;  %v1485_v57 = vmul.f32 %v9937_v55, %v9927_v26  ;;  %9956 = vpow2.f32 %v7005_v51  ;;  %v11733_v51 = vld [vmem:[%s13649_s5 + $0x38] sm:$0xff]  ;;  %v11747_v55 = vld [vmem:[%s13649_s5 + $0x48] sm:$0xff] }
 0x34b   :  { %v9941_v58 = vpop.eup %9940  ;;  %v1488_v59 = vmul.f32 %v9939_v56, %v9933_v46  ;;  %v11719_v46 = vld [vmem:[%s13649_s5 + $0x28] sm:$0xff]  ;;  %v11754_v56 = vld [vmem:[%s13649_s5 + $0x50] sm:$0xff] }
 0x34c   :  { %v9943_v60 = vpop.eup %9942  ;;  %v1482_v61 = vmul.f32 %v9941_v58, %v11575_v41  ;;  %v11768_v58 = vld [vmem:[%s13649_s5 + $0x60] sm:$0xff] }
 0x34d   :  { %v9945_v45 = vpop.eup %9944  ;;  %v1481_v21 = vmul.f32 %v9943_v60, %v11577_v20  ;;  %v11782_v60 = vld [vmem:[%s13649_s5 + $0x70] sm:$0xff] }
 0x34e   :  { %v9947_v44 = vpop.eup %9946  ;;  %v11674_v5 = vadd.f32 %v1486_v50, %v1482_v61  ;;  %v1487_v22 = vmul.f32 %v9945_v45, %v9935_v54  ;;  %v11726_v50 = vld [vmem:[%s13649_s5 + $0x30] sm:$0xff]  ;;  %v11740_v54 = vld [vmem:[%s13649_s5 + $0x40] sm:$0xff]  ;;  %v11789_v61 = vld [vmem:[%s13649_s5 + $0x78] sm:$0xff] }
 0x34f   :  { %v9949_v24 = vpop.eup %9948  ;;  %v11676_v40 = vadd.f32 %v1485_v57, %v1481_v21  ;;  %v1470_v18 = vadd.f32 1.0, %v9947_v44  ;;  %v11761_v57 = vld [vmem:[%s13649_s5 + $0x58] sm:$0xff]  ;;  %v11796_v45 = vld [vmem:[%s13647_s3] sm:$0xff]  ;;  %v11806_v44 = vld [vmem:[%s13647_s3 + $0x8] sm:$0xff] }
 0x350   :  { %v9951_v33 = vpop.eup %9950  ;;  %v1484_v48 = vmul.f32 %v9949_v24, %v11582_v37  ;;  %9958 = vtanh.f32 %v11674_v5  ;;  %v7052_v21 = vld [vmem:[%s13644_s0 + $0x20] sm:$0xff]  ;;  %v11820_v24 = vld [vmem:[%s13647_s3 + $0x18] sm:$0xff] }
 0x351   :  { %9960 = vtanh.f32 %v11676_v40  ;;  %v1469_v52 = vadd.f32 1.0, %v9951_v33  ;;  %8422 = vmatprep.subr.mxu0 %v7052_v21  ;;  %v11834_v33 = vld [vmem:[%s13647_s3 + $0x28] sm:$0xff] }
 0x352   :  { %v9953_v41 = vpop.eup %9952  ;;  %v11681_v1 = vadd.f32 %v1488_v59, %v1484_v48  ;;  %9962 = vrcp.f32 %v1470_v18  ;;  %v11775_v59 = vld [vmem:[%s13649_s5 + $0x68] sm:$0xff]  ;;  %8423 = vmatpush3.msra.mxu0 %v7052_v21  ;;  %v11827_v18 = vld [vmem:[%s13647_s3 + $0x20] sm:$0xff]  ;;  %v11841_v48 = vld [vmem:[%s13647_s3 + $0x30] sm:$0xff] }
 0x353   :  { %v9955_v20 = vpop.eup %9954  ;;  %v1483_v36 = vmul.f32 %v9953_v41, %v11586_v23  ;;  %9964 = vrcp.f32 %v1469_v52  ;;  %8425 = vmatmul.mubr.msk.f32.vlgmr.msra.gmra.mrb[32].mxu0 %vm193_vm0, %v11806_v44  ;;  %v11848_v52 = vld [vmem:[%s13647_s3 + $0x38] sm:$0xff]  ;;  %v11855_v41 = vld [vmem:[%s13647_s3 + $0x40] sm:$0xff] }
 0x354   :  { %v9957_v28 = vpop.eup %9956  ;;  %9966 = vtanh.f32 %v11681_v1  ;;  %v1472_v25 = vadd.f32 1.0, %v9955_v20  ;;  %v11862_v20 = vld [vmem:[%s13647_s3 + $0x48] sm:$0xff] }
 0x355   :  { %v11685_v29 = vadd.f32 %v1487_v22, %v1483_v36  ;;  %v1471_v37 = vadd.f32 1.0, %v9957_v28  ;;  %v11813_v22 = vld [vmem:[%s13647_s3 + $0x10] sm:$0xff]  ;;  %v11876_v28 = vld [vmem:[%s13647_s3 + $0x58] sm:$0xff] }
 0x356   :  { %9968 = vrcp.f32 %v1472_v25  ;;  %8427 = vmatprep.mubr.msk.f32.mxu0 %vm193_vm0, %v11813_v22  ;;  %v11869_v36 = vld [vmem:[%s13647_s3 + $0x50] sm:$0xff]  ;;  %v11883_v25 = vld [vmem:[%s13647_s3 + $0x60] sm:$0xff] }
 0x357   :  { %9970 = vtanh.f32 %v11685_v29  ;;  %8428 = vmatmul.mubr.msk.f32.gmra.mrb[34].mxu0 %vm193_vm0, %v11820_v24 }
 0x358   :  { %9972 = vrcp.f32 %v1471_v37  ;;  %8430 = vmatprep.mubr.msk.f32.mxu0 %vm193_vm0, %v11827_v18  ;;  %v11890_v37 = vld [vmem:[%s13647_s3 + $0x68] sm:$0xff] }
 0x35a   :  { %v9959_v42 = vpop.eup %9958 }
 0x35b   :  { %v9961_v2 = vpop.eup %9960  ;;  %8431 = vmatmul.mubr.msk.f32.gmra.mrb[36].mxu0 %vm193_vm0, %v11834_v33 }
 0x35c   :  { %v9963_v4 = vpop.eup %9962  ;;  %8433 = vmatprep.mubr.msk.f32.mxu0 %vm193_vm0, %v11841_v48 }
 0x35d   :  { %v9965_v6 = vpop.eup %9964  ;;  %v1498_v7 = vmul.f32 %v9963_v4, %v9959_v42  ;;  %v11897_v42 = vld [vmem:[%s13647_s3 + $0x70] sm:$0xff]  ;;  %v11911_v4 = vld [vmem:[%s13649_s5] sm:$0xff] }
 0x35e   :  { %v9967_v12 = vpop.eup %9966  ;;  %v1497_v13 = vmul.f32 %v9965_v6, %v9961_v2  ;;  %v11904_v2 = vld [vmem:[%s13647_s3 + $0x78] sm:$0xff]  ;;  %13768 = vst [vmem:[#allocation9_spill] sm:$0xff] %v11911_v4 }
 0x35f   :  { %8434 = vmatmul.mubr.msk.f32.gmra.mrb[38].mxu0 %vm193_vm0, %v11848_v52  ;;  %13767 = vst [vmem:[#allocation18_spill] sm:$0xff] %v11904_v2 }
 0x360   :  { %v9969_v23 = vpop.eup %9968  ;;  %v9153_v14 = vpack.c.bf16 %v1498_v7, %v1497_v13  ;;  %8436 = vmatprep.mubr.msk.f32.mxu0 %vm193_vm0, %v11855_v41 }
 0x361   :  { %v9971_v17 = vpop.eup %9970  ;;  %v1500_v26 = vmul.f32 %v9969_v23, %v9967_v12 }
 0x362   :  { %v9973_v30 = vpop.eup %9972  ;;  %9154 = vmatprep.subr.bf16.mxu1 %v9153_v14 }
 0x363   :  { %9156 = vmatpush3.bf16.msra.mxu1 %v9153_v14  ;;  %v1499_v31 = vmul.f32 %v9973_v30, %v9971_v17  ;;  %8437 = vmatmul.mubr.msk.f32.gmra.mrb[40].mxu0 %vm193_vm0, %v11862_v20 }
 0x364   :  { %8439 = vmatprep.mubr.msk.f32.mxu0 %vm193_vm0, %v11869_v36 }
 0x365   :  { %v9157_v34 = vpack.c.bf16 %v1500_v26, %v1499_v31 }
 0x367   :  { %9158 = vmatprep.subr.bf16.mxu1 %v9157_v34  ;;  %8440 = vmatmul.mubr.msk.f32.gmra.mrb[42].mxu0 %vm193_vm0, %v11876_v28 }
 0x368   :  { %9160 = vmatpush3.bf16.msra.mxu1 %v9157_v34  ;;  %8442 = vmatprep.mubr.msk.f32.mxu0 %vm193_vm0, %v11883_v25 }
 0x36b   :  { %8399 = vmatmul.mubr.msk.f32.vlgmr.msra.gmra.mrb[16].mxu1 %vm387_vm2, %v11691_v35  ;;  %8443 = vmatmul.mubr.msk.f32.gmra.mrb[44].mxu0 %vm193_vm0, %v11890_v37 }
 0x36c   :  { %8401 = vmatprep.mubr.msk.f32.mxu1 %vm387_vm2, %v11698_v38  ;;  %8445 = vmatprep.mubr.msk.f32.mxu0 %vm193_vm0, %v11897_v42 }
 0x36f   :  { %8402 = vmatmul.mubr.msk.f32.gmra.mrb[18].mxu1 %vm387_vm2, %v11705_v39  ;;  %8446 = vmatmul.mubr.msk.f32.gmra.mrb[46].mxu0 %vm193_vm0, %v11904_v2 }
 0x370   :  { %8404 = vmatprep.mubr.msk.f32.mxu1 %vm387_vm2, %v11712_v43  ;;  %8456 = vmatprep.mubr.msk.f32.mxu0 %vm387_vm2, %v11911_v4 }
 0x373   :  { %8405 = vmatmul.mubr.msk.f32.gmra.mrb[20].mxu1 %vm387_vm2, %v11719_v46 }
 0x374   :  { %8407 = vmatprep.mubr.msk.f32.mxu1 %vm387_vm2, %v11726_v50 }
 0x377   :  { %8408 = vmatmul.mubr.msk.f32.gmra.mrb[22].mxu1 %vm387_vm2, %v11733_v51 }
 0x378   :  { %8410 = vmatprep.mubr.msk.f32.mxu1 %vm387_vm2, %v11740_v54 }
 0x37b   :  { %8411 = vmatmul.mubr.msk.f32.gmra.mrb[24].mxu1 %vm387_vm2, %v11747_v55 }
 0x37c   :  { %8413 = vmatprep.mubr.msk.f32.mxu1 %vm387_vm2, %v11754_v56 }
 0x37f   :  { %8414 = vmatmul.mubr.msk.f32.gmra.mrb[26].mxu1 %vm387_vm2, %v11761_v57 }
 0x380   :  { %8416 = vmatprep.mubr.msk.f32.mxu1 %vm387_vm2, %v11768_v58 }
 0x383   :  { %8417 = vmatmul.mubr.msk.f32.gmra.mrb[28].mxu1 %vm387_vm2, %v11775_v59 }
 0x384   :  { %8419 = vmatprep.mubr.msk.f32.mxu1 %vm387_vm2, %v11782_v60 }
 0x387   :  { %8420 = vmatmul.mubr.msk.f32.gmra.mrb[30].mxu1 %vm387_vm2, %v11789_v61 }
 0x388   :  { %8482 = vmatprep.mubr.msk.f32.mxu1 %vm193_vm0, %v11796_v45 }
 0x43e   :  { %v8400_v6 = vpop.f32.mrb[16].mxu1 }
 0x43f   :  { %v9311_v7 = vadd.f32 %v8400_v6, %v11424_v11  ;;  %v1714_v12 = vpop.f32.mrb[17].mxu1 }
 0x440   :  { %v9312_v13 = vadd.f32 %v1714_v12, %v11420_v9 }
 0x441   :  { %v7041_v23 = vmul.f32 -1.442695, %v9311_v7 }
 0x442   :  { %v7040_v14 = vmul.f32 -1.442695, %v9312_v13  ;;  %v8403_v17 = vpop.f32.mrb[18].mxu1 }
 0x443   :  { %9974 = vpow2.f32 %v7041_v23  ;;  %v9313_v26 = vadd.f32 %v8403_v17, %v11426_v15  ;;  %v1724_v30 = vpop.f32.mrb[19].mxu1 }
 0x444   :  { %9976 = vpow2.f32 %v7040_v14  ;;  %v9314_v31 = vadd.f32 %v1724_v30, %v11428_v16 }
 0x445   :  { %v7043_v34 = vmul.f32 -1.442695, %v9313_v26 }
 0x446   :  { %v7042_v21 = vmul.f32 -1.442695, %v9314_v31  ;;  %v8406_v2 = vpop.f32.mrb[20].mxu1 }
 0x447   :  { %9978 = vpow2.f32 %v7043_v34  ;;  %v9315_v4 = vadd.f32 %v8406_v2, %v11422_v10  ;;  %v1734_v6 = vpop.f32.mrb[21].mxu1 }
 0x448   :  { %9980 = vpow2.f32 %v7042_v21  ;;  %v9316_v12 = vadd.f32 %v1734_v6, %v11418_v8 }
 0x449   :  { %v7045_v7 = vmul.f32 -1.442695, %v9315_v4 }
 0x44a   :  { %v7044_v13 = vmul.f32 -1.442695, %v9316_v12  ;;  %v8409_v9 = vpop.f32.mrb[22].mxu1 }
 0x44b   :  { %9982 = vpow2.f32 %v7045_v7  ;;  %v9317_v23 = vadd.f32 %v8409_v9, %v13758_v47  ;;  %v1744_v17 = vpop.f32.mrb[23].mxu1 }
 0x44c   :  { %9984 = vpow2.f32 %v7044_v13  ;;  %v9318_v14 = vadd.f32 %v1744_v17, %v13759_v53 }
 0x44d   :  { %v9975_v26 = vpop.eup %9974  ;;  %v7047_v30 = vmul.f32 -1.442695, %v9317_v23 }
 0x44e   :  { %v9977_v31 = vpop.eup %9976  ;;  %v1822_v34 = vadd.f32 1.0, %v9975_v26  ;;  %v7046_v16 = vmul.f32 -1.442695, %v9318_v14  ;;  %v8412_v2 = vpop.f32.mrb[24].mxu1 }
 0x44f   :  { %v1821_v10 = vadd.f32 1.0, %v9977_v31  ;;  %9986 = vpow2.f32 %v7047_v30  ;;  %v9319_v21 = vadd.f32 %v8412_v2, %v13760_v0  ;;  %v1754_v4 = vpop.f32.mrb[25].mxu1 }
 0x450   :  { %9988 = vrcp.f32 %v1822_v34  ;;  %v9320_v7 = vadd.f32 %v1754_v4, %v13761_v62 }
 0x451   :  { %v9979_v6 = vpop.eup %9978  ;;  %9990 = vrcp.f32 %v1821_v10 }
 0x452   :  { %v9981_v12 = vpop.eup %9980  ;;  %v1824_v9 = vadd.f32 1.0, %v9979_v6  ;;  %9992 = vpow2.f32 %v7046_v16  ;;  %v8415_v13 = vpop.f32.mrb[26].mxu1 }
 0x453   :  { %v1823_v17 = vadd.f32 1.0, %v9981_v12  ;;  %9994 = vtanh.f32 %v9319_v21  ;;  %v9321_v23 = vadd.f32 %v8415_v13, %v13762_v19  ;;  %v1764_v14 = vpop.f32.mrb[27].mxu1 }
 0x454   :  { %9996 = vrcp.f32 %v1824_v9  ;;  %v9322_v34 = vadd.f32 %v1764_v14, %v13763_v63 }
 0x455   :  { %v9983_v26 = vpop.eup %9982  ;;  %9998 = vrcp.f32 %v1823_v17 }
 0x456   :  { %v9985_v30 = vpop.eup %9984  ;;  %v1846_v31 = vadd.f32 1.0, %v9983_v26  ;;  %10000 = vtanh.f32 %v9320_v7  ;;  %v8418_v10 = vpop.f32.mrb[28].mxu1 }
 0x457   :  { %v1845_v2 = vadd.f32 1.0, %v9985_v30  ;;  %10002 = vtanh.f32 %v9321_v23  ;;  %v9323_v16 = vadd.f32 %v8418_v10, %v13764_v32  ;;  %v1774_v4 = vpop.f32.mrb[29].mxu1 }
 0x458   :  { %10004 = vrcp.f32 %v1846_v31  ;;  %v9324_v21 = vadd.f32 %v1774_v4, %v13765_v3 }
 0x459   :  { %v9987_v6 = vpop.eup %9986  ;;  %10006 = vrcp.f32 %v1845_v2  ;;  %v7049_v12 = vmul.f32 -1.442695, %v9323_v16 }
 0x45a   :  { %v9989_v9 = vpop.eup %9988  ;;  %v1848_v13 = vadd.f32 1.0, %v9987_v6  ;;  %10008 = vtanh.f32 %v9322_v34  ;;  %v7048_v17 = vmul.f32 -1.442695, %v9324_v21  ;;  %v8421_v26 = vpop.f32.mrb[30].mxu1 }
 0x45b   :  { %v9991_v7 = vpop.eup %9990  ;;  %10010 = vpow2.f32 %v7049_v12  ;;  %v9325_v14 = vadd.f32 %v8421_v26, %v13766_v27  ;;  %v1784_v30 = vpop.f32.mrb[31].mxu1 }
 0x45c   :  { %v9993_v23 = vpop.eup %9992  ;;  %10012 = vrcp.f32 %v1848_v13  ;;  %v9326_v10 = vadd.f32 %v1784_v30, %v13757_v49 }
 0x45d   :  { %v9995_v31 = vpop.eup %9994  ;;  %v1847_v32 = vadd.f32 1.0, %v9993_v23  ;;  %10014 = vpow2.f32 %v7048_v17  ;;  %v7051_v4 = vmul.f32 -1.442695, %v9325_v14 }
 0x45e   :  { %v9997_v2 = vpop.eup %9996  ;;  %v1890_v16 = vmul.f32 %v9995_v31, %v9989_v9  ;;  %v7050_v3 = vmul.f32 -1.442695, %v9326_v10 }
 0x45f   :  { %v9999_v6 = vpop.eup %9998  ;;  %10016 = vrcp.f32 %v1847_v32 }
 0x460   :  { %v10001_v34 = vpop.eup %10000  ;;  %10018 = vpow2.f32 %v7051_v4 }
 0x461   :  { %v10003_v21 = vpop.eup %10002  ;;  %v1889_v12 = vmul.f32 %v10001_v34, %v9991_v7  ;;  %10020 = vpow2.f32 %v7050_v3 }
 0x462   :  { %v10005_v26 = vpop.eup %10004  ;;  %v1892_v27 = vmul.f32 %v10003_v21, %v9997_v2 }
 0x463   :  { %v10007_v63 = vpop.eup %10006  ;;  %v1886_v13 = vmul.f32 %v10005_v26, %v11674_v5 }
 0x464   :  { %v10009_v30 = vpop.eup %10008  ;;  %v1885_v23 = vmul.f32 %v10007_v63, %v11676_v40 }
 0x465   :  { %v10011_v17 = vpop.eup %10010  ;;  %v11933_v14 = vadd.f32 %v1890_v16, %v1886_v13  ;;  %v1891_v9 = vmul.f32 %v10009_v30, %v9999_v6 }
 0x466   :  { %v10013_v10 = vpop.eup %10012  ;;  %v11935_v31 = vadd.f32 %v1889_v12, %v1885_v23  ;;  %v1874_v32 = vadd.f32 1.0, %v10011_v17 }
 0x467   :  { %v10015_v4 = vpop.eup %10014  ;;  %v1888_v7 = vmul.f32 %v10013_v10, %v11681_v1  ;;  %10022 = vtanh.f32 %v11933_v14 }
 0x468   :  { %10024 = vtanh.f32 %v11935_v31  ;;  %v1873_v3 = vadd.f32 1.0, %v10015_v4 }
 0x469   :  { %v10017_v5 = vpop.eup %10016  ;;  %v11940_v2 = vadd.f32 %v1892_v27, %v1888_v7  ;;  %10026 = vrcp.f32 %v1874_v32 }
 0x46a   :  { %v10019_v63 = vpop.eup %10018  ;;  %v1887_v40 = vmul.f32 %v10017_v5, %v11685_v29  ;;  %10028 = vrcp.f32 %v1873_v3  ;;  %v7097_v3 = vld [vmem:[%s13644_s0 + $0x28] sm:$0xff] }
 0x46b   :  { %v10021_v16 = vpop.eup %10020  ;;  %10030 = vtanh.f32 %v11940_v2  ;;  %v1876_v6 = vadd.f32 1.0, %v10019_v63  ;;  %8480 = vmatprep.subr.mxu1 %v7097_v3  ;;  %v13769_v5 = vld [vmem:[#allocation18_spill] sm:$0xff]  ;;  %v13770_v63 = vld [vmem:[#allocation9_spill] sm:$0xff] }
 0x46c   :  { %v11944_v34 = vadd.f32 %v1891_v9, %v1887_v40  ;;  %v1875_v1 = vadd.f32 1.0, %v10021_v16  ;;  %8481 = vmatpush3.msra.mxu1 %v7097_v3 }
 0x46d   :  { %10032 = vrcp.f32 %v1876_v6  ;;  %8483 = vmatmul.mubr.msk.f32.vlgmr.msra.gmra.mrb[32].mxu1 %vm193_vm0, %v11806_v44 }
 0x46e   :  { %10034 = vtanh.f32 %v11944_v34  ;;  %8485 = vmatprep.mubr.msk.f32.mxu1 %vm193_vm0, %v11813_v22 }
 0x46f   :  { %10036 = vrcp.f32 %v1875_v1  ;;  %v13771_v1 = vld [vmem:[#allocation6_spill] sm:$0xff] }
 0x471   :  { %v10023_v21 = vpop.eup %10022  ;;  %8486 = vmatmul.mubr.msk.f32.gmra.mrb[34].mxu1 %vm193_vm0, %v11820_v24 }
 0x472   :  { %v10025_v12 = vpop.eup %10024  ;;  %8488 = vmatprep.mubr.msk.f32.mxu1 %vm193_vm0, %v11827_v18 }
 0x473   :  { %v10027_v27 = vpop.eup %10026 }
 0x474   :  { %v10029_v26 = vpop.eup %10028  ;;  %v1902_v13 = vmul.f32 %v10027_v27, %v10023_v21 }
 0x475   :  { %v10031_v30 = vpop.eup %10030  ;;  %v1901_v23 = vmul.f32 %v10029_v26, %v10025_v12  ;;  %8489 = vmatmul.mubr.msk.f32.gmra.mrb[36].mxu1 %vm193_vm0, %v11834_v33 }
 0x476   :  { %8491 = vmatprep.mubr.msk.f32.mxu1 %vm193_vm0, %v11841_v48 }
 0x477   :  { %v10033_v29 = vpop.eup %10032  ;;  %v9161_v17 = vpack.c.bf16 %v1902_v13, %v1901_v23  ;;  %v13772_v23 = vld [vmem:[#allocation8_spill] sm:$0xff] }
 0x478   :  { %v10035_v10 = vpop.eup %10034  ;;  %v1904_v32 = vmul.f32 %v10033_v29, %v10031_v30 }
 0x479   :  { %v10037_v4 = vpop.eup %10036  ;;  %9162 = vmatprep.subr.bf16.mxu0 %v9161_v17  ;;  %8492 = vmatmul.mubr.msk.f32.gmra.mrb[38].mxu1 %vm193_vm0, %v11848_v52 }
 0x47a   :  { %9164 = vmatpush3.bf16.msra.mxu0 %v9161_v17  ;;  %v1903_v9 = vmul.f32 %v10037_v4, %v10035_v10  ;;  %8494 = vmatprep.mubr.msk.f32.mxu1 %vm193_vm0, %v11855_v41  ;;  %v13773_v4 = vld [vmem:[#allocation7_spill] sm:$0xff] }
 0x47c   :  { %v9165_v7 = vpack.c.bf16 %v1904_v32, %v1903_v9 }
 0x47d   :  { %8495 = vmatmul.mubr.msk.f32.gmra.mrb[40].mxu1 %vm193_vm0, %v11862_v20 }
 0x47e   :  { %9166 = vmatprep.subr.bf16.mxu0 %v9165_v7  ;;  %8497 = vmatprep.mubr.msk.f32.mxu1 %vm193_vm0, %v11869_v36 }
 0x47f   :  { %9168 = vmatpush3.bf16.msra.mxu0 %v9165_v7 }
 0x481   :  { %8498 = vmatmul.mubr.msk.f32.gmra.mrb[42].mxu1 %vm193_vm0, %v11876_v28 }
 0x482   :  { %8457 = vmatmul.mubr.msk.f32.vlgmr.msra.gmra.mrb[32].mxu0 %vm387_vm2, %v11691_v35  ;;  %8500 = vmatprep.mubr.msk.f32.mxu1 %vm193_vm0, %v11883_v25 }
 0x483   :  { %8459 = vmatprep.mubr.msk.f32.mxu0 %vm387_vm2, %v11698_v38 }
 0x485   :  { %8501 = vmatmul.mubr.msk.f32.gmra.mrb[44].mxu1 %vm193_vm0, %v11890_v37 }
 0x486   :  { %8460 = vmatmul.mubr.msk.f32.gmra.mrb[34].mxu0 %vm387_vm2, %v11705_v39  ;;  %8503 = vmatprep.mubr.msk.f32.mxu1 %vm193_vm0, %v11897_v42 }
 0x487   :  { %8462 = vmatprep.mubr.msk.f32.mxu0 %vm387_vm2, %v11712_v43 }
 0x489   :  { %8504 = vmatmul.mubr.msk.f32.gmra.mrb[46].mxu1 %vm193_vm0, %v13769_v5 }
 0x48a   :  { %8463 = vmatmul.mubr.msk.f32.gmra.mrb[36].mxu0 %vm387_vm2, %v11719_v46  ;;  %8514 = vmatprep.mubr.msk.f32.mxu1 %vm387_vm2, %v13770_v63 }
 0x48b   :  { %8465 = vmatprep.mubr.msk.f32.mxu0 %vm387_vm2, %v11726_v50 }
 0x48e   :  { %8466 = vmatmul.mubr.msk.f32.gmra.mrb[38].mxu0 %vm387_vm2, %v11733_v51 }
 0x48f   :  { %8468 = vmatprep.mubr.msk.f32.mxu0 %vm387_vm2, %v11740_v54 }
 0x492   :  { %8469 = vmatmul.mubr.msk.f32.gmra.mrb[40].mxu0 %vm387_vm2, %v11747_v55 }
 0x493   :  { %8471 = vmatprep.mubr.msk.f32.mxu0 %vm387_vm2, %v11754_v56 }
 0x496   :  { %8472 = vmatmul.mubr.msk.f32.gmra.mrb[42].mxu0 %vm387_vm2, %v11761_v57 }
 0x497   :  { %8474 = vmatprep.mubr.msk.f32.mxu0 %vm387_vm2, %v11768_v58 }
 0x49a   :  { %8475 = vmatmul.mubr.msk.f32.gmra.mrb[44].mxu0 %vm387_vm2, %v11775_v59 }
 0x49b   :  { %8477 = vmatprep.mubr.msk.f32.mxu0 %vm387_vm2, %v11782_v60 }
 0x49e   :  { %8478 = vmatmul.mubr.msk.f32.gmra.mrb[46].mxu0 %vm387_vm2, %v11789_v61 }
 0x49f   :  { %8540 = vmatprep.mubr.msk.f32.mxu0 %vm193_vm0, %v11796_v45 }
 0x555   :  { %v8458_v40 = vpop.f32.mrb[32].mxu0 }
 0x556   :  { %v9327_v16 = vadd.f32 %v8458_v40, %v11424_v11  ;;  %v2118_v6 = vpop.f32.mrb[33].mxu0 }
 0x557   :  { %v9328_v21 = vadd.f32 %v2118_v6, %v13771_v1 }
 0x558   :  { %v7086_v12 = vmul.f32 -1.442695, %v9327_v16 }
 0x559   :  { %v7085_v27 = vmul.f32 -1.442695, %v9328_v21  ;;  %v8461_v26 = vpop.f32.mrb[34].mxu0 }
 0x55a   :  { %10038 = vpow2.f32 %v7086_v12  ;;  %v9329_v13 = vadd.f32 %v8461_v26, %v11426_v15  ;;  %v2128_v30 = vpop.f32.mrb[35].mxu0 }
 0x55b   :  { %10040 = vpow2.f32 %v7085_v27  ;;  %v9330_v29 = vadd.f32 %v2128_v30, %v13772_v23 }
 0x55c   :  { %v7088_v17 = vmul.f32 -1.442695, %v9329_v13 }
 0x55d   :  { %v7087_v10 = vmul.f32 -1.442695, %v9330_v29  ;;  %v8464_v32 = vpop.f32.mrb[36].mxu0 }
 0x55e   :  { %10042 = vpow2.f32 %v7088_v17  ;;  %v9331_v9 = vadd.f32 %v8464_v32, %v13773_v4  ;;  %v2138_v7 = vpop.f32.mrb[37].mxu0 }
 0x55f   :  { %10044 = vpow2.f32 %v7087_v10  ;;  %v9332_v3 = vadd.f32 %v2138_v7, %v11418_v8 }
 0x560   :  { %v7090_v40 = vmul.f32 -1.442695, %v9331_v9 }
 0x561   :  { %v7089_v16 = vmul.f32 -1.442695, %v9332_v3  ;;  %v8467_v6 = vpop.f32.mrb[38].mxu0 }
 0x562   :  { %10046 = vpow2.f32 %v7090_v40  ;;  %v9333_v21 = vadd.f32 %v8467_v6, %v13758_v47  ;;  %v2148_v12 = vpop.f32.mrb[39].mxu0 }
 0x563   :  { %10048 = vpow2.f32 %v7089_v16  ;;  %v9334_v27 = vadd.f32 %v2148_v12, %v13759_v53 }
 0x564   :  { %v10039_v26 = vpop.eup %10038  ;;  %v7092_v13 = vmul.f32 -1.442695, %v9333_v21 }
 0x565   :  { %v10041_v30 = vpop.eup %10040  ;;  %v2226_v29 = vadd.f32 1.0, %v10039_v26  ;;  %v7091_v17 = vmul.f32 -1.442695, %v9334_v27  ;;  %v8470_v32 = vpop.f32.mrb[40].mxu0 }
 0x566   :  { %v2225_v4 = vadd.f32 1.0, %v10041_v30  ;;  %10050 = vpow2.f32 %v7092_v13  ;;  %v9335_v10 = vadd.f32 %v8470_v32, %v13760_v0  ;;  %v2158_v9 = vpop.f32.mrb[41].mxu0 }
 0x567   :  { %10052 = vrcp.f32 %v2226_v29  ;;  %v9336_v16 = vadd.f32 %v2158_v9, %v13761_v62  ;;  %v13774_v29 = vld [vmem:[#allocation16_spill] sm:$0xff] }
 0x568   :  { %v10043_v7 = vpop.eup %10042  ;;  %10054 = vrcp.f32 %v2225_v4 }
 0x569   :  { %v10045_v3 = vpop.eup %10044  ;;  %v2228_v40 = vadd.f32 1.0, %v10043_v7  ;;  %10056 = vpow2.f32 %v7091_v17  ;;  %v8473_v6 = vpop.f32.mrb[42].mxu0  ;;  %v13775_v17 = vld [vmem:[#allocation13_spill] sm:$0xff] }
 0x56a   :  { %v2227_v12 = vadd.f32 1.0, %v10045_v3  ;;  %10058 = vtanh.f32 %v9335_v10  ;;  %v9337_v21 = vadd.f32 %v8473_v6, %v13762_v19  ;;  %v2168_v27 = vpop.f32.mrb[43].mxu0  ;;  %v13776_v3 = vld [vmem:[#allocation14_spill] sm:$0xff] }
 0x56b   :  { %10060 = vrcp.f32 %v2228_v40  ;;  %v9338_v32 = vadd.f32 %v2168_v27, %v13774_v29  ;;  %v13777_v27 = vld [vmem:[#allocation17_spill] sm:$0xff] }
 0x56c   :  { %v10047_v26 = vpop.eup %10046  ;;  %10062 = vrcp.f32 %v2227_v12 }
 0x56d   :  { %v10049_v13 = vpop.eup %10048  ;;  %v2250_v30 = vadd.f32 1.0, %v10047_v26  ;;  %10064 = vtanh.f32 %v9336_v16  ;;  %v8476_v4 = vpop.f32.mrb[44].mxu0 }
 0x56e   :  { %v2249_v0 = vadd.f32 1.0, %v10049_v13  ;;  %10066 = vtanh.f32 %v9337_v21  ;;  %v9339_v7 = vadd.f32 %v8476_v4, %v13775_v17  ;;  %v2178_v9 = vpop.f32.mrb[45].mxu0 }
 0x56f   :  { %10068 = vrcp.f32 %v2250_v30  ;;  %v9340_v10 = vadd.f32 %v2178_v9, %v13776_v3 }
 0x570   :  { %v10051_v62 = vpop.eup %10050  ;;  %10070 = vrcp.f32 %v2249_v0  ;;  %v7094_v6 = vmul.f32 -1.442695, %v9339_v7 }
 0x571   :  { %v10053_v40 = vpop.eup %10052  ;;  %v2252_v19 = vadd.f32 1.0, %v10051_v62  ;;  %10072 = vtanh.f32 %v9338_v32  ;;  %v7093_v12 = vmul.f32 -1.442695, %v9340_v10  ;;  %v8479_v26 = vpop.f32.mrb[46].mxu0 }
 0x572   :  { %v10055_v16 = vpop.eup %10054  ;;  %10074 = vpow2.f32 %v7094_v6  ;;  %v9341_v29 = vadd.f32 %v8479_v26, %v13777_v27  ;;  %v2188_v13 = vpop.f32.mrb[47].mxu0 }
 0x573   :  { %v10057_v21 = vpop.eup %10056  ;;  %10076 = vrcp.f32 %v2252_v19  ;;  %v9342_v4 = vadd.f32 %v2188_v13, %v13757_v49 }
 0x574   :  { %v10059_v30 = vpop.eup %10058  ;;  %v2251_v17 = vadd.f32 1.0, %v10057_v21  ;;  %10078 = vpow2.f32 %v7093_v12  ;;  %v7096_v9 = vmul.f32 -1.442695, %v9341_v29 }
 0x575   :  { %v10061_v0 = vpop.eup %10060  ;;  %v2294_v7 = vmul.f32 %v10059_v30, %v10053_v40  ;;  %v7095_v3 = vmul.f32 -1.442695, %v9342_v4 }
 0x576   :  { %v10063_v62 = vpop.eup %10062  ;;  %10080 = vrcp.f32 %v2251_v17 }
 0x577   :  { %v10065_v32 = vpop.eup %10064  ;;  %10082 = vpow2.f32 %v7096_v9 }
 0x578   :  { %v10067_v10 = vpop.eup %10066  ;;  %v2293_v6 = vmul.f32 %v10065_v32, %v10055_v16  ;;  %10084 = vpow2.f32 %v7095_v3 }
 0x579   :  { %v10069_v26 = vpop.eup %10068  ;;  %v2296_v27 = vmul.f32 %v10067_v10, %v10061_v0 }
 0x57a   :  { %v10071_v53 = vpop.eup %10070  ;;  %v2290_v19 = vmul.f32 %v10069_v26, %v11933_v14 }
 0x57b   :  { %v10073_v13 = vpop.eup %10072  ;;  %v2289_v21 = vmul.f32 %v10071_v53, %v11935_v31 }
 0x57c   :  { %v10075_v12 = vpop.eup %10074  ;;  %v12032_v29 = vadd.f32 %v2294_v7, %v2290_v19  ;;  %v2295_v40 = vmul.f32 %v10073_v13, %v10063_v62 }
 0x57d   :  { %v10077_v4 = vpop.eup %10076  ;;  %v12034_v30 = vadd.f32 %v2293_v6, %v2289_v21  ;;  %v2278_v17 = vadd.f32 1.0, %v10075_v12 }
 0x57e   :  { %v10079_v9 = vpop.eup %10078  ;;  %v2292_v16 = vmul.f32 %v10077_v4, %v11940_v2  ;;  %10086 = vtanh.f32 %v12032_v29 }
 0x57f   :  { %10088 = vtanh.f32 %v12034_v30  ;;  %v2277_v3 = vadd.f32 1.0, %v10079_v9 }
 0x580   :  { %v10081_v14 = vpop.eup %10080  ;;  %v12039_v0 = vadd.f32 %v2296_v27, %v2292_v16  ;;  %10090 = vrcp.f32 %v2278_v17 }
 0x581   :  { %v10083_v53 = vpop.eup %10082  ;;  %v2291_v31 = vmul.f32 %v10081_v14, %v11944_v34  ;;  %10092 = vrcp.f32 %v2277_v3  ;;  %v13780_v3 = vld [vmem:[#allocation11_spill] sm:$0xff] }
 0x582   :  { %v10085_v7 = vpop.eup %10084  ;;  %10094 = vtanh.f32 %v12039_v0  ;;  %v2280_v62 = vadd.f32 1.0, %v10083_v53 }
 0x583   :  { %v12043_v32 = vadd.f32 %v2295_v40, %v2291_v31  ;;  %v2279_v2 = vadd.f32 1.0, %v10085_v7 }
 0x584   :  { %10096 = vrcp.f32 %v2280_v62 }
 0x585   :  { %10098 = vtanh.f32 %v12043_v32 }
 0x586   :  { %10100 = vrcp.f32 %v2279_v2  ;;  %v13781_v2 = vld [vmem:[#allocation12_spill] sm:$0xff] }
 0x588   :  { %v10087_v10 = vpop.eup %10086 }
 0x589   :  { %v10089_v6 = vpop.eup %10088 }
 0x58a   :  { %v10091_v27 = vpop.eup %10090 }
 0x58b   :  { %v10093_v26 = vpop.eup %10092  ;;  %v2306_v19 = vmul.f32 %v10091_v27, %v10087_v10 }
 0x58c   :  { %v10095_v13 = vpop.eup %10094  ;;  %v2305_v21 = vmul.f32 %v10093_v26, %v10089_v6  ;;  %v13782_v26 = vld [vmem:[#allocation15_spill] sm:$0xff] }
 0x58e   :  { %v10097_v34 = vpop.eup %10096  ;;  %v9169_v12 = vpack.c.bf16 %v2306_v19, %v2305_v21 }
 0x58f   :  { %v10099_v4 = vpop.eup %10098  ;;  %v2308_v17 = vmul.f32 %v10097_v34, %v10095_v13 }
 0x590   :  { %v10101_v9 = vpop.eup %10100  ;;  %9170 = vmatprep.subr.bf16.mxu1 %v9169_v12 }
 0x591   :  { %9172 = vmatpush3.bf16.msra.mxu1 %v9169_v12  ;;  %v2307_v40 = vmul.f32 %v10101_v9, %v10099_v4  ;;  %v13783_v4 = vld [vmem:[#allocation16_spill] sm:$0xff] }
 0x593   :  { %v9173_v16 = vpack.c.bf16 %v2308_v17, %v2307_v40 }
 0x595   :  { %9174 = vmatprep.subr.bf16.mxu1 %v9173_v16 }
 0x596   :  { %9176 = vmatpush3.bf16.msra.mxu1 %v9173_v16  ;;  %v13784_v16 = vld [vmem:[#allocation13_spill] sm:$0xff] }
 0x599   :  { %8515 = vmatmul.mubr.msk.f32.vlgmr.msra.gmra.mrb[32].mxu1 %vm387_vm2, %v11691_v35  ;;  %v7142_v35 = vld [vmem:[%s13644_s0 + $0x30] sm:$0xff] }
 0x59a   :  { %8517 = vmatprep.mubr.msk.f32.mxu1 %vm387_vm2, %v11698_v38  ;;  %8538 = vmatprep.subr.mxu0 %v7142_v35 }
 0x59b   :  { %8539 = vmatpush3.msra.mxu0 %v7142_v35 }
 0x59c   :  { %8541 = vmatmul.mubr.msk.f32.vlgmr.msra.gmra.mrb[48].mxu0 %vm193_vm0, %v11806_v44 }
 0x59d   :  { %8518 = vmatmul.mubr.msk.f32.gmra.mrb[34].mxu1 %vm387_vm2, %v11705_v39  ;;  %8543 = vmatprep.mubr.msk.f32.mxu0 %vm193_vm0, %v11813_v22 }
 0x59e   :  { %8520 = vmatprep.mubr.msk.f32.mxu1 %vm387_vm2, %v11712_v43 }
 0x5a0   :  { %8544 = vmatmul.mubr.msk.f32.gmra.mrb[50].mxu0 %vm193_vm0, %v11820_v24 }
 0x5a1   :  { %8521 = vmatmul.mubr.msk.f32.gmra.mrb[36].mxu1 %vm387_vm2, %v11719_v46  ;;  %8546 = vmatprep.mubr.msk.f32.mxu0 %vm193_vm0, %v11827_v18 }
 0x5a2   :  { %8523 = vmatprep.mubr.msk.f32.mxu1 %vm387_vm2, %v11726_v50 }
 0x5a4   :  { %8547 = vmatmul.mubr.msk.f32.gmra.mrb[52].mxu0 %vm193_vm0, %v11834_v33 }
 0x5a5   :  { %8524 = vmatmul.mubr.msk.f32.gmra.mrb[38].mxu1 %vm387_vm2, %v11733_v51  ;;  %8549 = vmatprep.mubr.msk.f32.mxu0 %vm193_vm0, %v11841_v48 }
 0x5a6   :  { %8526 = vmatprep.mubr.msk.f32.mxu1 %vm387_vm2, %v11740_v54 }
 0x5a8   :  { %8550 = vmatmul.mubr.msk.f32.gmra.mrb[54].mxu0 %vm193_vm0, %v11848_v52 }
 0x5a9   :  { %8527 = vmatmul.mubr.msk.f32.gmra.mrb[40].mxu1 %vm387_vm2, %v11747_v55  ;;  %8552 = vmatprep.mubr.msk.f32.mxu0 %vm193_vm0, %v11855_v41  ;;  %v13779_v41 = vld [vmem:[#allocation10_spill] sm:$0xff] }
 0x5aa   :  { %8529 = vmatprep.mubr.msk.f32.mxu1 %vm387_vm2, %v11754_v56 }
 0x5ac   :  { %8553 = vmatmul.mubr.msk.f32.gmra.mrb[56].mxu0 %vm193_vm0, %v11862_v20 }
 0x5ad   :  { %8530 = vmatmul.mubr.msk.f32.gmra.mrb[42].mxu1 %vm387_vm2, %v11761_v57  ;;  %8555 = vmatprep.mubr.msk.f32.mxu0 %vm193_vm0, %v11869_v36 }
 0x5ae   :  { %8532 = vmatprep.mubr.msk.f32.mxu1 %vm387_vm2, %v11768_v58 }
 0x5b0   :  { %8556 = vmatmul.mubr.msk.f32.gmra.mrb[58].mxu0 %vm193_vm0, %v11876_v28 }
 0x5b1   :  { %8533 = vmatmul.mubr.msk.f32.gmra.mrb[44].mxu1 %vm387_vm2, %v11775_v59  ;;  %8558 = vmatprep.mubr.msk.f32.mxu0 %vm193_vm0, %v11883_v25 }
 0x5b2   :  { %8535 = vmatprep.mubr.msk.f32.mxu1 %vm387_vm2, %v11782_v60 }
 0x5b4   :  { %8559 = vmatmul.mubr.msk.f32.gmra.mrb[60].mxu0 %vm193_vm0, %v11890_v37 }
 0x5b5   :  { %8536 = vmatmul.mubr.msk.f32.gmra.mrb[46].mxu1 %vm387_vm2, %v11789_v61  ;;  %8561 = vmatprep.mubr.msk.f32.mxu0 %vm193_vm0, %v11897_v42  ;;  %v13778_v61 = vld [vmem:[#allocation7_spill] sm:$0xff] }
 0x5b6   :  { %8598 = vmatprep.mubr.msk.f32.mxu1 %vm193_vm0, %v11796_v45 }
 0x5b8   :  { %8562 = vmatmul.mubr.msk.f32.gmra.mrb[62].mxu0 %vm193_vm0, %v13769_v5 }
 0x5b9   :  { %8572 = vmatprep.mubr.msk.f32.mxu0 %vm387_vm2, %v13770_v63 }
 0x66c   :  { %v8516_v38 = vpop.f32.mrb[32].mxu1 }
 0x66d   :  { %v9343_v39 = vadd.f32 %v8516_v38, %v11424_v11  ;;  %v2522_v43 = vpop.f32.mrb[33].mxu1 }
 0x66e   :  { %v9344_v46 = vadd.f32 %v2522_v43, %v13771_v1 }
 0x66f   :  { %v7131_v50 = vmul.f32 -1.442695, %v9343_v39  ;;  %v13785_v39 = vld [vmem:[#allocation14_spill] sm:$0xff] }
 0x670   :  { %v7130_v51 = vmul.f32 -1.442695, %v9344_v46  ;;  %v8519_v54 = vpop.f32.mrb[34].mxu1 }
 0x671   :  { %10102 = vpow2.f32 %v7131_v50  ;;  %v9345_v55 = vadd.f32 %v8519_v54, %v11426_v15  ;;  %v2532_v56 = vpop.f32.mrb[35].mxu1 }
 0x672   :  { %10104 = vpow2.f32 %v7130_v51  ;;  %v9346_v57 = vadd.f32 %v2532_v56, %v13772_v23 }
 0x673   :  { %v7133_v58 = vmul.f32 -1.442695, %v9345_v55 }
 0x674   :  { %v7132_v59 = vmul.f32 -1.442695, %v9346_v57  ;;  %v8522_v60 = vpop.f32.mrb[36].mxu1 }
 0x675   :  { %10106 = vpow2.f32 %v7133_v58  ;;  %v9347_v45 = vadd.f32 %v8522_v60, %v13778_v61  ;;  %v2542_v44 = vpop.f32.mrb[37].mxu1  ;;  %v13786_v58 = vld [vmem:[#allocation17_spill] sm:$0xff] }
 0x676   :  { %10108 = vpow2.f32 %v7132_v59  ;;  %v9348_v22 = vadd.f32 %v2542_v44, %v11418_v8 }
 0x677   :  { %v7135_v24 = vmul.f32 -1.442695, %v9347_v45 }
 0x678   :  { %v7134_v18 = vmul.f32 -1.442695, %v9348_v22  ;;  %v8525_v33 = vpop.f32.mrb[38].mxu1 }
 0x679   :  { %10110 = vpow2.f32 %v7135_v24  ;;  %v9349_v48 = vadd.f32 %v8525_v33, %v13758_v47  ;;  %v2552_v52 = vpop.f32.mrb[39].mxu1 }
 0x67a   :  { %10112 = vpow2.f32 %v7134_v18  ;;  %v9350_v20 = vadd.f32 %v2552_v52, %v13779_v41 }
 0x67b   :  { %v10103_v36 = vpop.eup %10102  ;;  %v7137_v28 = vmul.f32 -1.442695, %v9349_v48 }
 0x67c   :  { %v10105_v25 = vpop.eup %10104  ;;  %v2630_v37 = vadd.f32 1.0, %v10103_v36  ;;  %v7136_v42 = vmul.f32 -1.442695, %v9350_v20  ;;  %v8528_v5 = vpop.f32.mrb[40].mxu1 }
 0x67d   :  { %v2629_v63 = vadd.f32 1.0, %v10105_v25  ;;  %10114 = vpow2.f32 %v7137_v28  ;;  %v9351_v14 = vadd.f32 %v8528_v5, %v13780_v3  ;;  %v2562_v53 = vpop.f32.mrb[41].mxu1 }
 0x67e   :  { %10116 = vrcp.f32 %v2630_v37  ;;  %v9352_v10 = vadd.f32 %v2562_v53, %v13781_v2 }
 0x67f   :  { %v10107_v31 = vpop.eup %10106  ;;  %10118 = vrcp.f32 %v2629_v63 }
 0x680   :  { %v10109_v7 = vpop.eup %10108  ;;  %v2632_v62 = vadd.f32 1.0, %v10107_v31  ;;  %10120 = vpow2.f32 %v7136_v42  ;;  %v8531_v6 = vpop.f32.mrb[42].mxu1 }
 0x681   :  { %v2631_v27 = vadd.f32 1.0, %v10109_v7  ;;  %10122 = vtanh.f32 %v9351_v14  ;;  %v9353_v19 = vadd.f32 %v8531_v6, %v13782_v26  ;;  %v2572_v13 = vpop.f32.mrb[43].mxu1 }
 0x682   :  { %10124 = vrcp.f32 %v2632_v62  ;;  %v9354_v17 = vadd.f32 %v2572_v13, %v13783_v4 }
 0x683   :  { %v10111_v21 = vpop.eup %10110  ;;  %10126 = vrcp.f32 %v2631_v27 }
 0x684   :  { %v10113_v34 = vpop.eup %10112  ;;  %v2654_v12 = vadd.f32 1.0, %v10111_v21  ;;  %10128 = vtanh.f32 %v9352_v10  ;;  %v8534_v9 = vpop.f32.mrb[44].mxu1 }
 0x685   :  { %v2653_v40 = vadd.f32 1.0, %v10113_v34  ;;  %10130 = vtanh.f32 %v9353_v19  ;;  %v9355_v35 = vadd.f32 %v8534_v9, %v13784_v16  ;;  %v2582_v38 = vpop.f32.mrb[45].mxu1 }
 0x686   :  { %10132 = vrcp.f32 %v2654_v12  ;;  %v9356_v43 = vadd.f32 %v2582_v38, %v13785_v39 }
 0x687   :  { %v10115_v46 = vpop.eup %10114  ;;  %10134 = vrcp.f32 %v2653_v40  ;;  %v7139_v50 = vmul.f32 -1.442695, %v9355_v35 }
 0x688   :  { %v10117_v51 = vpop.eup %10116  ;;  %v2656_v54 = vadd.f32 1.0, %v10115_v46  ;;  %10136 = vtanh.f32 %v9354_v17  ;;  %v7138_v55 = vmul.f32 -1.442695, %v9356_v43  ;;  %v8537_v56 = vpop.f32.mrb[46].mxu1 }
 0x689   :  { %v10119_v57 = vpop.eup %10118  ;;  %10138 = vpow2.f32 %v7139_v50  ;;  %v9357_v59 = vadd.f32 %v8537_v56, %v13786_v58  ;;  %v2592_v60 = vpop.f32.mrb[47].mxu1 }
 0x68a   :  { %v10121_v45 = vpop.eup %10120  ;;  %10140 = vrcp.f32 %v2656_v54  ;;  %v9358_v44 = vadd.f32 %v2592_v60, %v13757_v49 }
 0x68b   :  { %v10123_v22 = vpop.eup %10122  ;;  %v2655_v24 = vadd.f32 1.0, %v10121_v45  ;;  %10142 = vpow2.f32 %v7138_v55  ;;  %v7141_v18 = vmul.f32 -1.442695, %v9357_v59 }
 0x68c   :  { %v10125_v33 = vpop.eup %10124  ;;  %v2698_v48 = vmul.f32 %v10123_v22, %v10117_v51  ;;  %v7140_v52 = vmul.f32 -1.442695, %v9358_v44  ;;  %v12148_v44 = vld [vmem:[%s13649_s5 + $0x8] sm:$0xff]  ;;  %v12155_v22 = vld [vmem:[%s13649_s5 + $0x10] sm:$0xff] }
 0x68d   :  { %v10127_v20 = vpop.eup %10126  ;;  %10144 = vrcp.f32 %v2655_v24  ;;  %v12162_v24 = vld [vmem:[%s13649_s5 + $0x18] sm:$0xff] }
 0x68e   :  { %v10129_v36 = vpop.eup %10128  ;;  %10146 = vpow2.f32 %v7141_v18  ;;  %v12169_v18 = vld [vmem:[%s13649_s5 + $0x20] sm:$0xff] }
 0x68f   :  { %v10131_v28 = vpop.eup %10130  ;;  %v2697_v25 = vmul.f32 %v10129_v36, %v10119_v57  ;;  %10148 = vpow2.f32 %v7140_v52  ;;  %v12190_v52 = vld [vmem:[%s13649_s5 + $0x38] sm:$0xff]  ;;  %v12204_v36 = vld [vmem:[%s13649_s5 + $0x48] sm:$0xff] }
 0x690   :  { %v10133_v37 = vpop.eup %10132  ;;  %v2700_v42 = vmul.f32 %v10131_v28, %v10125_v33  ;;  %v12176_v33 = vld [vmem:[%s13649_s5 + $0x28] sm:$0xff]  ;;  %v12211_v28 = vld [vmem:[%s13649_s5 + $0x50] sm:$0xff] }
 0x691   :  { %v10135_v5 = vpop.eup %10134  ;;  %v2694_v63 = vmul.f32 %v10133_v37, %v12032_v29  ;;  %v12225_v37 = vld [vmem:[%s13649_s5 + $0x60] sm:$0xff] }
 0x692   :  { %v10137_v14 = vpop.eup %10136  ;;  %v2693_v53 = vmul.f32 %v10135_v5, %v12034_v30  ;;  %v12239_v5 = vld [vmem:[%s13649_s5 + $0x70] sm:$0xff] }
 0x693   :  { %v10139_v31 = vpop.eup %10138  ;;  %v12131_v7 = vadd.f32 %v2698_v48, %v2694_v63  ;;  %v2699_v62 = vmul.f32 %v10137_v14, %v10127_v20  ;;  %v12183_v48 = vld [vmem:[%s13649_s5 + $0x30] sm:$0xff]  ;;  %v12197_v20 = vld [vmem:[%s13649_s5 + $0x40] sm:$0xff]  ;;  %v12246_v63 = vld [vmem:[%s13649_s5 + $0x78] sm:$0xff] }
 0x694   :  { %v10141_v10 = vpop.eup %10140  ;;  %v12133_v6 = vadd.f32 %v2697_v25, %v2693_v53  ;;  %v2682_v27 = vadd.f32 1.0, %v10139_v31  ;;  %v12218_v25 = vld [vmem:[%s13649_s5 + $0x58] sm:$0xff]  ;;  %v12253_v14 = vld [vmem:[%s13647_s3] sm:$0xff]  ;;  %v12263_v31 = vld [vmem:[%s13647_s3 + $0x8] sm:$0xff] }
 0x695   :  { %v10143_v19 = vpop.eup %10142  ;;  %v2696_v13 = vmul.f32 %v10141_v10, %v12039_v0  ;;  %10150 = vtanh.f32 %v12131_v7  ;;  %v7187_v53 = vld [vmem:[%s13644_s0 + $0x38] sm:$0xff] }
 0x696   :  { %10152 = vtanh.f32 %v12133_v6  ;;  %v2681_v21 = vadd.f32 1.0, %v10143_v19  ;;  %8596 = vmatprep.subr.mxu1 %v7187_v53  ;;  %v12277_v10 = vld [vmem:[%s13647_s3 + $0x18] sm:$0xff]  ;;  %v12291_v19 = vld [vmem:[%s13647_s3 + $0x28] sm:$0xff] }
 0x697   :  { %v10145_v29 = vpop.eup %10144  ;;  %v12138_v34 = vadd.f32 %v2700_v42, %v2696_v13  ;;  %10154 = vrcp.f32 %v2682_v27  ;;  %v12232_v42 = vld [vmem:[%s13649_s5 + $0x68] sm:$0xff]  ;;  %8597 = vmatpush3.msra.mxu1 %v7187_v53  ;;  %v12284_v27 = vld [vmem:[%s13647_s3 + $0x20] sm:$0xff]  ;;  %v12298_v13 = vld [vmem:[%s13647_s3 + $0x30] sm:$0xff] }
 0x698   :  { %v10147_v30 = vpop.eup %10146  ;;  %v2695_v12 = vmul.f32 %v10145_v29, %v12043_v32  ;;  %10156 = vrcp.f32 %v2681_v21  ;;  %8599 = vmatmul.mubr.msk.f32.vlgmr.msra.gmra.mrb[48].mxu1 %vm193_vm0, %v12263_v31  ;;  %v12305_v21 = vld [vmem:[%s13647_s3 + $0x38] sm:$0xff]  ;;  %v12312_v29 = vld [vmem:[%s13647_s3 + $0x40] sm:$0xff] }
 0x699   :  { %v10149_v17 = vpop.eup %10148  ;;  %10158 = vtanh.f32 %v12138_v34  ;;  %v2684_v9 = vadd.f32 1.0, %v10147_v30  ;;  %v12319_v30 = vld [vmem:[%s13647_s3 + $0x48] sm:$0xff] }
 0x69a   :  { %v12142_v40 = vadd.f32 %v2699_v62, %v2695_v12  ;;  %v2683_v0 = vadd.f32 1.0, %v10149_v17  ;;  %v12270_v62 = vld [vmem:[%s13647_s3 + $0x10] sm:$0xff]  ;;  %v12333_v17 = vld [vmem:[%s13647_s3 + $0x58] sm:$0xff] }
 0x69b   :  { %10160 = vrcp.f32 %v2684_v9  ;;  %8601 = vmatprep.mubr.msk.f32.mxu1 %vm193_vm0, %v12270_v62  ;;  %v12326_v12 = vld [vmem:[%s13647_s3 + $0x50] sm:$0xff]  ;;  %v12340_v9 = vld [vmem:[%s13647_s3 + $0x60] sm:$0xff] }
 0x69c   :  { %10162 = vtanh.f32 %v12142_v40  ;;  %8602 = vmatmul.mubr.msk.f32.gmra.mrb[50].mxu1 %vm193_vm0, %v12277_v10 }
 0x69d   :  { %10164 = vrcp.f32 %v2683_v0  ;;  %8604 = vmatprep.mubr.msk.f32.mxu1 %vm193_vm0, %v12284_v27  ;;  %v12347_v0 = vld [vmem:[%s13647_s3 + $0x68] sm:$0xff] }
 0x69f   :  { %v10151_v35 = vpop.eup %10150 }
 0x6a0   :  { %v10153_v38 = vpop.eup %10152  ;;  %8605 = vmatmul.mubr.msk.f32.gmra.mrb[52].mxu1 %vm193_vm0, %v12291_v19 }
 0x6a1   :  { %v10155_v43 = vpop.eup %10154  ;;  %8607 = vmatprep.mubr.msk.f32.mxu1 %vm193_vm0, %v12298_v13 }
 0x6a2   :  { %v10157_v46 = vpop.eup %10156  ;;  %v2710_v50 = vmul.f32 %v10155_v43, %v10151_v35  ;;  %v12354_v35 = vld [vmem:[%s13647_s3 + $0x70] sm:$0xff]  ;;  %v12368_v43 = vld [vmem:[%s13649_s5] sm:$0xff] }
 0x6a3   :  { %v10159_v51 = vpop.eup %10158  ;;  %v2709_v54 = vmul.f32 %v10157_v46, %v10153_v38  ;;  %v12361_v38 = vld [vmem:[%s13647_s3 + $0x78] sm:$0xff]  ;;  %13788 = vst [vmem:[#allocation9_spill] sm:$0xff] %v12368_v43 }
 0x6a4   :  { %8608 = vmatmul.mubr.msk.f32.gmra.mrb[54].mxu1 %vm193_vm0, %v12305_v21  ;;  %13787 = vst [vmem:[#allocation18_spill] sm:$0xff] %v12361_v38 }
 0x6a5   :  { %v10161_v32 = vpop.eup %10160  ;;  %v9177_v55 = vpack.c.bf16 %v2710_v50, %v2709_v54  ;;  %8610 = vmatprep.mubr.msk.f32.mxu1 %vm193_vm0, %v12312_v29 }
 0x6a6   :  { %v10163_v56 = vpop.eup %10162  ;;  %v2712_v57 = vmul.f32 %v10161_v32, %v10159_v51 }
 0x6a7   :  { %v10165_v59 = vpop.eup %10164  ;;  %9178 = vmatprep.subr.bf16.mxu0 %v9177_v55 }
 0x6a8   :  { %9180 = vmatpush3.bf16.msra.mxu0 %v9177_v55  ;;  %v2711_v60 = vmul.f32 %v10165_v59, %v10163_v56  ;;  %8611 = vmatmul.mubr.msk.f32.gmra.mrb[56].mxu1 %vm193_vm0, %v12319_v30 }
 0x6a9   :  { %8613 = vmatprep.mubr.msk.f32.mxu1 %vm193_vm0, %v12326_v12 }
 0x6aa   :  { %v9181_v45 = vpack.c.bf16 %v2712_v57, %v2711_v60 }
 0x6ac   :  { %9182 = vmatprep.subr.bf16.mxu0 %v9181_v45  ;;  %8614 = vmatmul.mubr.msk.f32.gmra.mrb[58].mxu1 %vm193_vm0, %v12333_v17 }
 0x6ad   :  { %9184 = vmatpush3.bf16.msra.mxu0 %v9181_v45  ;;  %8616 = vmatprep.mubr.msk.f32.mxu1 %vm193_vm0, %v12340_v9 }
 0x6b0   :  { %8573 = vmatmul.mubr.msk.f32.vlgmr.msra.gmra.mrb[48].mxu0 %vm387_vm2, %v12148_v44  ;;  %8617 = vmatmul.mubr.msk.f32.gmra.mrb[60].mxu1 %vm193_vm0, %v12347_v0 }
 0x6b1   :  { %8575 = vmatprep.mubr.msk.f32.mxu0 %vm387_vm2, %v12155_v22  ;;  %8619 = vmatprep.mubr.msk.f32.mxu1 %vm193_vm0, %v12354_v35 }
 0x6b4   :  { %8576 = vmatmul.mubr.msk.f32.gmra.mrb[50].mxu0 %vm387_vm2, %v12162_v24  ;;  %8620 = vmatmul.mubr.msk.f32.gmra.mrb[62].mxu1 %vm193_vm0, %v12361_v38 }
 0x6b5   :  { %8578 = vmatprep.mubr.msk.f32.mxu0 %vm387_vm2, %v12169_v18  ;;  %8630 = vmatprep.mubr.msk.f32.mxu1 %vm387_vm2, %v12368_v43 }
 0x6b8   :  { %8579 = vmatmul.mubr.msk.f32.gmra.mrb[52].mxu0 %vm387_vm2, %v12176_v33 }
 0x6b9   :  { %8581 = vmatprep.mubr.msk.f32.mxu0 %vm387_vm2, %v12183_v48 }
 0x6bc   :  { %8582 = vmatmul.mubr.msk.f32.gmra.mrb[54].mxu0 %vm387_vm2, %v12190_v52 }
 0x6bd   :  { %8584 = vmatprep.mubr.msk.f32.mxu0 %vm387_vm2, %v12197_v20 }
 0x6c0   :  { %8585 = vmatmul.mubr.msk.f32.gmra.mrb[56].mxu0 %vm387_vm2, %v12204_v36 }
 0x6c1   :  { %8587 = vmatprep.mubr.msk.f32.mxu0 %vm387_vm2, %v12211_v28 }
 0x6c4   :  { %8588 = vmatmul.mubr.msk.f32.gmra.mrb[58].mxu0 %vm387_vm2, %v12218_v25 }
 0x6c5   :  { %8590 = vmatprep.mubr.msk.f32.mxu0 %vm387_vm2, %v12225_v37 }
 0x6c8   :  { %8591 = vmatmul.mubr.msk.f32.gmra.mrb[60].mxu0 %vm387_vm2, %v12232_v42 }
 0x6c9   :  { %8593 = vmatprep.mubr.msk.f32.mxu0 %vm387_vm2, %v12239_v5 }
 0x6cc   :  { %8594 = vmatmul.mubr.msk.f32.gmra.mrb[62].mxu0 %vm387_vm2, %v12246_v63 }
 0x6cd   :  { %8656 = vmatprep.mubr.msk.f32.mxu0 %vm193_vm0, %v12253_v14 }
 0x783   :  { %v8574_v46 = vpop.f32.mrb[48].mxu0 }
 0x784   :  { %v9359_v50 = vadd.f32 %v8574_v46, %v11424_v11  ;;  %v2926_v51 = vpop.f32.mrb[49].mxu0 }
 0x785   :  { %v9360_v54 = vadd.f32 %v2926_v51, %v13771_v1 }
 0x786   :  { %v7176_v32 = vmul.f32 -1.442695, %v9359_v50 }
 0x787   :  { %v7175_v55 = vmul.f32 -1.442695, %v9360_v54  ;;  %v8577_v56 = vpop.f32.mrb[50].mxu0 }
 0x788   :  { %10166 = vpow2.f32 %v7176_v32  ;;  %v9361_v57 = vadd.f32 %v8577_v56, %v11426_v15  ;;  %v2936_v59 = vpop.f32.mrb[51].mxu0 }
 0x789   :  { %10168 = vpow2.f32 %v7175_v55  ;;  %v9362_v60 = vadd.f32 %v2936_v59, %v13772_v23 }
 0x78a   :  { %v7178_v45 = vmul.f32 -1.442695, %v9361_v57 }
 0x78b   :  { %v7177_v53 = vmul.f32 -1.442695, %v9362_v60  ;;  %v8580_v38 = vpop.f32.mrb[52].mxu0 }
 0x78c   :  { %10170 = vpow2.f32 %v7178_v45  ;;  %v9363_v43 = vadd.f32 %v8580_v38, %v13778_v61  ;;  %v2946_v46 = vpop.f32.mrb[53].mxu0 }
 0x78d   :  { %10172 = vpow2.f32 %v7177_v53  ;;  %v9364_v51 = vadd.f32 %v2946_v46, %v11418_v8 }
 0x78e   :  { %v7180_v50 = vmul.f32 -1.442695, %v9363_v43 }
 0x78f   :  { %v7179_v54 = vmul.f32 -1.442695, %v9364_v51  ;;  %v8583_v1 = vpop.f32.mrb[54].mxu0 }
 0x790   :  { %10174 = vpow2.f32 %v7180_v50  ;;  %v9365_v32 = vadd.f32 %v8583_v1, %v13758_v47  ;;  %v2956_v56 = vpop.f32.mrb[55].mxu0 }
 0x791   :  { %10176 = vpow2.f32 %v7179_v54  ;;  %v9366_v55 = vadd.f32 %v2956_v56, %v13779_v41 }
 0x792   :  { %v10167_v57 = vpop.eup %10166  ;;  %v7182_v59 = vmul.f32 -1.442695, %v9365_v32 }
 0x793   :  { %v10169_v60 = vpop.eup %10168  ;;  %v3034_v45 = vadd.f32 1.0, %v10167_v57  ;;  %v7181_v23 = vmul.f32 -1.442695, %v9366_v55  ;;  %v8586_v38 = vpop.f32.mrb[56].mxu0 }
 0x794   :  { %v3033_v61 = vadd.f32 1.0, %v10169_v60  ;;  %10178 = vpow2.f32 %v7182_v59  ;;  %v9367_v53 = vadd.f32 %v8586_v38, %v13780_v3  ;;  %v2966_v43 = vpop.f32.mrb[57].mxu0 }
 0x795   :  { %10180 = vrcp.f32 %v3034_v45  ;;  %v9368_v50 = vadd.f32 %v2966_v43, %v13781_v2 }
 0x796   :  { %v10171_v46 = vpop.eup %10170  ;;  %10182 = vrcp.f32 %v3033_v61 }
 0x797   :  { %v10173_v51 = vpop.eup %10172  ;;  %v3036_v1 = vadd.f32 1.0, %v10171_v46  ;;  %10184 = vpow2.f32 %v7181_v23  ;;  %v8589_v54 = vpop.f32.mrb[58].mxu0 }
 0x798   :  { %v3035_v56 = vadd.f32 1.0, %v10173_v51  ;;  %10186 = vtanh.f32 %v9367_v53  ;;  %v9369_v32 = vadd.f32 %v8589_v54, %v13782_v26  ;;  %v2976_v55 = vpop.f32.mrb[59].mxu0 }
 0x799   :  { %10188 = vrcp.f32 %v3036_v1  ;;  %v9370_v45 = vadd.f32 %v2976_v55, %v13783_v4 }
 0x79a   :  { %v10175_v57 = vpop.eup %10174  ;;  %10190 = vrcp.f32 %v3035_v56 }
 0x79b   :  { %v10177_v59 = vpop.eup %10176  ;;  %v3058_v60 = vadd.f32 1.0, %v10175_v57  ;;  %10192 = vtanh.f32 %v9368_v50  ;;  %v8592_v61 = vpop.f32.mrb[60].mxu0 }
 0x79c   :  { %v3057_v38 = vadd.f32 1.0, %v10177_v59  ;;  %10194 = vtanh.f32 %v9369_v32  ;;  %v9371_v23 = vadd.f32 %v8592_v61, %v13784_v16  ;;  %v2986_v43 = vpop.f32.mrb[61].mxu0 }
 0x79d   :  { %10196 = vrcp.f32 %v3058_v60  ;;  %v9372_v53 = vadd.f32 %v2986_v43, %v13785_v39 }
 0x79e   :  { %v10179_v46 = vpop.eup %10178  ;;  %10198 = vrcp.f32 %v3057_v38  ;;  %v7184_v51 = vmul.f32 -1.442695, %v9371_v23 }
 0x79f   :  { %v10181_v1 = vpop.eup %10180  ;;  %v3060_v54 = vadd.f32 1.0, %v10179_v46  ;;  %10200 = vtanh.f32 %v9370_v45  ;;  %v7183_v56 = vmul.f32 -1.442695, %v9372_v53  ;;  %v8595_v57 = vpop.f32.mrb[62].mxu0 }
 0x7a0   :  { %v10183_v50 = vpop.eup %10182  ;;  %10202 = vpow2.f32 %v7184_v51  ;;  %v9373_v55 = vadd.f32 %v8595_v57, %v13786_v58  ;;  %v2996_v59 = vpop.f32.mrb[63].mxu0 }
 0x7a1   :  { %v10185_v32 = vpop.eup %10184  ;;  %10204 = vrcp.f32 %v3060_v54  ;;  %v9374_v61 = vadd.f32 %v2996_v59, %v13757_v49 }
 0x7a2   :  { %v10187_v60 = vpop.eup %10186  ;;  %v3059_v16 = vadd.f32 1.0, %v10185_v32  ;;  %10206 = vpow2.f32 %v7183_v56  ;;  %v7186_v43 = vmul.f32 -1.442695, %v9373_v55 }
 0x7a3   :  { %v10189_v38 = vpop.eup %10188  ;;  %v3102_v23 = vmul.f32 %v10187_v60, %v10181_v1  ;;  %v7185_v39 = vmul.f32 -1.442695, %v9374_v61 }
 0x7a4   :  { %v10191_v46 = vpop.eup %10190  ;;  %10208 = vrcp.f32 %v3059_v16 }
 0x7a5   :  { %v10193_v45 = vpop.eup %10192  ;;  %10210 = vpow2.f32 %v7186_v43 }
 0x7a6   :  { %v10195_v53 = vpop.eup %10194  ;;  %v3101_v51 = vmul.f32 %v10193_v45, %v10183_v50  ;;  %10212 = vpow2.f32 %v7185_v39 }
 0x7a7   :  { %v10197_v57 = vpop.eup %10196  ;;  %v3104_v58 = vmul.f32 %v10195_v53, %v10189_v38 }
 0x7a8   :  { %v10199_v4 = vpop.eup %10198  ;;  %v3098_v54 = vmul.f32 %v10197_v57, %v12131_v7 }
 0x7a9   :  { %v10201_v59 = vpop.eup %10200  ;;  %v3097_v32 = vmul.f32 %v10199_v4, %v12133_v6 }
 0x7aa   :  { %v10203_v56 = vpop.eup %10202  ;;  %v12390_v55 = vadd.f32 %v3102_v23, %v3098_v54  ;;  %v3103_v1 = vmul.f32 %v10201_v59, %v10191_v46 }
 0x7ab   :  { %v10205_v61 = vpop.eup %10204  ;;  %v12392_v60 = vadd.f32 %v3101_v51, %v3097_v32  ;;  %v3086_v16 = vadd.f32 1.0, %v10203_v56 }
 0x7ac   :  { %v10207_v43 = vpop.eup %10206  ;;  %v3100_v50 = vmul.f32 %v10205_v61, %v12138_v34  ;;  %10214 = vtanh.f32 %v12390_v55 }
 0x7ad   :  { %10216 = vtanh.f32 %v12392_v60  ;;  %v3085_v39 = vadd.f32 1.0, %v10207_v43 }
 0x7ae   :  { %v10209_v7 = vpop.eup %10208  ;;  %v12397_v38 = vadd.f32 %v3104_v58, %v3100_v50  ;;  %10218 = vrcp.f32 %v3086_v16 }
 0x7af   :  { %v10211_v4 = vpop.eup %10210  ;;  %v3099_v6 = vmul.f32 %v10209_v7, %v12142_v40  ;;  %10220 = vrcp.f32 %v3085_v39  ;;  %v7232_v39 = vld [vmem:[%s13644_s0 + $0x40] sm:$0xff] }
 0x7b0   :  { %v10213_v23 = vpop.eup %10212  ;;  %10222 = vtanh.f32 %v12397_v38  ;;  %v3088_v46 = vadd.f32 1.0, %v10211_v4  ;;  %8654 = vmatprep.subr.mxu0 %v7232_v39  ;;  %v13789_v7 = vld [vmem:[#allocation18_spill] sm:$0xff]  ;;  %v13790_v4 = vld [vmem:[#allocation9_spill] sm:$0xff] }
 0x7b1   :  { %v12401_v45 = vadd.f32 %v3103_v1, %v3099_v6  ;;  %v3087_v34 = vadd.f32 1.0, %v10213_v23  ;;  %8655 = vmatpush3.msra.mxu0 %v7232_v39 }
 0x7b2   :  { %10224 = vrcp.f32 %v3088_v46  ;;  %8657 = vmatmul.mubr.msk.f32.vlgmr.msra.gmra.mrb[64].mxu0 %vm193_vm0, %v12263_v31 }
 0x7b3   :  { %10226 = vtanh.f32 %v12401_v45  ;;  %8659 = vmatprep.mubr.msk.f32.mxu0 %vm193_vm0, %v12270_v62 }
 0x7b4   :  { %10228 = vrcp.f32 %v3087_v34  ;;  %v13791_v34 = vld [vmem:[#allocation6_spill] sm:$0xff] }
 0x7b6   :  { %v10215_v53 = vpop.eup %10214  ;;  %8660 = vmatmul.mubr.msk.f32.gmra.mrb[66].mxu0 %vm193_vm0, %v12277_v10 }
 0x7b7   :  { %v10217_v51 = vpop.eup %10216  ;;  %8662 = vmatprep.mubr.msk.f32.mxu0 %vm193_vm0, %v12284_v27 }
 0x7b8   :  { %v10219_v58 = vpop.eup %10218 }
 0x7b9   :  { %v10221_v57 = vpop.eup %10220  ;;  %v3114_v54 = vmul.f32 %v10219_v58, %v10215_v53 }
 0x7ba   :  { %v10223_v59 = vpop.eup %10222  ;;  %v3113_v32 = vmul.f32 %v10221_v57, %v10217_v51  ;;  %8663 = vmatmul.mubr.msk.f32.gmra.mrb[68].mxu0 %vm193_vm0, %v12291_v19 }
 0x7bb   :  { %8665 = vmatprep.mubr.msk.f32.mxu0 %vm193_vm0, %v12298_v13 }
 0x7bc   :  { %v10225_v40 = vpop.eup %10224  ;;  %v9185_v56 = vpack.c.bf16 %v3114_v54, %v3113_v32  ;;  %v13792_v32 = vld [vmem:[#allocation8_spill] sm:$0xff] }
 0x7bd   :  { %v10227_v61 = vpop.eup %10226  ;;  %v3116_v16 = vmul.f32 %v10225_v40, %v10223_v59 }
 0x7be   :  { %v10229_v43 = vpop.eup %10228  ;;  %9186 = vmatprep.subr.bf16.mxu1 %v9185_v56  ;;  %8666 = vmatmul.mubr.msk.f32.gmra.mrb[70].mxu0 %vm193_vm0, %v12305_v21 }
 0x7bf   :  { %9188 = vmatpush3.bf16.msra.mxu1 %v9185_v56  ;;  %v3115_v1 = vmul.f32 %v10229_v43, %v10227_v61  ;;  %8668 = vmatprep.mubr.msk.f32.mxu0 %vm193_vm0, %v12312_v29  ;;  %v13793_v43 = vld [vmem:[#allocation7_spill] sm:$0xff] }
 0x7c1   :  { %v9189_v50 = vpack.c.bf16 %v3116_v16, %v3115_v1 }
 0x7c2   :  { %8669 = vmatmul.mubr.msk.f32.gmra.mrb[72].mxu0 %vm193_vm0, %v12319_v30 }
 0x7c3   :  { %9190 = vmatprep.subr.bf16.mxu1 %v9189_v50  ;;  %8671 = vmatprep.mubr.msk.f32.mxu0 %vm193_vm0, %v12326_v12 }
 0x7c4   :  { %9192 = vmatpush3.bf16.msra.mxu1 %v9189_v50 }
 0x7c6   :  { %8672 = vmatmul.mubr.msk.f32.gmra.mrb[74].mxu0 %vm193_vm0, %v12333_v17 }
 0x7c7   :  { %8631 = vmatmul.mubr.msk.f32.vlgmr.msra.gmra.mrb[48].mxu1 %vm387_vm2, %v12148_v44  ;;  %8674 = vmatprep.mubr.msk.f32.mxu0 %vm193_vm0, %v12340_v9 }
 0x7c8   :  { %8633 = vmatprep.mubr.msk.f32.mxu1 %vm387_vm2, %v12155_v22 }
 0x7ca   :  { %8675 = vmatmul.mubr.msk.f32.gmra.mrb[76].mxu0 %vm193_vm0, %v12347_v0 }
 0x7cb   :  { %8634 = vmatmul.mubr.msk.f32.gmra.mrb[50].mxu1 %vm387_vm2, %v12162_v24  ;;  %8677 = vmatprep.mubr.msk.f32.mxu0 %vm193_vm0, %v12354_v35 }
 0x7cc   :  { %8636 = vmatprep.mubr.msk.f32.mxu1 %vm387_vm2, %v12169_v18 }
 0x7ce   :  { %8678 = vmatmul.mubr.msk.f32.gmra.mrb[78].mxu0 %vm193_vm0, %v13789_v7 }
 0x7cf   :  { %8637 = vmatmul.mubr.msk.f32.gmra.mrb[52].mxu1 %vm387_vm2, %v12176_v33  ;;  %8688 = vmatprep.mubr.msk.f32.mxu0 %vm387_vm2, %v13790_v4 }
 0x7d0   :  { %8639 = vmatprep.mubr.msk.f32.mxu1 %vm387_vm2, %v12183_v48 }
 0x7d3   :  { %8640 = vmatmul.mubr.msk.f32.gmra.mrb[54].mxu1 %vm387_vm2, %v12190_v52 }
 0x7d4   :  { %8642 = vmatprep.mubr.msk.f32.mxu1 %vm387_vm2, %v12197_v20 }
 0x7d7   :  { %8643 = vmatmul.mubr.msk.f32.gmra.mrb[56].mxu1 %vm387_vm2, %v12204_v36 }
 0x7d8   :  { %8645 = vmatprep.mubr.msk.f32.mxu1 %vm387_vm2, %v12211_v28 }
 0x7db   :  { %8646 = vmatmul.mubr.msk.f32.gmra.mrb[58].mxu1 %vm387_vm2, %v12218_v25 }
 0x7dc   :  { %8648 = vmatprep.mubr.msk.f32.mxu1 %vm387_vm2, %v12225_v37 }
 0x7df   :  { %8649 = vmatmul.mubr.msk.f32.gmra.mrb[60].mxu1 %vm387_vm2, %v12232_v42 }
 0x7e0   :  { %8651 = vmatprep.mubr.msk.f32.mxu1 %vm387_vm2, %v12239_v5 }
 0x7e3   :  { %8652 = vmatmul.mubr.msk.f32.gmra.mrb[62].mxu1 %vm387_vm2, %v12246_v63 }
 0x7e4   :  { %8714 = vmatprep.mubr.msk.f32.mxu1 %vm193_vm0, %v12253_v14 }
 0x89a   :  { %v8632_v6 = vpop.f32.mrb[48].mxu1 }
 0x89b   :  { %v9375_v23 = vadd.f32 %v8632_v6, %v11424_v11  ;;  %v3330_v46 = vpop.f32.mrb[49].mxu1 }
 0x89c   :  { %v9376_v53 = vadd.f32 %v3330_v46, %v13791_v34 }
 0x89d   :  { %v7221_v51 = vmul.f32 -1.442695, %v9375_v23 }
 0x89e   :  { %v7220_v58 = vmul.f32 -1.442695, %v9376_v53  ;;  %v8635_v57 = vpop.f32.mrb[50].mxu1 }
 0x89f   :  { %10230 = vpow2.f32 %v7221_v51  ;;  %v9377_v54 = vadd.f32 %v8635_v57, %v11426_v15  ;;  %v3340_v59 = vpop.f32.mrb[51].mxu1 }
 0x8a0   :  { %10232 = vpow2.f32 %v7220_v58  ;;  %v9378_v40 = vadd.f32 %v3340_v59, %v13792_v32 }
 0x8a1   :  { %v7223_v56 = vmul.f32 -1.442695, %v9377_v54 }
 0x8a2   :  { %v7222_v61 = vmul.f32 -1.442695, %v9378_v40  ;;  %v8638_v16 = vpop.f32.mrb[52].mxu1 }
 0x8a3   :  { %10234 = vpow2.f32 %v7223_v56  ;;  %v9379_v1 = vadd.f32 %v8638_v16, %v13793_v43  ;;  %v3350_v50 = vpop.f32.mrb[53].mxu1 }
 0x8a4   :  { %10236 = vpow2.f32 %v7222_v61  ;;  %v9380_v39 = vadd.f32 %v3350_v50, %v11418_v8 }
 0x8a5   :  { %v7225_v6 = vmul.f32 -1.442695, %v9379_v1 }
 0x8a6   :  { %v7224_v23 = vmul.f32 -1.442695, %v9380_v39  ;;  %v8641_v46 = vpop.f32.mrb[54].mxu1 }
 0x8a7   :  { %10238 = vpow2.f32 %v7225_v6  ;;  %v9381_v53 = vadd.f32 %v8641_v46, %v13758_v47  ;;  %v3360_v51 = vpop.f32.mrb[55].mxu1 }
 0x8a8   :  { %10240 = vpow2.f32 %v7224_v23  ;;  %v9382_v58 = vadd.f32 %v3360_v51, %v13779_v41 }
 0x8a9   :  { %v10231_v57 = vpop.eup %10230  ;;  %v7227_v54 = vmul.f32 -1.442695, %v9381_v53 }
 0x8aa   :  { %v10233_v59 = vpop.eup %10232  ;;  %v3438_v40 = vadd.f32 1.0, %v10231_v57  ;;  %v7226_v56 = vmul.f32 -1.442695, %v9382_v58  ;;  %v8644_v16 = vpop.f32.mrb[56].mxu1 }
 0x8ab   :  { %v3437_v43 = vadd.f32 1.0, %v10233_v59  ;;  %10242 = vpow2.f32 %v7227_v54  ;;  %v9383_v61 = vadd.f32 %v8644_v16, %v13780_v3  ;;  %v3370_v1 = vpop.f32.mrb[57].mxu1 }
 0x8ac   :  { %10244 = vrcp.f32 %v3438_v40  ;;  %v9384_v23 = vadd.f32 %v3370_v1, %v13781_v2  ;;  %v13794_v40 = vld [vmem:[#allocation16_spill] sm:$0xff] }
 0x8ad   :  { %v10235_v50 = vpop.eup %10234  ;;  %10246 = vrcp.f32 %v3437_v43 }
 0x8ae   :  { %v10237_v39 = vpop.eup %10236  ;;  %v3440_v6 = vadd.f32 1.0, %v10235_v50  ;;  %10248 = vpow2.f32 %v7226_v56  ;;  %v8647_v46 = vpop.f32.mrb[58].mxu1  ;;  %v13795_v56 = vld [vmem:[#allocation13_spill] sm:$0xff] }
 0x8af   :  { %v3439_v51 = vadd.f32 1.0, %v10237_v39  ;;  %10250 = vtanh.f32 %v9383_v61  ;;  %v9385_v53 = vadd.f32 %v8647_v46, %v13782_v26  ;;  %v3380_v58 = vpop.f32.mrb[59].mxu1  ;;  %v13796_v39 = vld [vmem:[#allocation14_spill] sm:$0xff] }
 0x8b0   :  { %10252 = vrcp.f32 %v3440_v6  ;;  %v9386_v16 = vadd.f32 %v3380_v58, %v13794_v40  ;;  %v13797_v58 = vld [vmem:[#allocation17_spill] sm:$0xff] }
 0x8b1   :  { %v10239_v57 = vpop.eup %10238  ;;  %10254 = vrcp.f32 %v3439_v51 }
 0x8b2   :  { %v10241_v54 = vpop.eup %10240  ;;  %v3462_v59 = vadd.f32 1.0, %v10239_v57  ;;  %10256 = vtanh.f32 %v9384_v23  ;;  %v8650_v43 = vpop.f32.mrb[60].mxu1 }
 0x8b3   :  { %v3461_v3 = vadd.f32 1.0, %v10241_v54  ;;  %10258 = vtanh.f32 %v9385_v53  ;;  %v9387_v50 = vadd.f32 %v8650_v43, %v13795_v56  ;;  %v3390_v1 = vpop.f32.mrb[61].mxu1 }
 0x8b4   :  { %10260 = vrcp.f32 %v3462_v59  ;;  %v9388_v61 = vadd.f32 %v3390_v1, %v13796_v39 }
 0x8b5   :  { %v10243_v2 = vpop.eup %10242  ;;  %10262 = vrcp.f32 %v3461_v3  ;;  %v7229_v46 = vmul.f32 -1.442695, %v9387_v50 }
 0x8b6   :  { %v10245_v6 = vpop.eup %10244  ;;  %v3464_v26 = vadd.f32 1.0, %v10243_v2  ;;  %10264 = vtanh.f32 %v9386_v16  ;;  %v7228_v51 = vmul.f32 -1.442695, %v9388_v61  ;;  %v8653_v57 = vpop.f32.mrb[62].mxu1 }
 0x8b7   :  { %v10247_v23 = vpop.eup %10246  ;;  %10266 = vpow2.f32 %v7229_v46  ;;  %v9389_v40 = vadd.f32 %v8653_v57, %v13797_v58  ;;  %v3400_v54 = vpop.f32.mrb[63].mxu1 }
 0x8b8   :  { %v10249_v53 = vpop.eup %10248  ;;  %10268 = vrcp.f32 %v3464_v26  ;;  %v9390_v43 = vadd.f32 %v3400_v54, %v13757_v49 }
 0x8b9   :  { %v10251_v59 = vpop.eup %10250  ;;  %v3463_v56 = vadd.f32 1.0, %v10249_v53  ;;  %10270 = vpow2.f32 %v7228_v51  ;;  %v7231_v1 = vmul.f32 -1.442695, %v9389_v40 }
 0x8ba   :  { %v10253_v3 = vpop.eup %10252  ;;  %v3506_v50 = vmul.f32 %v10251_v59, %v10245_v6  ;;  %v7230_v39 = vmul.f32 -1.442695, %v9390_v43 }
 0x8bb   :  { %v10255_v2 = vpop.eup %10254  ;;  %10272 = vrcp.f32 %v3463_v56 }
 0x8bc   :  { %v10257_v16 = vpop.eup %10256  ;;  %10274 = vpow2.f32 %v7231_v1 }
 0x8bd   :  { %v10259_v61 = vpop.eup %10258  ;;  %v3505_v46 = vmul.f32 %v10257_v16, %v10247_v23  ;;  %10276 = vpow2.f32 %v7230_v39 }
 0x8be   :  { %v10261_v57 = vpop.eup %10260  ;;  %v3508_v58 = vmul.f32 %v10259_v61, %v10253_v3 }
 0x8bf   :  { %v10263_v41 = vpop.eup %10262  ;;  %v3502_v26 = vmul.f32 %v10261_v57, %v12390_v55 }
 0x8c0   :  { %v10265_v54 = vpop.eup %10264  ;;  %v3501_v53 = vmul.f32 %v10263_v41, %v12392_v60 }
 0x8c1   :  { %v10267_v51 = vpop.eup %10266  ;;  %v12489_v40 = vadd.f32 %v3506_v50, %v3502_v26  ;;  %v3507_v6 = vmul.f32 %v10265_v54, %v10255_v2 }
 0x8c2   :  { %v10269_v43 = vpop.eup %10268  ;;  %v12491_v59 = vadd.f32 %v3505_v46, %v3501_v53  ;;  %v3490_v56 = vadd.f32 1.0, %v10267_v51 }
 0x8c3   :  { %v10271_v1 = vpop.eup %10270  ;;  %v3504_v23 = vmul.f32 %v10269_v43, %v12397_v38  ;;  %10278 = vtanh.f32 %v12489_v40 }
 0x8c4   :  { %10280 = vtanh.f32 %v12491_v59  ;;  %v3489_v39 = vadd.f32 1.0, %v10271_v1 }
 0x8c5   :  { %v10273_v55 = vpop.eup %10272  ;;  %v12496_v3 = vadd.f32 %v3508_v58, %v3504_v23  ;;  %10282 = vrcp.f32 %v3490_v56 }
 0x8c6   :  { %v10275_v41 = vpop.eup %10274  ;;  %v3503_v60 = vmul.f32 %v10273_v55, %v12401_v45  ;;  %10284 = vrcp.f32 %v3489_v39  ;;  %v13800_v39 = vld [vmem:[#allocation11_spill] sm:$0xff] }
 0x8c7   :  { %v10277_v50 = vpop.eup %10276  ;;  %10286 = vtanh.f32 %v12496_v3  ;;  %v3492_v2 = vadd.f32 1.0, %v10275_v41 }
 0x8c8   :  { %v12500_v16 = vadd.f32 %v3507_v6, %v3503_v60  ;;  %v3491_v38 = vadd.f32 1.0, %v10277_v50 }
 0x8c9   :  { %10288 = vrcp.f32 %v3492_v2 }
 0x8ca   :  { %10290 = vtanh.f32 %v12500_v16 }
 0x8cb   :  { %10292 = vrcp.f32 %v3491_v38  ;;  %v13801_v38 = vld [vmem:[#allocation12_spill] sm:$0xff] }
 0x8cd   :  { %v10279_v61 = vpop.eup %10278 }
 0x8ce   :  { %v10281_v46 = vpop.eup %10280 }
 0x8cf   :  { %v10283_v58 = vpop.eup %10282 }
 0x8d0   :  { %v10285_v57 = vpop.eup %10284  ;;  %v3518_v26 = vmul.f32 %v10283_v58, %v10279_v61 }
 0x8d1   :  { %v10287_v54 = vpop.eup %10286  ;;  %v3517_v53 = vmul.f32 %v10285_v57, %v10281_v46  ;;  %v13802_v57 = vld [vmem:[#allocation15_spill] sm:$0xff] }
 0x8d3   :  { %v10289_v45 = vpop.eup %10288  ;;  %v9193_v51 = vpack.c.bf16 %v3518_v26, %v3517_v53 }
 0x8d4   :  { %v10291_v43 = vpop.eup %10290  ;;  %v3520_v56 = vmul.f32 %v10289_v45, %v10287_v54 }
 0x8d5   :  { %v10293_v1 = vpop.eup %10292  ;;  %9194 = vmatprep.subr.bf16.mxu0 %v9193_v51 }
 0x8d6   :  { %9196 = vmatpush3.bf16.msra.mxu0 %v9193_v51  ;;  %v3519_v6 = vmul.f32 %v10293_v1, %v10291_v43  ;;  %v13803_v43 = vld [vmem:[#allocation16_spill] sm:$0xff] }
 0x8d8   :  { %v9197_v23 = vpack.c.bf16 %v3520_v56, %v3519_v6 }
 0x8da   :  { %9198 = vmatprep.subr.bf16.mxu0 %v9197_v23 }
 0x8db   :  { %9200 = vmatpush3.bf16.msra.mxu0 %v9197_v23  ;;  %v13804_v23 = vld [vmem:[#allocation13_spill] sm:$0xff] }
 0x8de   :  { %8689 = vmatmul.mubr.msk.f32.vlgmr.msra.gmra.mrb[64].mxu0 %vm387_vm2, %v12148_v44  ;;  %v7277_v44 = vld [vmem:[%s13644_s0 + $0x48] sm:$0xff] }
 0x8df   :  { %8691 = vmatprep.mubr.msk.f32.mxu0 %vm387_vm2, %v12155_v22  ;;  %8712 = vmatprep.subr.mxu1 %v7277_v44 }
 0x8e0   :  { %8713 = vmatpush3.msra.mxu1 %v7277_v44 }
 0x8e1   :  { %8715 = vmatmul.mubr.msk.f32.vlgmr.msra.gmra.mrb[64].mxu1 %vm193_vm0, %v12263_v31 }
 0x8e2   :  { %8692 = vmatmul.mubr.msk.f32.gmra.mrb[66].mxu0 %vm387_vm2, %v12162_v24  ;;  %8717 = vmatprep.mubr.msk.f32.mxu1 %vm193_vm0, %v12270_v62 }
 0x8e3   :  { %8694 = vmatprep.mubr.msk.f32.mxu0 %vm387_vm2, %v12169_v18 }
 0x8e5   :  { %8718 = vmatmul.mubr.msk.f32.gmra.mrb[66].mxu1 %vm193_vm0, %v12277_v10 }
 0x8e6   :  { %8695 = vmatmul.mubr.msk.f32.gmra.mrb[68].mxu0 %vm387_vm2, %v12176_v33  ;;  %8720 = vmatprep.mubr.msk.f32.mxu1 %vm193_vm0, %v12284_v27 }
 0x8e7   :  { %8697 = vmatprep.mubr.msk.f32.mxu0 %vm387_vm2, %v12183_v48 }
 0x8e9   :  { %8721 = vmatmul.mubr.msk.f32.gmra.mrb[68].mxu1 %vm193_vm0, %v12291_v19 }
 0x8ea   :  { %8698 = vmatmul.mubr.msk.f32.gmra.mrb[70].mxu0 %vm387_vm2, %v12190_v52  ;;  %8723 = vmatprep.mubr.msk.f32.mxu1 %vm193_vm0, %v12298_v13 }
 0x8eb   :  { %8700 = vmatprep.mubr.msk.f32.mxu0 %vm387_vm2, %v12197_v20 }
 0x8ed   :  { %8724 = vmatmul.mubr.msk.f32.gmra.mrb[70].mxu1 %vm193_vm0, %v12305_v21 }
 0x8ee   :  { %8701 = vmatmul.mubr.msk.f32.gmra.mrb[72].mxu0 %vm387_vm2, %v12204_v36  ;;  %8726 = vmatprep.mubr.msk.f32.mxu1 %vm193_vm0, %v12312_v29  ;;  %v13799_v29 = vld [vmem:[#allocation10_spill] sm:$0xff] }
 0x8ef   :  { %8703 = vmatprep.mubr.msk.f32.mxu0 %vm387_vm2, %v12211_v28 }
 0x8f1   :  { %8727 = vmatmul.mubr.msk.f32.gmra.mrb[72].mxu1 %vm193_vm0, %v12319_v30 }
 0x8f2   :  { %8704 = vmatmul.mubr.msk.f32.gmra.mrb[74].mxu0 %vm387_vm2, %v12218_v25  ;;  %8729 = vmatprep.mubr.msk.f32.mxu1 %vm193_vm0, %v12326_v12 }
 0x8f3   :  { %8706 = vmatprep.mubr.msk.f32.mxu0 %vm387_vm2, %v12225_v37 }
 0x8f5   :  { %8730 = vmatmul.mubr.msk.f32.gmra.mrb[74].mxu1 %vm193_vm0, %v12333_v17 }
 0x8f6   :  { %8707 = vmatmul.mubr.msk.f32.gmra.mrb[76].mxu0 %vm387_vm2, %v12232_v42  ;;  %8732 = vmatprep.mubr.msk.f32.mxu1 %vm193_vm0, %v12340_v9 }
 0x8f7   :  { %8709 = vmatprep.mubr.msk.f32.mxu0 %vm387_vm2, %v12239_v5 }
 0x8f9   :  { %8733 = vmatmul.mubr.msk.f32.gmra.mrb[76].mxu1 %vm193_vm0, %v12347_v0 }
 0x8fa   :  { %8710 = vmatmul.mubr.msk.f32.gmra.mrb[78].mxu0 %vm387_vm2, %v12246_v63  ;;  %8735 = vmatprep.mubr.msk.f32.mxu1 %vm193_vm0, %v12354_v35  ;;  %v13798_v63 = vld [vmem:[#allocation7_spill] sm:$0xff] }
 0x8fb   :  { %8772 = vmatprep.mubr.msk.f32.mxu0 %vm193_vm0, %v12253_v14 }
 0x8fd   :  { %8736 = vmatmul.mubr.msk.f32.gmra.mrb[78].mxu1 %vm193_vm0, %v13789_v7 }
 0x8fe   :  { %8746 = vmatprep.mubr.msk.f32.mxu1 %vm387_vm2, %v13790_v4 }
 0x9b1   :  { %v8690_v22 = vpop.f32.mrb[64].mxu0 }
 0x9b2   :  { %v9391_v24 = vadd.f32 %v8690_v22, %v11424_v11  ;;  %v3734_v18 = vpop.f32.mrb[65].mxu0 }
 0x9b3   :  { %v9392_v33 = vadd.f32 %v3734_v18, %v13791_v34 }
 0x9b4   :  { %v7266_v48 = vmul.f32 -1.442695, %v9391_v24  ;;  %v13805_v24 = vld [vmem:[#allocation14_spill] sm:$0xff] }
 0x9b5   :  { %v7265_v52 = vmul.f32 -1.442695, %v9392_v33  ;;  %v8693_v20 = vpop.f32.mrb[66].mxu0 }
 0x9b6   :  { %10294 = vpow2.f32 %v7266_v48  ;;  %v9393_v36 = vadd.f32 %v8693_v20, %v11426_v15  ;;  %v3744_v28 = vpop.f32.mrb[67].mxu0 }
 0x9b7   :  { %10296 = vpow2.f32 %v7265_v52  ;;  %v9394_v25 = vadd.f32 %v3744_v28, %v13792_v32 }
 0x9b8   :  { %v7268_v37 = vmul.f32 -1.442695, %v9393_v36 }
 0x9b9   :  { %v7267_v42 = vmul.f32 -1.442695, %v9394_v25  ;;  %v8696_v5 = vpop.f32.mrb[68].mxu0 }
 0x9ba   :  { %10298 = vpow2.f32 %v7268_v37  ;;  %v9395_v14 = vadd.f32 %v8696_v5, %v13798_v63  ;;  %v3754_v31 = vpop.f32.mrb[69].mxu0  ;;  %v13806_v37 = vld [vmem:[#allocation17_spill] sm:$0xff] }
 0x9bb   :  { %10300 = vpow2.f32 %v7267_v42  ;;  %v9396_v62 = vadd.f32 %v3754_v31, %v11418_v8 }
 0x9bc   :  { %v7270_v10 = vmul.f32 -1.442695, %v9395_v14 }
 0x9bd   :  { %v7269_v27 = vmul.f32 -1.442695, %v9396_v62  ;;  %v8699_v19 = vpop.f32.mrb[70].mxu0 }
 0x9be   :  { %10302 = vpow2.f32 %v7270_v10  ;;  %v9397_v13 = vadd.f32 %v8699_v19, %v13758_v47  ;;  %v3764_v21 = vpop.f32.mrb[71].mxu0 }
 0x9bf   :  { %10304 = vpow2.f32 %v7269_v27  ;;  %v9398_v30 = vadd.f32 %v3764_v21, %v13799_v29 }
 0x9c0   :  { %v10295_v12 = vpop.eup %10294  ;;  %v7272_v17 = vmul.f32 -1.442695, %v9397_v13 }
 0x9c1   :  { %v10297_v9 = vpop.eup %10296  ;;  %v3842_v0 = vadd.f32 1.0, %v10295_v12  ;;  %v7271_v35 = vmul.f32 -1.442695, %v9398_v30  ;;  %v8702_v7 = vpop.f32.mrb[72].mxu0 }
 0x9c2   :  { %v3841_v4 = vadd.f32 1.0, %v10297_v9  ;;  %10306 = vpow2.f32 %v7272_v17  ;;  %v9399_v55 = vadd.f32 %v8702_v7, %v13800_v39  ;;  %v3774_v41 = vpop.f32.mrb[73].mxu0 }
 0x9c3   :  { %10308 = vrcp.f32 %v3842_v0  ;;  %v9400_v61 = vadd.f32 %v3774_v41, %v13801_v38 }
 0x9c4   :  { %v10299_v60 = vpop.eup %10298  ;;  %10310 = vrcp.f32 %v3841_v4 }
 0x9c5   :  { %v10301_v50 = vpop.eup %10300  ;;  %v3844_v2 = vadd.f32 1.0, %v10299_v60  ;;  %10312 = vpow2.f32 %v7271_v35  ;;  %v8705_v46 = vpop.f32.mrb[74].mxu0 }
 0x9c6   :  { %v3843_v58 = vadd.f32 1.0, %v10301_v50  ;;  %10314 = vtanh.f32 %v9399_v55  ;;  %v9401_v26 = vadd.f32 %v8705_v46, %v13802_v57  ;;  %v3784_v54 = vpop.f32.mrb[75].mxu0 }
 0x9c7   :  { %10316 = vrcp.f32 %v3844_v2  ;;  %v9402_v56 = vadd.f32 %v3784_v54, %v13803_v43 }
 0x9c8   :  { %v10303_v53 = vpop.eup %10302  ;;  %10318 = vrcp.f32 %v3843_v58 }
 0x9c9   :  { %v10305_v45 = vpop.eup %10304  ;;  %v3866_v51 = vadd.f32 1.0, %v10303_v53  ;;  %10320 = vtanh.f32 %v9400_v61  ;;  %v8708_v1 = vpop.f32.mrb[76].mxu0 }
 0x9ca   :  { %v3865_v6 = vadd.f32 1.0, %v10305_v45  ;;  %10322 = vtanh.f32 %v9401_v26  ;;  %v9403_v44 = vadd.f32 %v8708_v1, %v13804_v23  ;;  %v3794_v22 = vpop.f32.mrb[77].mxu0 }
 0x9cb   :  { %10324 = vrcp.f32 %v3866_v51  ;;  %v9404_v18 = vadd.f32 %v3794_v22, %v13805_v24 }
 0x9cc   :  { %v10307_v33 = vpop.eup %10306  ;;  %10326 = vrcp.f32 %v3865_v6  ;;  %v7274_v48 = vmul.f32 -1.442695, %v9403_v44 }
 0x9cd   :  { %v10309_v52 = vpop.eup %10308  ;;  %v3868_v20 = vadd.f32 1.0, %v10307_v33  ;;  %10328 = vtanh.f32 %v9402_v56  ;;  %v7273_v36 = vmul.f32 -1.442695, %v9404_v18  ;;  %v8711_v28 = vpop.f32.mrb[78].mxu0 }
 0x9ce   :  { %v10311_v25 = vpop.eup %10310  ;;  %10330 = vpow2.f32 %v7274_v48  ;;  %v9405_v42 = vadd.f32 %v8711_v28, %v13806_v37  ;;  %v3804_v5 = vpop.f32.mrb[79].mxu0 }
 0x9cf   :  { %v10313_v14 = vpop.eup %10312  ;;  %10332 = vrcp.f32 %v3868_v20  ;;  %v9406_v31 = vadd.f32 %v3804_v5, %v13757_v49 }
 0x9d0   :  { %v10315_v62 = vpop.eup %10314  ;;  %v3867_v10 = vadd.f32 1.0, %v10313_v14  ;;  %10334 = vpow2.f32 %v7273_v36  ;;  %v7276_v27 = vmul.f32 -1.442695, %v9405_v42 }
 0x9d1   :  { %v10317_v19 = vpop.eup %10316  ;;  %v3910_v13 = vmul.f32 %v10315_v62, %v10309_v52  ;;  %v7275_v21 = vmul.f32 -1.442695, %v9406_v31  ;;  %v12605_v31 = vld [vmem:[%s13649_s5 + $0x8] sm:$0xff]  ;;  %v12612_v62 = vld [vmem:[%s13649_s5 + $0x10] sm:$0xff] }
 0x9d2   :  { %v10319_v30 = vpop.eup %10318  ;;  %10336 = vrcp.f32 %v3867_v10  ;;  %v12619_v10 = vld [vmem:[%s13649_s5 + $0x18] sm:$0xff] }
 0x9d3   :  { %v10321_v12 = vpop.eup %10320  ;;  %10338 = vpow2.f32 %v7276_v27  ;;  %v12626_v27 = vld [vmem:[%s13649_s5 + $0x20] sm:$0xff] }
 0x9d4   :  { %v10323_v17 = vpop.eup %10322  ;;  %v3909_v9 = vmul.f32 %v10321_v12, %v10311_v25  ;;  %10340 = vpow2.f32 %v7275_v21  ;;  %v12647_v21 = vld [vmem:[%s13649_s5 + $0x38] sm:$0xff]  ;;  %v12661_v12 = vld [vmem:[%s13649_s5 + $0x48] sm:$0xff] }
 0x9d5   :  { %v10325_v0 = vpop.eup %10324  ;;  %v3912_v35 = vmul.f32 %v10323_v17, %v10317_v19  ;;  %v12633_v19 = vld [vmem:[%s13649_s5 + $0x28] sm:$0xff]  ;;  %v12668_v17 = vld [vmem:[%s13649_s5 + $0x50] sm:$0xff] }
 0x9d6   :  { %v10327_v7 = vpop.eup %10326  ;;  %v3906_v4 = vmul.f32 %v10325_v0, %v12489_v40  ;;  %v12682_v0 = vld [vmem:[%s13649_s5 + $0x60] sm:$0xff] }
 0x9d7   :  { %v10329_v55 = vpop.eup %10328  ;;  %v3905_v41 = vmul.f32 %v10327_v7, %v12491_v59  ;;  %v12696_v7 = vld [vmem:[%s13649_s5 + $0x70] sm:$0xff] }
 0x9d8   :  { %v10331_v60 = vpop.eup %10330  ;;  %v12588_v50 = vadd.f32 %v3910_v13, %v3906_v4  ;;  %v3911_v2 = vmul.f32 %v10329_v55, %v10319_v30  ;;  %v12640_v13 = vld [vmem:[%s13649_s5 + $0x30] sm:$0xff]  ;;  %v12654_v30 = vld [vmem:[%s13649_s5 + $0x40] sm:$0xff]  ;;  %v12703_v4 = vld [vmem:[%s13649_s5 + $0x78] sm:$0xff] }
 0x9d9   :  { %v10333_v61 = vpop.eup %10332  ;;  %v12590_v46 = vadd.f32 %v3909_v9, %v3905_v41  ;;  %v3894_v58 = vadd.f32 1.0, %v10331_v60  ;;  %v12675_v9 = vld [vmem:[%s13649_s5 + $0x58] sm:$0xff]  ;;  %v12710_v55 = vld [vmem:[%s13647_s3] sm:$0xff]  ;;  %v7322_v41 = vld [vmem:[%s13644_s0 + $0x50] sm:$0xff] }
 0x9da   :  { %v10335_v26 = vpop.eup %10334  ;;  %v3908_v54 = vmul.f32 %v10333_v61, %v12496_v3  ;;  %10342 = vtanh.f32 %v12588_v50  ;;  %8770 = vmatprep.subr.mxu0 %v7322_v41  ;;  %v12720_v60 = vld [vmem:[%s13647_s3 + $0x8] sm:$0xff]  ;;  %v12734_v61 = vld [vmem:[%s13647_s3 + $0x18] sm:$0xff] }
 0x9db   :  { %10344 = vtanh.f32 %v12590_v46  ;;  %v3893_v53 = vadd.f32 1.0, %v10335_v26  ;;  %8771 = vmatpush3.msra.mxu0 %v7322_v41  ;;  %v12748_v26 = vld [vmem:[%s13647_s3 + $0x28] sm:$0xff] }
 0x9dc   :  { %v10337_v40 = vpop.eup %10336  ;;  %v12595_v45 = vadd.f32 %v3912_v35, %v3908_v54  ;;  %10346 = vrcp.f32 %v3894_v58  ;;  %v12689_v35 = vld [vmem:[%s13649_s5 + $0x68] sm:$0xff]  ;;  %8773 = vmatmul.mubr.msk.f32.vlgmr.msra.gmra.mrb[80].mxu0 %vm193_vm0, %v12720_v60  ;;  %v12741_v58 = vld [vmem:[%s13647_s3 + $0x20] sm:$0xff]  ;;  %v12755_v54 = vld [vmem:[%s13647_s3 + $0x30] sm:$0xff] }
 0x9dd   :  { %v10339_v59 = vpop.eup %10338  ;;  %v3907_v51 = vmul.f32 %v10337_v40, %v12500_v16  ;;  %10348 = vrcp.f32 %v3893_v53  ;;  %v12762_v53 = vld [vmem:[%s13647_s3 + $0x38] sm:$0xff]  ;;  %v12769_v40 = vld [vmem:[%s13647_s3 + $0x40] sm:$0xff] }
 0x9de   :  { %v10341_v56 = vpop.eup %10340  ;;  %10350 = vtanh.f32 %v12595_v45  ;;  %v3896_v1 = vadd.f32 1.0, %v10339_v59  ;;  %v12776_v59 = vld [vmem:[%s13647_s3 + $0x48] sm:$0xff] }
 0x9df   :  { %v12599_v6 = vadd.f32 %v3911_v2, %v3907_v51  ;;  %v3895_v3 = vadd.f32 1.0, %v10341_v56  ;;  %v12727_v2 = vld [vmem:[%s13647_s3 + $0x10] sm:$0xff]  ;;  %v12790_v56 = vld [vmem:[%s13647_s3 + $0x58] sm:$0xff] }
 0x9e0   :  { %10352 = vrcp.f32 %v3896_v1  ;;  %8775 = vmatprep.mubr.msk.f32.mxu0 %vm193_vm0, %v12727_v2  ;;  %v12783_v51 = vld [vmem:[%s13647_s3 + $0x50] sm:$0xff]  ;;  %v12797_v1 = vld [vmem:[%s13647_s3 + $0x60] sm:$0xff] }
 0x9e1   :  { %10354 = vtanh.f32 %v12599_v6  ;;  %8776 = vmatmul.mubr.msk.f32.gmra.mrb[82].mxu0 %vm193_vm0, %v12734_v61 }
 0x9e2   :  { %10356 = vrcp.f32 %v3895_v3  ;;  %8778 = vmatprep.mubr.msk.f32.mxu0 %vm193_vm0, %v12741_v58  ;;  %v12804_v3 = vld [vmem:[%s13647_s3 + $0x68] sm:$0xff] }
 0x9e4   :  { %v10343_v44 = vpop.eup %10342 }
 0x9e5   :  { %v10345_v22 = vpop.eup %10344  ;;  %8779 = vmatmul.mubr.msk.f32.gmra.mrb[84].mxu0 %vm193_vm0, %v12748_v26 }
 0x9e6   :  { %v10347_v18 = vpop.eup %10346  ;;  %8781 = vmatprep.mubr.msk.f32.mxu0 %vm193_vm0, %v12755_v54 }
 0x9e7   :  { %v10349_v33 = vpop.eup %10348  ;;  %v3922_v48 = vmul.f32 %v10347_v18, %v10343_v44  ;;  %v12811_v44 = vld [vmem:[%s13647_s3 + $0x70] sm:$0xff]  ;;  %v12825_v18 = vld [vmem:[%s13649_s5] sm:$0xff] }
 0x9e8   :  { %v10351_v52 = vpop.eup %10350  ;;  %v3921_v20 = vmul.f32 %v10349_v33, %v10345_v22  ;;  %v12818_v22 = vld [vmem:[%s13647_s3 + $0x78] sm:$0xff]  ;;  %13808 = vst [vmem:[#allocation9_spill] sm:$0xff] %v12825_v18 }
 0x9e9   :  { %8782 = vmatmul.mubr.msk.f32.gmra.mrb[86].mxu0 %vm193_vm0, %v12762_v53  ;;  %13807 = vst [vmem:[#allocation18_spill] sm:$0xff] %v12818_v22 }
 0x9ea   :  { %v10353_v16 = vpop.eup %10352  ;;  %v9201_v36 = vpack.c.bf16 %v3922_v48, %v3921_v20  ;;  %8784 = vmatprep.mubr.msk.f32.mxu0 %vm193_vm0, %v12769_v40 }
 0x9eb   :  { %v10355_v28 = vpop.eup %10354  ;;  %v3924_v25 = vmul.f32 %v10353_v16, %v10351_v52 }
 0x9ec   :  { %v10357_v42 = vpop.eup %10356  ;;  %9202 = vmatprep.subr.bf16.mxu1 %v9201_v36 }
 0x9ed   :  { %9204 = vmatpush3.bf16.msra.mxu1 %v9201_v36  ;;  %v3923_v5 = vmul.f32 %v10357_v42, %v10355_v28  ;;  %8785 = vmatmul.mubr.msk.f32.gmra.mrb[88].mxu0 %vm193_vm0, %v12776_v59 }
 0x9ee   :  { %8787 = vmatprep.mubr.msk.f32.mxu0 %vm193_vm0, %v12783_v51 }
 0x9ef   :  { %v9205_v14 = vpack.c.bf16 %v3924_v25, %v3923_v5 }
 0x9f1   :  { %9206 = vmatprep.subr.bf16.mxu1 %v9205_v14  ;;  %8788 = vmatmul.mubr.msk.f32.gmra.mrb[90].mxu0 %vm193_vm0, %v12790_v56 }
 0x9f2   :  { %9208 = vmatpush3.bf16.msra.mxu1 %v9205_v14  ;;  %8790 = vmatprep.mubr.msk.f32.mxu0 %vm193_vm0, %v12797_v1 }
 0x9f5   :  { %8747 = vmatmul.mubr.msk.f32.vlgmr.msra.gmra.mrb[64].mxu1 %vm387_vm2, %v12605_v31  ;;  %8791 = vmatmul.mubr.msk.f32.gmra.mrb[92].mxu0 %vm193_vm0, %v12804_v3 }
 0x9f6   :  { %8749 = vmatprep.mubr.msk.f32.mxu1 %vm387_vm2, %v12612_v62  ;;  %8793 = vmatprep.mubr.msk.f32.mxu0 %vm193_vm0, %v12811_v44 }
 0x9f9   :  { %8750 = vmatmul.mubr.msk.f32.gmra.mrb[66].mxu1 %vm387_vm2, %v12619_v10  ;;  %8794 = vmatmul.mubr.msk.f32.gmra.mrb[94].mxu0 %vm193_vm0, %v12818_v22 }
 0x9fa   :  { %8752 = vmatprep.mubr.msk.f32.mxu1 %vm387_vm2, %v12626_v27  ;;  %8804 = vmatprep.mubr.msk.f32.mxu0 %vm387_vm2, %v12825_v18 }
 0x9fd   :  { %8753 = vmatmul.mubr.msk.f32.gmra.mrb[68].mxu1 %vm387_vm2, %v12633_v19 }
 0x9fe   :  { %8755 = vmatprep.mubr.msk.f32.mxu1 %vm387_vm2, %v12640_v13 }
 0xa01   :  { %8756 = vmatmul.mubr.msk.f32.gmra.mrb[70].mxu1 %vm387_vm2, %v12647_v21 }
 0xa02   :  { %8758 = vmatprep.mubr.msk.f32.mxu1 %vm387_vm2, %v12654_v30 }
 0xa05   :  { %8759 = vmatmul.mubr.msk.f32.gmra.mrb[72].mxu1 %vm387_vm2, %v12661_v12 }
 0xa06   :  { %8761 = vmatprep.mubr.msk.f32.mxu1 %vm387_vm2, %v12668_v17 }
 0xa09   :  { %8762 = vmatmul.mubr.msk.f32.gmra.mrb[74].mxu1 %vm387_vm2, %v12675_v9 }
 0xa0a   :  { %8764 = vmatprep.mubr.msk.f32.mxu1 %vm387_vm2, %v12682_v0 }
 0xa0d   :  { %8765 = vmatmul.mubr.msk.f32.gmra.mrb[76].mxu1 %vm387_vm2, %v12689_v35 }
 0xa0e   :  { %8767 = vmatprep.mubr.msk.f32.mxu1 %vm387_vm2, %v12696_v7 }
 0xa11   :  { %8768 = vmatmul.mubr.msk.f32.gmra.mrb[78].mxu1 %vm387_vm2, %v12703_v4 }
 0xa12   :  { %8830 = vmatprep.mubr.msk.f32.mxu1 %vm193_vm0, %v12710_v55 }
 0xac8   :  { %v8748_v33 = vpop.f32.mrb[64].mxu1 }
 0xac9   :  { %v9407_v48 = vadd.f32 %v8748_v33, %v11424_v11  ;;  %v4138_v52 = vpop.f32.mrb[65].mxu1 }
 0xaca   :  { %v9408_v20 = vadd.f32 %v4138_v52, %v13791_v34 }
 0xacb   :  { %v7311_v16 = vmul.f32 -1.442695, %v9407_v48 }
 0xacc   :  { %v7310_v36 = vmul.f32 -1.442695, %v9408_v20  ;;  %v8751_v28 = vpop.f32.mrb[66].mxu1 }
 0xacd   :  { %10358 = vpow2.f32 %v7311_v16  ;;  %v9409_v25 = vadd.f32 %v8751_v28, %v11426_v15  ;;  %v4148_v42 = vpop.f32.mrb[67].mxu1 }
 0xace   :  { %10360 = vpow2.f32 %v7310_v36  ;;  %v9410_v5 = vadd.f32 %v4148_v42, %v13792_v32 }
 0xacf   :  { %v7313_v14 = vmul.f32 -1.442695, %v9409_v25 }
 0xad0   :  { %v7312_v41 = vmul.f32 -1.442695, %v9410_v5  ;;  %v8754_v22 = vpop.f32.mrb[68].mxu1 }
 0xad1   :  { %10362 = vpow2.f32 %v7313_v14  ;;  %v9411_v18 = vadd.f32 %v8754_v22, %v13798_v63  ;;  %v4158_v33 = vpop.f32.mrb[69].mxu1 }
 0xad2   :  { %10364 = vpow2.f32 %v7312_v41  ;;  %v9412_v52 = vadd.f32 %v4158_v33, %v11418_v8 }
 0xad3   :  { %v7315_v48 = vmul.f32 -1.442695, %v9411_v18 }
 0xad4   :  { %v7314_v20 = vmul.f32 -1.442695, %v9412_v52  ;;  %v8757_v34 = vpop.f32.mrb[70].mxu1 }
 0xad5   :  { %10366 = vpow2.f32 %v7315_v48  ;;  %v9413_v16 = vadd.f32 %v8757_v34, %v13758_v47  ;;  %v4168_v28 = vpop.f32.mrb[71].mxu1 }
 0xad6   :  { %10368 = vpow2.f32 %v7314_v20  ;;  %v9414_v36 = vadd.f32 %v4168_v28, %v13799_v29 }
 0xad7   :  { %v10359_v25 = vpop.eup %10358  ;;  %v7317_v42 = vmul.f32 -1.442695, %v9413_v16 }
 0xad8   :  { %v10361_v5 = vpop.eup %10360  ;;  %v4246_v14 = vadd.f32 1.0, %v10359_v25  ;;  %v7316_v32 = vmul.f32 -1.442695, %v9414_v36  ;;  %v8760_v22 = vpop.f32.mrb[72].mxu1 }
 0xad9   :  { %v4245_v63 = vadd.f32 1.0, %v10361_v5  ;;  %10370 = vpow2.f32 %v7317_v42  ;;  %v9415_v41 = vadd.f32 %v8760_v22, %v13800_v39  ;;  %v4178_v18 = vpop.f32.mrb[73].mxu1 }
 0xada   :  { %10372 = vrcp.f32 %v4246_v14  ;;  %v9416_v48 = vadd.f32 %v4178_v18, %v13801_v38 }
 0xadb   :  { %v10363_v33 = vpop.eup %10362  ;;  %10374 = vrcp.f32 %v4245_v63 }
 0xadc   :  { %v10365_v52 = vpop.eup %10364  ;;  %v4248_v34 = vadd.f32 1.0, %v10363_v33  ;;  %10376 = vpow2.f32 %v7316_v32  ;;  %v8763_v20 = vpop.f32.mrb[74].mxu1 }
 0xadd   :  { %v4247_v28 = vadd.f32 1.0, %v10365_v52  ;;  %10378 = vtanh.f32 %v9415_v41  ;;  %v9417_v16 = vadd.f32 %v8763_v20, %v13802_v57  ;;  %v4188_v36 = vpop.f32.mrb[75].mxu1 }
 0xade   :  { %10380 = vrcp.f32 %v4248_v34  ;;  %v9418_v14 = vadd.f32 %v4188_v36, %v13803_v43 }
 0xadf   :  { %v10367_v25 = vpop.eup %10366  ;;  %10382 = vrcp.f32 %v4247_v28 }
 0xae0   :  { %v10369_v42 = vpop.eup %10368  ;;  %v4270_v5 = vadd.f32 1.0, %v10367_v25  ;;  %10384 = vtanh.f32 %v9416_v48  ;;  %v8766_v63 = vpop.f32.mrb[76].mxu1 }
 0xae1   :  { %v4269_v22 = vadd.f32 1.0, %v10369_v42  ;;  %10386 = vtanh.f32 %v9417_v16  ;;  %v9419_v32 = vadd.f32 %v8766_v63, %v13804_v23  ;;  %v4198_v18 = vpop.f32.mrb[77].mxu1 }
 0xae2   :  { %10388 = vrcp.f32 %v4270_v5  ;;  %v9420_v41 = vadd.f32 %v4198_v18, %v13805_v24 }
 0xae3   :  { %v10371_v33 = vpop.eup %10370  ;;  %10390 = vrcp.f32 %v4269_v22  ;;  %v7319_v52 = vmul.f32 -1.442695, %v9419_v32 }
 0xae4   :  { %v10373_v34 = vpop.eup %10372  ;;  %v4272_v20 = vadd.f32 1.0, %v10371_v33  ;;  %10392 = vtanh.f32 %v9418_v14  ;;  %v7318_v28 = vmul.f32 -1.442695, %v9420_v41  ;;  %v8769_v25 = vpop.f32.mrb[78].mxu1 }
 0xae5   :  { %v10375_v48 = vpop.eup %10374  ;;  %10394 = vpow2.f32 %v7319_v52  ;;  %v9421_v36 = vadd.f32 %v8769_v25, %v13806_v37  ;;  %v4208_v42 = vpop.f32.mrb[79].mxu1 }
 0xae6   :  { %v10377_v16 = vpop.eup %10376  ;;  %10396 = vrcp.f32 %v4272_v20  ;;  %v9422_v63 = vadd.f32 %v4208_v42, %v13757_v49 }
 0xae7   :  { %v10379_v5 = vpop.eup %10378  ;;  %v4271_v23 = vadd.f32 1.0, %v10377_v16  ;;  %10398 = vpow2.f32 %v7318_v28  ;;  %v7321_v18 = vmul.f32 -1.442695, %v9421_v36 }
 0xae8   :  { %v10381_v22 = vpop.eup %10380  ;;  %v4314_v32 = vmul.f32 %v10379_v5, %v10373_v34  ;;  %v7320_v24 = vmul.f32 -1.442695, %v9422_v63 }
 0xae9   :  { %v10383_v33 = vpop.eup %10382  ;;  %10400 = vrcp.f32 %v4271_v23 }
 0xaea   :  { %v10385_v14 = vpop.eup %10384  ;;  %10402 = vpow2.f32 %v7321_v18 }
 0xaeb   :  { %v10387_v41 = vpop.eup %10386  ;;  %v4313_v52 = vmul.f32 %v10385_v14, %v10375_v48  ;;  %10404 = vpow2.f32 %v7320_v24 }
 0xaec   :  { %v10389_v25 = vpop.eup %10388  ;;  %v4316_v37 = vmul.f32 %v10387_v41, %v10381_v22 }
 0xaed   :  { %v10391_v43 = vpop.eup %10390  ;;  %v4310_v20 = vmul.f32 %v10389_v25, %v12588_v50 }
 0xaee   :  { %v10393_v42 = vpop.eup %10392  ;;  %v4309_v16 = vmul.f32 %v10391_v43, %v12590_v46 }
 0xaef   :  { %v10395_v28 = vpop.eup %10394  ;;  %v12847_v36 = vadd.f32 %v4314_v32, %v4310_v20  ;;  %v4315_v34 = vmul.f32 %v10393_v42, %v10383_v33 }
 0xaf0   :  { %v10397_v63 = vpop.eup %10396  ;;  %v12849_v5 = vadd.f32 %v4313_v52, %v4309_v16  ;;  %v4298_v23 = vadd.f32 1.0, %v10395_v28 }
 0xaf1   :  { %v10399_v18 = vpop.eup %10398  ;;  %v4312_v48 = vmul.f32 %v10397_v63, %v12595_v45  ;;  %10406 = vtanh.f32 %v12847_v36 }
 0xaf2   :  { %10408 = vtanh.f32 %v12849_v5  ;;  %v4297_v24 = vadd.f32 1.0, %v10399_v18 }
 0xaf3   :  { %v10401_v50 = vpop.eup %10400  ;;  %v12854_v22 = vadd.f32 %v4316_v37, %v4312_v48  ;;  %10410 = vrcp.f32 %v4298_v23 }
 0xaf4   :  { %v10403_v43 = vpop.eup %10402  ;;  %v4311_v46 = vmul.f32 %v10401_v50, %v12599_v6  ;;  %10412 = vrcp.f32 %v4297_v24  ;;  %v7367_v24 = vld [vmem:[%s13644_s0 + $0x58] sm:$0xff]  ;;  %v13809_v50 = vld [vmem:[#allocation18_spill] sm:$0xff] }
 0xaf5   :  { %v10405_v32 = vpop.eup %10404  ;;  %10414 = vtanh.f32 %v12854_v22  ;;  %v4300_v33 = vadd.f32 1.0, %v10403_v43  ;;  %8828 = vmatprep.subr.mxu1 %v7367_v24  ;;  %v13810_v43 = vld [vmem:[#allocation9_spill] sm:$0xff] }
 0xaf6   :  { %v12858_v14 = vadd.f32 %v4315_v34, %v4311_v46  ;;  %v4299_v45 = vadd.f32 1.0, %v10405_v32  ;;  %8829 = vmatpush3.msra.mxu1 %v7367_v24 }
 0xaf7   :  { %10416 = vrcp.f32 %v4300_v33  ;;  %8831 = vmatmul.mubr.msk.f32.vlgmr.msra.gmra.mrb[80].mxu1 %vm193_vm0, %v12720_v60 }
 0xaf8   :  { %10418 = vtanh.f32 %v12858_v14  ;;  %8833 = vmatprep.mubr.msk.f32.mxu1 %vm193_vm0, %v12727_v2 }
 0xaf9   :  { %10420 = vrcp.f32 %v4299_v45  ;;  %v13811_v45 = vld [vmem:[#allocation6_spill] sm:$0xff] }
 0xafb   :  { %v10407_v41 = vpop.eup %10406  ;;  %8834 = vmatmul.mubr.msk.f32.gmra.mrb[82].mxu1 %vm193_vm0, %v12734_v61 }
 0xafc   :  { %v10409_v52 = vpop.eup %10408  ;;  %8836 = vmatprep.mubr.msk.f32.mxu1 %vm193_vm0, %v12741_v58 }
 0xafd   :  { %v10411_v37 = vpop.eup %10410 }
 0xafe   :  { %v10413_v25 = vpop.eup %10412  ;;  %v4326_v20 = vmul.f32 %v10411_v37, %v10407_v41 }
 0xaff   :  { %v10415_v42 = vpop.eup %10414  ;;  %v4325_v16 = vmul.f32 %v10413_v25, %v10409_v52  ;;  %8837 = vmatmul.mubr.msk.f32.gmra.mrb[84].mxu1 %vm193_vm0, %v12748_v26 }
 0xb00   :  { %8839 = vmatprep.mubr.msk.f32.mxu1 %vm193_vm0, %v12755_v54 }
 0xb01   :  { %v10417_v6 = vpop.eup %10416  ;;  %v9209_v28 = vpack.c.bf16 %v4326_v20, %v4325_v16  ;;  %v13812_v16 = vld [vmem:[#allocation8_spill] sm:$0xff] }
 0xb02   :  { %v10419_v63 = vpop.eup %10418  ;;  %v4328_v23 = vmul.f32 %v10417_v6, %v10415_v42 }
 0xb03   :  { %v10421_v18 = vpop.eup %10420  ;;  %9210 = vmatprep.subr.bf16.mxu0 %v9209_v28  ;;  %8840 = vmatmul.mubr.msk.f32.gmra.mrb[86].mxu1 %vm193_vm0, %v12762_v53 }
 0xb04   :  { %9212 = vmatpush3.bf16.msra.mxu0 %v9209_v28  ;;  %v4327_v34 = vmul.f32 %v10421_v18, %v10419_v63  ;;  %8842 = vmatprep.mubr.msk.f32.mxu1 %vm193_vm0, %v12769_v40  ;;  %v13813_v18 = vld [vmem:[#allocation7_spill] sm:$0xff] }
 0xb06   :  { %v9213_v48 = vpack.c.bf16 %v4328_v23, %v4327_v34 }
 0xb07   :  { %8843 = vmatmul.mubr.msk.f32.gmra.mrb[88].mxu1 %vm193_vm0, %v12776_v59 }
 0xb08   :  { %9214 = vmatprep.subr.bf16.mxu0 %v9213_v48  ;;  %8845 = vmatprep.mubr.msk.f32.mxu1 %vm193_vm0, %v12783_v51 }
 0xb09   :  { %9216 = vmatpush3.bf16.msra.mxu0 %v9213_v48 }
 0xb0b   :  { %8846 = vmatmul.mubr.msk.f32.gmra.mrb[90].mxu1 %vm193_vm0, %v12790_v56 }
 0xb0c   :  { %8805 = vmatmul.mubr.msk.f32.vlgmr.msra.gmra.mrb[80].mxu0 %vm387_vm2, %v12605_v31  ;;  %8848 = vmatprep.mubr.msk.f32.mxu1 %vm193_vm0, %v12797_v1 }
 0xb0d   :  { %8807 = vmatprep.mubr.msk.f32.mxu0 %vm387_vm2, %v12612_v62 }
 0xb0f   :  { %8849 = vmatmul.mubr.msk.f32.gmra.mrb[92].mxu1 %vm193_vm0, %v12804_v3 }
 0xb10   :  { %8808 = vmatmul.mubr.msk.f32.gmra.mrb[82].mxu0 %vm387_vm2, %v12619_v10  ;;  %8851 = vmatprep.mubr.msk.f32.mxu1 %vm193_vm0, %v12811_v44 }
 0xb11   :  { %8810 = vmatprep.mubr.msk.f32.mxu0 %vm387_vm2, %v12626_v27 }
 0xb13   :  { %8852 = vmatmul.mubr.msk.f32.gmra.mrb[94].mxu1 %vm193_vm0, %v13809_v50 }
 0xb14   :  { %8811 = vmatmul.mubr.msk.f32.gmra.mrb[84].mxu0 %vm387_vm2, %v12633_v19  ;;  %8862 = vmatprep.mubr.msk.f32.mxu1 %vm387_vm2, %v13810_v43 }
 0xb15   :  { %8813 = vmatprep.mubr.msk.f32.mxu0 %vm387_vm2, %v12640_v13 }
 0xb18   :  { %8814 = vmatmul.mubr.msk.f32.gmra.mrb[86].mxu0 %vm387_vm2, %v12647_v21 }
 0xb19   :  { %8816 = vmatprep.mubr.msk.f32.mxu0 %vm387_vm2, %v12654_v30 }
 0xb1c   :  { %8817 = vmatmul.mubr.msk.f32.gmra.mrb[88].mxu0 %vm387_vm2, %v12661_v12 }
 0xb1d   :  { %8819 = vmatprep.mubr.msk.f32.mxu0 %vm387_vm2, %v12668_v17 }
 0xb20   :  { %8820 = vmatmul.mubr.msk.f32.gmra.mrb[90].mxu0 %vm387_vm2, %v12675_v9 }
 0xb21   :  { %8822 = vmatprep.mubr.msk.f32.mxu0 %vm387_vm2, %v12682_v0 }
 0xb24   :  { %8823 = vmatmul.mubr.msk.f32.gmra.mrb[92].mxu0 %vm387_vm2, %v12689_v35 }
 0xb25   :  { %8825 = vmatprep.mubr.msk.f32.mxu0 %vm387_vm2, %v12696_v7 }
 0xb28   :  { %8826 = vmatmul.mubr.msk.f32.gmra.mrb[94].mxu0 %vm387_vm2, %v12703_v4 }
 0xb29   :  { %8888 = vmatprep.mubr.msk.f32.mxu0 %vm193_vm0, %v12710_v55 }
 0xbdf   :  { %v8806_v46 = vpop.f32.mrb[80].mxu0 }
 0xbe0   :  { %v9423_v32 = vadd.f32 %v8806_v46, %v11424_v11  ;;  %v4542_v33 = vpop.f32.mrb[81].mxu0 }
 0xbe1   :  { %v9424_v41 = vadd.f32 %v4542_v33, %v13811_v45 }
 0xbe2   :  { %v7356_v52 = vmul.f32 -1.442695, %v9423_v32 }
 0xbe3   :  { %v7355_v37 = vmul.f32 -1.442695, %v9424_v41  ;;  %v8809_v25 = vpop.f32.mrb[82].mxu0 }
 0xbe4   :  { %10422 = vpow2.f32 %v7356_v52  ;;  %v9425_v20 = vadd.f32 %v8809_v25, %v11426_v15  ;;  %v4552_v42 = vpop.f32.mrb[83].mxu0 }
 0xbe5   :  { %10424 = vpow2.f32 %v7355_v37  ;;  %v9426_v6 = vadd.f32 %v4552_v42, %v13812_v16 }
 0xbe6   :  { %v7358_v28 = vmul.f32 -1.442695, %v9425_v20 }
 0xbe7   :  { %v7357_v63 = vmul.f32 -1.442695, %v9426_v6  ;;  %v8812_v23 = vpop.f32.mrb[84].mxu0 }
 0xbe8   :  { %10426 = vpow2.f32 %v7358_v28  ;;  %v9427_v34 = vadd.f32 %v8812_v23, %v13813_v18  ;;  %v4562_v48 = vpop.f32.mrb[85].mxu0 }
 0xbe9   :  { %10428 = vpow2.f32 %v7357_v63  ;;  %v9428_v24 = vadd.f32 %v4562_v48, %v11418_v8 }
 0xbea   :  { %v7360_v46 = vmul.f32 -1.442695, %v9427_v34 }
 0xbeb   :  { %v7359_v32 = vmul.f32 -1.442695, %v9428_v24  ;;  %v8815_v33 = vpop.f32.mrb[86].mxu0 }
 0xbec   :  { %10430 = vpow2.f32 %v7360_v46  ;;  %v9429_v41 = vadd.f32 %v8815_v33, %v13758_v47  ;;  %v4572_v52 = vpop.f32.mrb[87].mxu0 }
 0xbed   :  { %10432 = vpow2.f32 %v7359_v32  ;;  %v9430_v37 = vadd.f32 %v4572_v52, %v13799_v29 }
 0xbee   :  { %v10423_v25 = vpop.eup %10422  ;;  %v7362_v20 = vmul.f32 -1.442695, %v9429_v41 }
 0xbef   :  { %v10425_v42 = vpop.eup %10424  ;;  %v4650_v6 = vadd.f32 1.0, %v10423_v25  ;;  %v7361_v28 = vmul.f32 -1.442695, %v9430_v37  ;;  %v8818_v23 = vpop.f32.mrb[88].mxu0 }
 0xbf0   :  { %v4649_v18 = vadd.f32 1.0, %v10425_v42  ;;  %10434 = vpow2.f32 %v7362_v20  ;;  %v9431_v63 = vadd.f32 %v8818_v23, %v13800_v39  ;;  %v4582_v34 = vpop.f32.mrb[89].mxu0 }
 0xbf1   :  { %10436 = vrcp.f32 %v4650_v6  ;;  %v9432_v32 = vadd.f32 %v4582_v34, %v13801_v38  ;;  %v13814_v6 = vld [vmem:[#allocation16_spill] sm:$0xff] }
 0xbf2   :  { %v10427_v48 = vpop.eup %10426  ;;  %10438 = vrcp.f32 %v4649_v18 }
 0xbf3   :  { %v10429_v24 = vpop.eup %10428  ;;  %v4652_v46 = vadd.f32 1.0, %v10427_v48  ;;  %10440 = vpow2.f32 %v7361_v28  ;;  %v8821_v33 = vpop.f32.mrb[90].mxu0  ;;  %v13815_v28 = vld [vmem:[#allocation13_spill] sm:$0xff] }
 0xbf4   :  { %v4651_v52 = vadd.f32 1.0, %v10429_v24  ;;  %10442 = vtanh.f32 %v9431_v63  ;;  %v9433_v41 = vadd.f32 %v8821_v33, %v13802_v57  ;;  %v4592_v37 = vpop.f32.mrb[91].mxu0  ;;  %v13816_v24 = vld [vmem:[#allocation14_spill] sm:$0xff] }
 0xbf5   :  { %10444 = vrcp.f32 %v4652_v46  ;;  %v9434_v23 = vadd.f32 %v4592_v37, %v13814_v6  ;;  %v13817_v37 = vld [vmem:[#allocation17_spill] sm:$0xff] }
 0xbf6   :  { %v10431_v25 = vpop.eup %10430  ;;  %10446 = vrcp.f32 %v4651_v52 }
 0xbf7   :  { %v10433_v20 = vpop.eup %10432  ;;  %v4674_v42 = vadd.f32 1.0, %v10431_v25  ;;  %10448 = vtanh.f32 %v9432_v32  ;;  %v8824_v18 = vpop.f32.mrb[92].mxu0 }
 0xbf8   :  { %v4673_v39 = vadd.f32 1.0, %v10433_v20  ;;  %10450 = vtanh.f32 %v9433_v41  ;;  %v9435_v48 = vadd.f32 %v8824_v18, %v13815_v28  ;;  %v4602_v34 = vpop.f32.mrb[93].mxu0 }
 0xbf9   :  { %10452 = vrcp.f32 %v4674_v42  ;;  %v9436_v63 = vadd.f32 %v4602_v34, %v13816_v24 }
 0xbfa   :  { %v10435_v38 = vpop.eup %10434  ;;  %10454 = vrcp.f32 %v4673_v39  ;;  %v7364_v33 = vmul.f32 -1.442695, %v9435_v48 }
 0xbfb   :  { %v10437_v46 = vpop.eup %10436  ;;  %v4676_v57 = vadd.f32 1.0, %v10435_v38  ;;  %10456 = vtanh.f32 %v9434_v23  ;;  %v7363_v52 = vmul.f32 -1.442695, %v9436_v63  ;;  %v8827_v25 = vpop.f32.mrb[94].mxu0 }
 0xbfc   :  { %v10439_v32 = vpop.eup %10438  ;;  %10458 = vpow2.f32 %v7364_v33  ;;  %v9437_v6 = vadd.f32 %v8827_v25, %v13817_v37  ;;  %v4612_v20 = vpop.f32.mrb[95].mxu0 }
 0xbfd   :  { %v10441_v41 = vpop.eup %10440  ;;  %10460 = vrcp.f32 %v4676_v57  ;;  %v9438_v18 = vadd.f32 %v4612_v20, %v13757_v49 }
 0xbfe   :  { %v10443_v42 = vpop.eup %10442  ;;  %v4675_v28 = vadd.f32 1.0, %v10441_v41  ;;  %10462 = vpow2.f32 %v7363_v52  ;;  %v7366_v34 = vmul.f32 -1.442695, %v9437_v6 }
 0xbff   :  { %v10445_v39 = vpop.eup %10444  ;;  %v4718_v48 = vmul.f32 %v10443_v42, %v10437_v46  ;;  %v7365_v24 = vmul.f32 -1.442695, %v9438_v18 }
 0xc00   :  { %v10447_v38 = vpop.eup %10446  ;;  %10464 = vrcp.f32 %v4675_v28 }
 0xc01   :  { %v10449_v23 = vpop.eup %10448  ;;  %10466 = vpow2.f32 %v7366_v34 }
 0xc02   :  { %v10451_v63 = vpop.eup %10450  ;;  %v4717_v33 = vmul.f32 %v10449_v23, %v10439_v32  ;;  %10468 = vpow2.f32 %v7365_v24 }
 0xc03   :  { %v10453_v25 = vpop.eup %10452  ;;  %v4720_v37 = vmul.f32 %v10451_v63, %v10445_v39 }
 0xc04   :  { %v10455_v29 = vpop.eup %10454  ;;  %v4714_v57 = vmul.f32 %v10453_v25, %v12847_v36 }
 0xc05   :  { %v10457_v20 = vpop.eup %10456  ;;  %v4713_v41 = vmul.f32 %v10455_v29, %v12849_v5 }
 0xc06   :  { %v10459_v52 = vpop.eup %10458  ;;  %v12946_v6 = vadd.f32 %v4718_v48, %v4714_v57  ;;  %v4719_v46 = vmul.f32 %v10457_v20, %v10447_v38 }
 0xc07   :  { %v10461_v18 = vpop.eup %10460  ;;  %v12948_v42 = vadd.f32 %v4717_v33, %v4713_v41  ;;  %v4702_v28 = vadd.f32 1.0, %v10459_v52 }
 0xc08   :  { %v10463_v34 = vpop.eup %10462  ;;  %v4716_v32 = vmul.f32 %v10461_v18, %v12854_v22  ;;  %10470 = vtanh.f32 %v12946_v6 }
 0xc09   :  { %10472 = vtanh.f32 %v12948_v42  ;;  %v4701_v24 = vadd.f32 1.0, %v10463_v34 }
 0xc0a   :  { %v10465_v36 = vpop.eup %10464  ;;  %v12953_v39 = vadd.f32 %v4720_v37, %v4716_v32  ;;  %10474 = vrcp.f32 %v4702_v28 }
 0xc0b   :  { %v10467_v29 = vpop.eup %10466  ;;  %v4715_v5 = vmul.f32 %v10465_v36, %v12858_v14  ;;  %10476 = vrcp.f32 %v4701_v24  ;;  %v13820_v24 = vld [vmem:[#allocation11_spill] sm:$0xff] }
 0xc0c   :  { %v10469_v48 = vpop.eup %10468  ;;  %10478 = vtanh.f32 %v12953_v39  ;;  %v4704_v38 = vadd.f32 1.0, %v10467_v29 }
 0xc0d   :  { %v12957_v23 = vadd.f32 %v4719_v46, %v4715_v5  ;;  %v4703_v22 = vadd.f32 1.0, %v10469_v48 }
 0xc0e   :  { %10480 = vrcp.f32 %v4704_v38 }
 0xc0f   :  { %10482 = vtanh.f32 %v12957_v23 }
 0xc10   :  { %10484 = vrcp.f32 %v4703_v22  ;;  %v13821_v22 = vld [vmem:[#allocation12_spill] sm:$0xff] }
 0xc12   :  { %v10471_v63 = vpop.eup %10470 }
 0xc13   :  { %v10473_v33 = vpop.eup %10472 }
 0xc14   :  { %v10475_v37 = vpop.eup %10474 }
 0xc15   :  { %v10477_v25 = vpop.eup %10476  ;;  %v4730_v57 = vmul.f32 %v10475_v37, %v10471_v63 }
 0xc16   :  { %v10479_v20 = vpop.eup %10478  ;;  %v4729_v41 = vmul.f32 %v10477_v25, %v10473_v33  ;;  %v13822_v25 = vld [vmem:[#allocation15_spill] sm:$0xff] }
 0xc18   :  { %v10481_v14 = vpop.eup %10480  ;;  %v9217_v52 = vpack.c.bf16 %v4730_v57, %v4729_v41 }
 0xc19   :  { %v10483_v18 = vpop.eup %10482  ;;  %v4732_v28 = vmul.f32 %v10481_v14, %v10479_v20 }
 0xc1a   :  { %v10485_v34 = vpop.eup %10484  ;;  %9218 = vmatprep.subr.bf16.mxu1 %v9217_v52 }
 0xc1b   :  { %9220 = vmatpush3.bf16.msra.mxu1 %v9217_v52  ;;  %v4731_v46 = vmul.f32 %v10485_v34, %v10483_v18  ;;  %v13823_v18 = vld [vmem:[#allocation16_spill] sm:$0xff] }
 0xc1d   :  { %v9221_v32 = vpack.c.bf16 %v4732_v28, %v4731_v46 }
 0xc1f   :  { %9222 = vmatprep.subr.bf16.mxu1 %v9221_v32 }
 0xc20   :  { %9224 = vmatpush3.bf16.msra.mxu1 %v9221_v32  ;;  %v13824_v32 = vld [vmem:[#allocation13_spill] sm:$0xff] }
 0xc23   :  { %8863 = vmatmul.mubr.msk.f32.vlgmr.msra.gmra.mrb[80].mxu1 %vm387_vm2, %v12605_v31  ;;  %v7412_v31 = vld [vmem:[%s13644_s0 + $0x60] sm:$0xff] }
 0xc24   :  { %8865 = vmatprep.mubr.msk.f32.mxu1 %vm387_vm2, %v12612_v62  ;;  %8886 = vmatprep.subr.mxu0 %v7412_v31 }
 0xc25   :  { %8887 = vmatpush3.msra.mxu0 %v7412_v31 }
 0xc26   :  { %8889 = vmatmul.mubr.msk.f32.vlgmr.msra.gmra.mrb[96].mxu0 %vm193_vm0, %v12720_v60 }
 0xc27   :  { %8866 = vmatmul.mubr.msk.f32.gmra.mrb[82].mxu1 %vm387_vm2, %v12619_v10  ;;  %8891 = vmatprep.mubr.msk.f32.mxu0 %vm193_vm0, %v12727_v2 }
 0xc28   :  { %8868 = vmatprep.mubr.msk.f32.mxu1 %vm387_vm2, %v12626_v27 }
 0xc2a   :  { %8892 = vmatmul.mubr.msk.f32.gmra.mrb[98].mxu0 %vm193_vm0, %v12734_v61 }
 0xc2b   :  { %8869 = vmatmul.mubr.msk.f32.gmra.mrb[84].mxu1 %vm387_vm2, %v12633_v19  ;;  %8894 = vmatprep.mubr.msk.f32.mxu0 %vm193_vm0, %v12741_v58 }
 0xc2c   :  { %8871 = vmatprep.mubr.msk.f32.mxu1 %vm387_vm2, %v12640_v13 }
 0xc2e   :  { %8895 = vmatmul.mubr.msk.f32.gmra.mrb[100].mxu0 %vm193_vm0, %v12748_v26 }
 0xc2f   :  { %8872 = vmatmul.mubr.msk.f32.gmra.mrb[86].mxu1 %vm387_vm2, %v12647_v21  ;;  %8897 = vmatprep.mubr.msk.f32.mxu0 %vm193_vm0, %v12755_v54 }
 0xc30   :  { %8874 = vmatprep.mubr.msk.f32.mxu1 %vm387_vm2, %v12654_v30 }
 0xc32   :  { %8898 = vmatmul.mubr.msk.f32.gmra.mrb[102].mxu0 %vm193_vm0, %v12762_v53 }
 0xc33   :  { %8875 = vmatmul.mubr.msk.f32.gmra.mrb[88].mxu1 %vm387_vm2, %v12661_v12  ;;  %8900 = vmatprep.mubr.msk.f32.mxu0 %vm193_vm0, %v12769_v40  ;;  %v13819_v40 = vld [vmem:[#allocation10_spill] sm:$0xff] }
 0xc34   :  { %8877 = vmatprep.mubr.msk.f32.mxu1 %vm387_vm2, %v12668_v17 }
 0xc36   :  { %8901 = vmatmul.mubr.msk.f32.gmra.mrb[104].mxu0 %vm193_vm0, %v12776_v59 }
 0xc37   :  { %8878 = vmatmul.mubr.msk.f32.gmra.mrb[90].mxu1 %vm387_vm2, %v12675_v9  ;;  %8903 = vmatprep.mubr.msk.f32.mxu0 %vm193_vm0, %v12783_v51 }
 0xc38   :  { %8880 = vmatprep.mubr.msk.f32.mxu1 %vm387_vm2, %v12682_v0 }
 0xc3a   :  { %8904 = vmatmul.mubr.msk.f32.gmra.mrb[106].mxu0 %vm193_vm0, %v12790_v56 }
 0xc3b   :  { %8881 = vmatmul.mubr.msk.f32.gmra.mrb[92].mxu1 %vm387_vm2, %v12689_v35  ;;  %8906 = vmatprep.mubr.msk.f32.mxu0 %vm193_vm0, %v12797_v1 }
 0xc3c   :  { %8883 = vmatprep.mubr.msk.f32.mxu1 %vm387_vm2, %v12696_v7 }
 0xc3e   :  { %8907 = vmatmul.mubr.msk.f32.gmra.mrb[108].mxu0 %vm193_vm0, %v12804_v3 }
 0xc3f   :  { %8884 = vmatmul.mubr.msk.f32.gmra.mrb[94].mxu1 %vm387_vm2, %v12703_v4  ;;  %8909 = vmatprep.mubr.msk.f32.mxu0 %vm193_vm0, %v12811_v44  ;;  %v13818_v4 = vld [vmem:[#allocation7_spill] sm:$0xff] }
 0xc40   :  { %8946 = vmatprep.mubr.msk.f32.mxu1 %vm193_vm0, %v12710_v55 }
 0xc42   :  { %8910 = vmatmul.mubr.msk.f32.gmra.mrb[110].mxu0 %vm193_vm0, %v13809_v50 }
 0xc43   :  { %8920 = vmatprep.mubr.msk.f32.mxu0 %vm387_vm2, %v13810_v43 }
 0xcf6   :  { %v8864_v62 = vpop.f32.mrb[80].mxu1 }
 0xcf7   :  { %v9439_v10 = vadd.f32 %v8864_v62, %v11424_v11  ;;  %v4946_v27 = vpop.f32.mrb[81].mxu1 }
 0xcf8   :  { %v9440_v19 = vadd.f32 %v4946_v27, %v13811_v45 }
 0xcf9   :  { %v7401_v13 = vmul.f32 -1.442695, %v9439_v10  ;;  %v13825_v10 = vld [vmem:[#allocation14_spill] sm:$0xff] }
 0xcfa   :  { %v7400_v21 = vmul.f32 -1.442695, %v9440_v19  ;;  %v8867_v30 = vpop.f32.mrb[82].mxu1 }
 0xcfb   :  { %10486 = vpow2.f32 %v7401_v13  ;;  %v9441_v12 = vadd.f32 %v8867_v30, %v11426_v15  ;;  %v4956_v17 = vpop.f32.mrb[83].mxu1 }
 0xcfc   :  { %10488 = vpow2.f32 %v7400_v21  ;;  %v9442_v9 = vadd.f32 %v4956_v17, %v13812_v16 }
 0xcfd   :  { %v7403_v0 = vmul.f32 -1.442695, %v9441_v12 }
 0xcfe   :  { %v7402_v35 = vmul.f32 -1.442695, %v9442_v9  ;;  %v8870_v7 = vpop.f32.mrb[84].mxu1 }
 0xcff   :  { %10490 = vpow2.f32 %v7403_v0  ;;  %v9443_v55 = vadd.f32 %v8870_v7, %v13818_v4  ;;  %v4966_v60 = vpop.f32.mrb[85].mxu1  ;;  %v13826_v0 = vld [vmem:[#allocation17_spill] sm:$0xff] }
 0xd00   :  { %10492 = vpow2.f32 %v7402_v35  ;;  %v9444_v2 = vadd.f32 %v4966_v60, %v11418_v8 }
 0xd01   :  { %v7405_v61 = vmul.f32 -1.442695, %v9443_v55 }
 0xd02   :  { %v7404_v58 = vmul.f32 -1.442695, %v9444_v2  ;;  %v8873_v26 = vpop.f32.mrb[86].mxu1 }
 0xd03   :  { %10494 = vpow2.f32 %v7405_v61  ;;  %v9445_v54 = vadd.f32 %v8873_v26, %v13758_v47  ;;  %v4976_v53 = vpop.f32.mrb[87].mxu1 }
 0xd04   :  { %10496 = vpow2.f32 %v7404_v58  ;;  %v9446_v59 = vadd.f32 %v4976_v53, %v13819_v40 }
 0xd05   :  { %v10487_v51 = vpop.eup %10486  ;;  %v7407_v56 = vmul.f32 -1.442695, %v9445_v54 }
 0xd06   :  { %v10489_v1 = vpop.eup %10488  ;;  %v5054_v3 = vadd.f32 1.0, %v10487_v51  ;;  %v7406_v44 = vmul.f32 -1.442695, %v9446_v59  ;;  %v8876_v50 = vpop.f32.mrb[88].mxu1 }
 0xd07   :  { %v5053_v43 = vadd.f32 1.0, %v10489_v1  ;;  %10498 = vpow2.f32 %v7407_v56  ;;  %v9447_v36 = vadd.f32 %v8876_v50, %v13820_v24  ;;  %v4986_v29 = vpop.f32.mrb[89].mxu1 }
 0xd08   :  { %10500 = vrcp.f32 %v5054_v3  ;;  %v9448_v63 = vadd.f32 %v4986_v29, %v13821_v22 }
 0xd09   :  { %v10491_v5 = vpop.eup %10490  ;;  %10502 = vrcp.f32 %v5053_v43 }
 0xd0a   :  { %v10493_v48 = vpop.eup %10492  ;;  %v5056_v38 = vadd.f32 1.0, %v10491_v5  ;;  %10504 = vpow2.f32 %v7406_v44  ;;  %v8879_v33 = vpop.f32.mrb[90].mxu1 }
 0xd0b   :  { %v5055_v37 = vadd.f32 1.0, %v10493_v48  ;;  %10506 = vtanh.f32 %v9447_v36  ;;  %v9449_v57 = vadd.f32 %v8879_v33, %v13822_v25  ;;  %v4996_v20 = vpop.f32.mrb[91].mxu1 }
 0xd0c   :  { %10508 = vrcp.f32 %v5056_v38  ;;  %v9450_v28 = vadd.f32 %v4996_v20, %v13823_v18 }
 0xd0d   :  { %v10495_v41 = vpop.eup %10494  ;;  %10510 = vrcp.f32 %v5055_v37 }
 0xd0e   :  { %v10497_v14 = vpop.eup %10496  ;;  %v5078_v52 = vadd.f32 1.0, %v10495_v41  ;;  %10512 = vtanh.f32 %v9448_v63  ;;  %v8882_v34 = vpop.f32.mrb[92].mxu1 }
 0xd0f   :  { %v5077_v46 = vadd.f32 1.0, %v10497_v14  ;;  %10514 = vtanh.f32 %v9449_v57  ;;  %v9451_v31 = vadd.f32 %v8882_v34, %v13824_v32  ;;  %v5006_v62 = vpop.f32.mrb[93].mxu1 }
 0xd10   :  { %10516 = vrcp.f32 %v5078_v52  ;;  %v9452_v27 = vadd.f32 %v5006_v62, %v13825_v10 }
 0xd11   :  { %v10499_v19 = vpop.eup %10498  ;;  %10518 = vrcp.f32 %v5077_v46  ;;  %v7409_v13 = vmul.f32 -1.442695, %v9451_v31 }
 0xd12   :  { %v10501_v21 = vpop.eup %10500  ;;  %v5080_v30 = vadd.f32 1.0, %v10499_v19  ;;  %10520 = vtanh.f32 %v9450_v28  ;;  %v7408_v12 = vmul.f32 -1.442695, %v9452_v27  ;;  %v8885_v17 = vpop.f32.mrb[94].mxu1 }
 0xd13   :  { %v10503_v9 = vpop.eup %10502  ;;  %10522 = vpow2.f32 %v7409_v13  ;;  %v9453_v35 = vadd.f32 %v8885_v17, %v13826_v0  ;;  %v5016_v7 = vpop.f32.mrb[95].mxu1 }
 0xd14   :  { %v10505_v55 = vpop.eup %10504  ;;  %10524 = vrcp.f32 %v5080_v30  ;;  %v9454_v60 = vadd.f32 %v5016_v7, %v13757_v49 }
 0xd15   :  { %v10507_v2 = vpop.eup %10506  ;;  %v5079_v61 = vadd.f32 1.0, %v10505_v55  ;;  %10526 = vpow2.f32 %v7408_v12  ;;  %v7411_v58 = vmul.f32 -1.442695, %v9453_v35 }
 0xd16   :  { %v10509_v26 = vpop.eup %10508  ;;  %v5122_v54 = vmul.f32 %v10507_v2, %v10501_v21  ;;  %v7410_v53 = vmul.f32 -1.442695, %v9454_v60  ;;  %v13062_v60 = vld [vmem:[%s13649_s5 + $0x8] sm:$0xff]  ;;  %v13069_v2 = vld [vmem:[%s13649_s5 + $0x10] sm:$0xff] }
 0xd17   :  { %v10511_v59 = vpop.eup %10510  ;;  %10528 = vrcp.f32 %v5079_v61  ;;  %v13076_v61 = vld [vmem:[%s13649_s5 + $0x18] sm:$0xff] }
 0xd18   :  { %v10513_v51 = vpop.eup %10512  ;;  %10530 = vpow2.f32 %v7411_v58  ;;  %v13083_v58 = vld [vmem:[%s13649_s5 + $0x20] sm:$0xff] }
 0xd19   :  { %v10515_v56 = vpop.eup %10514  ;;  %v5121_v1 = vmul.f32 %v10513_v51, %v10503_v9  ;;  %10532 = vpow2.f32 %v7410_v53  ;;  %v13104_v53 = vld [vmem:[%s13649_s5 + $0x38] sm:$0xff]  ;;  %v13118_v51 = vld [vmem:[%s13649_s5 + $0x48] sm:$0xff] }
 0xd1a   :  { %v10517_v3 = vpop.eup %10516  ;;  %v5124_v44 = vmul.f32 %v10515_v56, %v10509_v26  ;;  %v13090_v26 = vld [vmem:[%s13649_s5 + $0x28] sm:$0xff]  ;;  %v13125_v56 = vld [vmem:[%s13649_s5 + $0x50] sm:$0xff] }
 0xd1b   :  { %v10519_v50 = vpop.eup %10518  ;;  %v5118_v43 = vmul.f32 %v10517_v3, %v12946_v6  ;;  %v13139_v3 = vld [vmem:[%s13649_s5 + $0x60] sm:$0xff] }
 0xd1c   :  { %v10521_v36 = vpop.eup %10520  ;;  %v5117_v29 = vmul.f32 %v10519_v50, %v12948_v42  ;;  %v13153_v50 = vld [vmem:[%s13649_s5 + $0x70] sm:$0xff] }
 0xd1d   :  { %v10523_v5 = vpop.eup %10522  ;;  %v13045_v48 = vadd.f32 %v5122_v54, %v5118_v43  ;;  %v5123_v38 = vmul.f32 %v10521_v36, %v10511_v59  ;;  %v13097_v54 = vld [vmem:[%s13649_s5 + $0x30] sm:$0xff]  ;;  %v13111_v59 = vld [vmem:[%s13649_s5 + $0x40] sm:$0xff]  ;;  %v13160_v43 = vld [vmem:[%s13649_s5 + $0x78] sm:$0xff] }
 0xd1e   :  { %v10525_v63 = vpop.eup %10524  ;;  %v13047_v33 = vadd.f32 %v5121_v1, %v5117_v29  ;;  %v5106_v37 = vadd.f32 1.0, %v10523_v5  ;;  %v13132_v1 = vld [vmem:[%s13649_s5 + $0x58] sm:$0xff]  ;;  %v13167_v36 = vld [vmem:[%s13647_s3] sm:$0xff]  ;;  %v7457_v29 = vld [vmem:[%s13644_s0 + $0x68] sm:$0xff] }
 0xd1f   :  { %v10527_v57 = vpop.eup %10526  ;;  %v5120_v20 = vmul.f32 %v10525_v63, %v12953_v39  ;;  %10534 = vtanh.f32 %v13045_v48  ;;  %8944 = vmatprep.subr.mxu1 %v7457_v29  ;;  %v13177_v5 = vld [vmem:[%s13647_s3 + $0x8] sm:$0xff]  ;;  %v13191_v63 = vld [vmem:[%s13647_s3 + $0x18] sm:$0xff] }
 0xd20   :  { %10536 = vtanh.f32 %v13047_v33  ;;  %v5105_v41 = vadd.f32 1.0, %v10527_v57  ;;  %8945 = vmatpush3.msra.mxu1 %v7457_v29  ;;  %v13205_v57 = vld [vmem:[%s13647_s3 + $0x28] sm:$0xff] }
 0xd21   :  { %v10529_v6 = vpop.eup %10528  ;;  %v13052_v14 = vadd.f32 %v5124_v44, %v5120_v20  ;;  %10538 = vrcp.f32 %v5106_v37  ;;  %v13146_v44 = vld [vmem:[%s13649_s5 + $0x68] sm:$0xff]  ;;  %8947 = vmatmul.mubr.msk.f32.vlgmr.msra.gmra.mrb[96].mxu1 %vm193_vm0, %v13177_v5  ;;  %v13198_v37 = vld [vmem:[%s13647_s3 + $0x20] sm:$0xff]  ;;  %v13212_v20 = vld [vmem:[%s13647_s3 + $0x30] sm:$0xff] }
 0xd22   :  { %v10531_v42 = vpop.eup %10530  ;;  %v5119_v52 = vmul.f32 %v10529_v6, %v12957_v23  ;;  %10540 = vrcp.f32 %v5105_v41  ;;  %v13219_v41 = vld [vmem:[%s13647_s3 + $0x38] sm:$0xff]  ;;  %v13226_v6 = vld [vmem:[%s13647_s3 + $0x40] sm:$0xff] }
 0xd23   :  { %v10533_v28 = vpop.eup %10532  ;;  %10542 = vtanh.f32 %v13052_v14  ;;  %v5108_v34 = vadd.f32 1.0, %v10531_v42  ;;  %v13233_v42 = vld [vmem:[%s13647_s3 + $0x48] sm:$0xff] }
 0xd24   :  { %v13056_v46 = vadd.f32 %v5123_v38, %v5119_v52  ;;  %v5107_v39 = vadd.f32 1.0, %v10533_v28  ;;  %v13184_v38 = vld [vmem:[%s13647_s3 + $0x10] sm:$0xff]  ;;  %v13247_v28 = vld [vmem:[%s13647_s3 + $0x58] sm:$0xff] }
 0xd25   :  { %10544 = vrcp.f32 %v5108_v34  ;;  %8949 = vmatprep.mubr.msk.f32.mxu1 %vm193_vm0, %v13184_v38  ;;  %v13240_v52 = vld [vmem:[%s13647_s3 + $0x50] sm:$0xff]  ;;  %v13254_v34 = vld [vmem:[%s13647_s3 + $0x60] sm:$0xff] }
 0xd26   :  { %10546 = vtanh.f32 %v13056_v46  ;;  %8950 = vmatmul.mubr.msk.f32.gmra.mrb[98].mxu1 %vm193_vm0, %v13191_v63 }
 0xd27   :  { %10548 = vrcp.f32 %v5107_v39  ;;  %8952 = vmatprep.mubr.msk.f32.mxu1 %vm193_vm0, %v13198_v37  ;;  %v13261_v39 = vld [vmem:[%s13647_s3 + $0x68] sm:$0xff] }
 0xd29   :  { %v10535_v31 = vpop.eup %10534 }
 0xd2a   :  { %v10537_v62 = vpop.eup %10536  ;;  %8953 = vmatmul.mubr.msk.f32.gmra.mrb[100].mxu1 %vm193_vm0, %v13205_v57 }
 0xd2b   :  { %v10539_v27 = vpop.eup %10538  ;;  %8955 = vmatprep.mubr.msk.f32.mxu1 %vm193_vm0, %v13212_v20 }
 0xd2c   :  { %v10541_v19 = vpop.eup %10540  ;;  %v5134_v13 = vmul.f32 %v10539_v27, %v10535_v31  ;;  %v13268_v31 = vld [vmem:[%s13647_s3 + $0x70] sm:$0xff]  ;;  %v13282_v27 = vld [vmem:[%s13649_s5] sm:$0xff] }
 0xd2d   :  { %v10543_v21 = vpop.eup %10542  ;;  %v5133_v30 = vmul.f32 %v10541_v19, %v10537_v62  ;;  %v13275_v62 = vld [vmem:[%s13647_s3 + $0x78] sm:$0xff]  ;;  %13828 = vst [vmem:[#allocation9_spill] sm:$0xff] %v13282_v27  ;;  %s10953_s3 = scalar_lea.vmem %s6858_s7, 32 }
 0xd2e   :  { %8956 = vmatmul.mubr.msk.f32.gmra.mrb[102].mxu1 %vm193_vm0, %v13219_v41  ;;  %13827 = vst [vmem:[#allocation18_spill] sm:$0xff] %v13275_v62 }
 0xd2f   :  { %v10545_v23 = vpop.eup %10544  ;;  %v9225_v12 = vpack.c.bf16 %v5134_v13, %v5133_v30  ;;  %8958 = vmatprep.mubr.msk.f32.mxu1 %vm193_vm0, %v13226_v6 }
 0xd30   :  { %v10547_v17 = vpop.eup %10546  ;;  %v5136_v9 = vmul.f32 %v10545_v23, %v10543_v21 }
 0xd31   :  { %v10549_v35 = vpop.eup %10548  ;;  %9226 = vmatprep.subr.bf16.mxu0 %v9225_v12 }
 0xd32   :  { %9228 = vmatpush3.bf16.msra.mxu0 %v9225_v12  ;;  %v5135_v7 = vmul.f32 %v10549_v35, %v10547_v17  ;;  %8959 = vmatmul.mubr.msk.f32.gmra.mrb[104].mxu1 %vm193_vm0, %v13233_v42 }
 0xd33   :  { %8961 = vmatprep.mubr.msk.f32.mxu1 %vm193_vm0, %v13240_v52 }
 0xd34   :  { %v9229_v55 = vpack.c.bf16 %v5136_v9, %v5135_v7 }
 0xd36   :  { %9230 = vmatprep.subr.bf16.mxu0 %v9229_v55  ;;  %8962 = vmatmul.mubr.msk.f32.gmra.mrb[106].mxu1 %vm193_vm0, %v13247_v28 }
 0xd37   :  { %9232 = vmatpush3.bf16.msra.mxu0 %v9229_v55  ;;  %8964 = vmatprep.mubr.msk.f32.mxu1 %vm193_vm0, %v13254_v34 }
 0xd3a   :  { %8921 = vmatmul.mubr.msk.f32.vlgmr.msra.gmra.mrb[96].mxu0 %vm387_vm2, %v13062_v60  ;;  %8965 = vmatmul.mubr.msk.f32.gmra.mrb[108].mxu1 %vm193_vm0, %v13261_v39 }
 0xd3b   :  { %8923 = vmatprep.mubr.msk.f32.mxu0 %vm387_vm2, %v13069_v2  ;;  %8967 = vmatprep.mubr.msk.f32.mxu1 %vm193_vm0, %v13268_v31 }
 0xd3e   :  { %8924 = vmatmul.mubr.msk.f32.gmra.mrb[98].mxu0 %vm387_vm2, %v13076_v61  ;;  %8968 = vmatmul.mubr.msk.f32.gmra.mrb[110].mxu1 %vm193_vm0, %v13275_v62 }
 0xd3f   :  { %8926 = vmatprep.mubr.msk.f32.mxu0 %vm387_vm2, %v13083_v58  ;;  %8978 = vmatprep.mubr.msk.f32.mxu1 %vm387_vm2, %v13282_v27 }
 0xd42   :  { %8927 = vmatmul.mubr.msk.f32.gmra.mrb[100].mxu0 %vm387_vm2, %v13090_v26 }
 0xd43   :  { %8929 = vmatprep.mubr.msk.f32.mxu0 %vm387_vm2, %v13097_v54 }
 0xd46   :  { %8930 = vmatmul.mubr.msk.f32.gmra.mrb[102].mxu0 %vm387_vm2, %v13104_v53 }
 0xd47   :  { %8932 = vmatprep.mubr.msk.f32.mxu0 %vm387_vm2, %v13111_v59 }
 0xd4a   :  { %8933 = vmatmul.mubr.msk.f32.gmra.mrb[104].mxu0 %vm387_vm2, %v13118_v51 }
 0xd4b   :  { %8935 = vmatprep.mubr.msk.f32.mxu0 %vm387_vm2, %v13125_v56 }
 0xd4e   :  { %8936 = vmatmul.mubr.msk.f32.gmra.mrb[106].mxu0 %vm387_vm2, %v13132_v1 }
 0xd4f   :  { %8938 = vmatprep.mubr.msk.f32.mxu0 %vm387_vm2, %v13139_v3 }
 0xd52   :  { %8939 = vmatmul.mubr.msk.f32.gmra.mrb[108].mxu0 %vm387_vm2, %v13146_v44 }
 0xd53   :  { %8941 = vmatprep.mubr.msk.f32.mxu0 %vm387_vm2, %v13153_v50 }
 0xd56   :  { %8942 = vmatmul.mubr.msk.f32.gmra.mrb[110].mxu0 %vm387_vm2, %v13160_v43 }
 0xd57   :  { %9004 = vmatprep.mubr.msk.f32.mxu0 %vm193_vm0, %v13167_v36 }
 0xe0d   :  { %v8922_v19 = vpop.f32.mrb[96].mxu0 }
 0xe0e   :  { %v9455_v13 = vadd.f32 %v8922_v19, %v11424_v11  ;;  %v5350_v21 = vpop.f32.mrb[97].mxu0 }
 0xe0f   :  { %v9456_v30 = vadd.f32 %v5350_v21, %v13811_v45 }
 0xe10   :  { %v7446_v23 = vmul.f32 -1.442695, %v9455_v13 }
 0xe11   :  { %v7445_v12 = vmul.f32 -1.442695, %v9456_v30  ;;  %v8925_v17 = vpop.f32.mrb[98].mxu0 }
 0xe12   :  { %10550 = vpow2.f32 %v7446_v23  ;;  %v9457_v9 = vadd.f32 %v8925_v17, %v11426_v15  ;;  %v5360_v35 = vpop.f32.mrb[99].mxu0 }
 0xe13   :  { %10552 = vpow2.f32 %v7445_v12  ;;  %v9458_v7 = vadd.f32 %v5360_v35, %v13812_v16 }
 0xe14   :  { %v7448_v55 = vmul.f32 -1.442695, %v9457_v9 }
 0xe15   :  { %v7447_v29 = vmul.f32 -1.442695, %v9458_v7  ;;  %v8928_v62 = vpop.f32.mrb[100].mxu0 }
 0xe16   :  { %10554 = vpow2.f32 %v7448_v55  ;;  %v9459_v27 = vadd.f32 %v8928_v62, %v13818_v4  ;;  %v5370_v19 = vpop.f32.mrb[101].mxu0 }
 0xe17   :  { %10556 = vpow2.f32 %v7447_v29  ;;  %v9460_v21 = vadd.f32 %v5370_v19, %v11418_v8 }
 0xe18   :  { %v7450_v13 = vmul.f32 -1.442695, %v9459_v27 }
 0xe19   :  { %v7449_v30 = vmul.f32 -1.442695, %v9460_v21  ;;  %v8931_v45 = vpop.f32.mrb[102].mxu0 }
 0xe1a   :  { %10558 = vpow2.f32 %v7450_v13  ;;  %v9461_v23 = vadd.f32 %v8931_v45, %v13758_v47  ;;  %v5380_v17 = vpop.f32.mrb[103].mxu0 }
 0xe1b   :  { %10560 = vpow2.f32 %v7449_v30  ;;  %v9462_v12 = vadd.f32 %v5380_v17, %v13819_v40 }
 0xe1c   :  { %v10551_v9 = vpop.eup %10550  ;;  %v7452_v35 = vmul.f32 -1.442695, %v9461_v23 }
 0xe1d   :  { %v10553_v7 = vpop.eup %10552  ;;  %v5458_v55 = vadd.f32 1.0, %v10551_v9  ;;  %v7451_v16 = vmul.f32 -1.442695, %v9462_v12  ;;  %v8934_v62 = vpop.f32.mrb[104].mxu0 }
 0xe1e   :  { %v5457_v4 = vadd.f32 1.0, %v10553_v7  ;;  %10562 = vpow2.f32 %v7452_v35  ;;  %v9463_v29 = vadd.f32 %v8934_v62, %v13820_v24  ;;  %v5390_v27 = vpop.f32.mrb[105].mxu0 }
 0xe1f   :  { %10564 = vrcp.f32 %v5458_v55  ;;  %v9464_v13 = vadd.f32 %v5390_v27, %v13821_v22 }
 0xe20   :  { %v10555_v19 = vpop.eup %10554  ;;  %10566 = vrcp.f32 %v5457_v4 }
 0xe21   :  { %v10557_v21 = vpop.eup %10556  ;;  %v5460_v45 = vadd.f32 1.0, %v10555_v19  ;;  %10568 = vpow2.f32 %v7451_v16  ;;  %v8937_v30 = vpop.f32.mrb[106].mxu0 }
 0xe22   :  { %v5459_v17 = vadd.f32 1.0, %v10557_v21  ;;  %10570 = vtanh.f32 %v9463_v29  ;;  %v9465_v23 = vadd.f32 %v8937_v30, %v13822_v25  ;;  %v5400_v12 = vpop.f32.mrb[107].mxu0 }
 0xe23   :  { %10572 = vrcp.f32 %v5460_v45  ;;  %v9466_v55 = vadd.f32 %v5400_v12, %v13823_v18 }
 0xe24   :  { %v10559_v9 = vpop.eup %10558  ;;  %10574 = vrcp.f32 %v5459_v17 }
 0xe25   :  { %v10561_v35 = vpop.eup %10560  ;;  %v5482_v7 = vadd.f32 1.0, %v10559_v9  ;;  %10576 = vtanh.f32 %v9464_v13  ;;  %v8940_v4 = vpop.f32.mrb[108].mxu0 }
 0xe26   :  { %v5481_v62 = vadd.f32 1.0, %v10561_v35  ;;  %10578 = vtanh.f32 %v9465_v23  ;;  %v9467_v16 = vadd.f32 %v8940_v4, %v13824_v32  ;;  %v5410_v27 = vpop.f32.mrb[109].mxu0 }
 0xe27   :  { %10580 = vrcp.f32 %v5482_v7  ;;  %v9468_v29 = vadd.f32 %v5410_v27, %v13825_v10 }
 0xe28   :  { %v10563_v19 = vpop.eup %10562  ;;  %10582 = vrcp.f32 %v5481_v62  ;;  %v7454_v21 = vmul.f32 -1.442695, %v9467_v16 }
 0xe29   :  { %v10565_v45 = vpop.eup %10564  ;;  %v5484_v30 = vadd.f32 1.0, %v10563_v19  ;;  %10584 = vtanh.f32 %v9466_v55  ;;  %v7453_v17 = vmul.f32 -1.442695, %v9468_v29  ;;  %v8943_v9 = vpop.f32.mrb[110].mxu0 }
 0xe2a   :  { %v10567_v13 = vpop.eup %10566  ;;  %10586 = vpow2.f32 %v7454_v21  ;;  %v9469_v12 = vadd.f32 %v8943_v9, %v13826_v0  ;;  %v5420_v35 = vpop.f32.mrb[111].mxu0 }
 0xe2b   :  { %v10569_v23 = vpop.eup %10568  ;;  %10588 = vrcp.f32 %v5484_v30  ;;  %v9470_v4 = vadd.f32 %v5420_v35, %v13757_v49 }
 0xe2c   :  { %v10571_v7 = vpop.eup %10570  ;;  %v5483_v32 = vadd.f32 1.0, %v10569_v23  ;;  %10590 = vpow2.f32 %v7453_v17  ;;  %v7456_v27 = vmul.f32 -1.442695, %v9469_v12 }
 0xe2d   :  { %v10573_v62 = vpop.eup %10572  ;;  %v5526_v16 = vmul.f32 %v10571_v7, %v10565_v45  ;;  %v7455_v10 = vmul.f32 -1.442695, %v9470_v4 }
 0xe2e   :  { %v10575_v19 = vpop.eup %10574  ;;  %10592 = vrcp.f32 %v5483_v32 }
 0xe2f   :  { %v10577_v55 = vpop.eup %10576  ;;  %10594 = vpow2.f32 %v7456_v27 }
 0xe30   :  { %v10579_v29 = vpop.eup %10578  ;;  %v5525_v21 = vmul.f32 %v10577_v55, %v10567_v13  ;;  %10596 = vpow2.f32 %v7455_v10 }
 0xe31   :  { %v10581_v9 = vpop.eup %10580  ;;  %v5528_v0 = vmul.f32 %v10579_v29, %v10573_v62 }
 0xe32   :  { %v10583_v18 = vpop.eup %10582  ;;  %v5522_v30 = vmul.f32 %v10581_v9, %v13045_v48 }
 0xe33   :  { %v10585_v35 = vpop.eup %10584  ;;  %v5521_v23 = vmul.f32 %v10583_v18, %v13047_v33 }
 0xe34   :  { %v10587_v17 = vpop.eup %10586  ;;  %v13304_v12 = vadd.f32 %v5526_v16, %v5522_v30  ;;  %v5527_v45 = vmul.f32 %v10585_v35, %v10575_v19 }
 0xe35   :  { %v10589_v4 = vpop.eup %10588  ;;  %v13306_v7 = vadd.f32 %v5525_v21, %v5521_v23  ;;  %v5510_v32 = vadd.f32 1.0, %v10587_v17 }
 0xe36   :  { %v10591_v27 = vpop.eup %10590  ;;  %v5524_v13 = vmul.f32 %v10589_v4, %v13052_v14  ;;  %10598 = vtanh.f32 %v13304_v12 }
 0xe37   :  { %10600 = vtanh.f32 %v13306_v7  ;;  %v5509_v10 = vadd.f32 1.0, %v10591_v27 }
 0xe38   :  { %v10593_v48 = vpop.eup %10592  ;;  %v13311_v62 = vadd.f32 %v5528_v0, %v5524_v13  ;;  %10602 = vrcp.f32 %v5510_v32 }
 0xe39   :  { %v10595_v18 = vpop.eup %10594  ;;  %v5523_v33 = vmul.f32 %v10593_v48, %v13056_v46  ;;  %10604 = vrcp.f32 %v5509_v10  ;;  %v7502_v10 = vld [vmem:[%s13644_s0 + $0x70] sm:$0xff]  ;;  %v13830_v48 = vld [vmem:[#allocation9_spill] sm:$0xff] }
 0xe3a   :  { %v10597_v16 = vpop.eup %10596  ;;  %10606 = vtanh.f32 %v13311_v62  ;;  %v5512_v19 = vadd.f32 1.0, %v10595_v18  ;;  %9002 = vmatprep.subr.mxu0 %v7502_v10 }
 0xe3b   :  { %v13315_v55 = vadd.f32 %v5527_v45, %v5523_v33  ;;  %v5511_v14 = vadd.f32 1.0, %v10597_v16  ;;  %9003 = vmatpush3.msra.mxu0 %v7502_v10 }
 0xe3c   :  { %10608 = vrcp.f32 %v5512_v19  ;;  %9005 = vmatmul.mubr.msk.f32.vlgmr.msra.gmra.mrb[112].mxu0 %vm193_vm0, %v13177_v5  ;;  %v13831_v19 = vld [vmem:[#allocation6_spill] sm:$0xff] }
 0xe3d   :  { %10610 = vtanh.f32 %v13315_v55  ;;  %9007 = vmatprep.mubr.msk.f32.mxu0 %vm193_vm0, %v13184_v38 }
 0xe3e   :  { %10612 = vrcp.f32 %v5511_v14 }
 0xe40   :  { %v10599_v29 = vpop.eup %10598  ;;  %9008 = vmatmul.mubr.msk.f32.gmra.mrb[114].mxu0 %vm193_vm0, %v13191_v63 }
 0xe41   :  { %v10601_v21 = vpop.eup %10600  ;;  %9010 = vmatprep.mubr.msk.f32.mxu0 %vm193_vm0, %v13198_v37 }
 0xe42   :  { %v10603_v0 = vpop.eup %10602 }
 0xe43   :  { %v10605_v9 = vpop.eup %10604  ;;  %v5538_v30 = vmul.f32 %v10603_v0, %v10599_v29 }
 0xe44   :  { %v10607_v35 = vpop.eup %10606  ;;  %v5537_v23 = vmul.f32 %v10605_v9, %v10601_v21  ;;  %9011 = vmatmul.mubr.msk.f32.gmra.mrb[116].mxu0 %vm193_vm0, %v13205_v57 }
 0xe45   :  { %9013 = vmatprep.mubr.msk.f32.mxu0 %vm193_vm0, %v13212_v20 }
 0xe46   :  { %v10609_v46 = vpop.eup %10608  ;;  %v9233_v17 = vpack.c.bf16 %v5538_v30, %v5537_v23 }
 0xe47   :  { %v10611_v4 = vpop.eup %10610  ;;  %v5540_v32 = vmul.f32 %v10609_v46, %v10607_v35  ;;  %v13832_v35 = vld [vmem:[#allocation8_spill] sm:$0xff] }
 0xe48   :  { %v10613_v27 = vpop.eup %10612  ;;  %9234 = vmatprep.subr.bf16.mxu1 %v9233_v17  ;;  %9014 = vmatmul.mubr.msk.f32.gmra.mrb[118].mxu0 %vm193_vm0, %v13219_v41 }
 0xe49   :  { %9236 = vmatpush3.bf16.msra.mxu1 %v9233_v17  ;;  %v5539_v45 = vmul.f32 %v10613_v27, %v10611_v4  ;;  %9016 = vmatprep.mubr.msk.f32.mxu0 %vm193_vm0, %v13226_v6 }
 0xe4b   :  { %v9237_v13 = vpack.c.bf16 %v5540_v32, %v5539_v45  ;;  %v13833_v32 = vld [vmem:[#allocation7_spill] sm:$0xff] }
 0xe4c   :  { %9017 = vmatmul.mubr.msk.f32.gmra.mrb[120].mxu0 %vm193_vm0, %v13233_v42 }
 0xe4d   :  { %9238 = vmatprep.subr.bf16.mxu1 %v9237_v13  ;;  %9019 = vmatprep.mubr.msk.f32.mxu0 %vm193_vm0, %v13240_v52 }
 0xe4e   :  { %9240 = vmatpush3.bf16.msra.mxu1 %v9237_v13 }
 0xe50   :  { %9020 = vmatmul.mubr.msk.f32.gmra.mrb[122].mxu0 %vm193_vm0, %v13247_v28 }
 0xe51   :  { %8979 = vmatmul.mubr.msk.f32.vlgmr.msra.gmra.mrb[96].mxu1 %vm387_vm2, %v13062_v60  ;;  %9022 = vmatprep.mubr.msk.f32.mxu0 %vm193_vm0, %v13254_v34 }
 0xe52   :  { %8981 = vmatprep.mubr.msk.f32.mxu1 %vm387_vm2, %v13069_v2 }
 0xe54   :  { %9023 = vmatmul.mubr.msk.f32.gmra.mrb[124].mxu0 %vm193_vm0, %v13261_v39 }
 0xe55   :  { %8982 = vmatmul.mubr.msk.f32.gmra.mrb[98].mxu1 %vm387_vm2, %v13076_v61  ;;  %9025 = vmatprep.mubr.msk.f32.mxu0 %vm193_vm0, %v13268_v31 }
 0xe56   :  { %8984 = vmatprep.mubr.msk.f32.mxu1 %vm387_vm2, %v13083_v58 }
 0xe59   :  { %8985 = vmatmul.mubr.msk.f32.gmra.mrb[100].mxu1 %vm387_vm2, %v13090_v26 }
 0xe5a   :  { %8987 = vmatprep.mubr.msk.f32.mxu1 %vm387_vm2, %v13097_v54 }
 0xe5d   :  { %8988 = vmatmul.mubr.msk.f32.gmra.mrb[102].mxu1 %vm387_vm2, %v13104_v53 }
 0xe5e   :  { %8990 = vmatprep.mubr.msk.f32.mxu1 %vm387_vm2, %v13111_v59 }
 0xe61   :  { %8991 = vmatmul.mubr.msk.f32.gmra.mrb[104].mxu1 %vm387_vm2, %v13118_v51 }
 0xe62   :  { %8993 = vmatprep.mubr.msk.f32.mxu1 %vm387_vm2, %v13125_v56 }
 0xe65   :  { %8994 = vmatmul.mubr.msk.f32.gmra.mrb[106].mxu1 %vm387_vm2, %v13132_v1 }
 0xe66   :  { %8996 = vmatprep.mubr.msk.f32.mxu1 %vm387_vm2, %v13139_v3 }
 0xe69   :  { %8997 = vmatmul.mubr.msk.f32.gmra.mrb[108].mxu1 %vm387_vm2, %v13146_v44 }
 0xe6a   :  { %8999 = vmatprep.mubr.msk.f32.mxu1 %vm387_vm2, %v13153_v50 }
 0xe6d   :  { %9000 = vmatmul.mubr.msk.f32.gmra.mrb[110].mxu1 %vm387_vm2, %v13160_v43 }
 0xe6e   :  { %9062 = vmatprep.mubr.msk.f32.mxu1 %vm193_vm0, %v13167_v36  ;;  %v13829_v36 = vld [vmem:[#allocation18_spill] sm:$0xff] }
 0xe6f   :  { %9026 = vmatmul.mubr.msk.f32.gmra.mrb[126].mxu0 %vm193_vm0, %v13829_v36 }
 0xe70   :  { %9036 = vmatprep.mubr.msk.f32.mxu0 %vm387_vm2, %v13830_v48 }
 0xf24   :  { %v8980_v18 = vpop.f32.mrb[96].mxu1 }
 0xf25   :  { %v9471_v33 = vadd.f32 %v8980_v18, %v11424_v11  ;;  %v5754_v16 = vpop.f32.mrb[97].mxu1 }
 0xf26   :  { %v9472_v14 = vadd.f32 %v5754_v16, %v13831_v19 }
 0xf27   :  { %v7491_v29 = vmul.f32 -1.442695, %v9471_v33 }
 0xf28   :  { %v7490_v21 = vmul.f32 -1.442695, %v9472_v14  ;;  %v8983_v0 = vpop.f32.mrb[98].mxu1 }
 0xf29   :  { %10614 = vpow2.f32 %v7491_v29  ;;  %v9473_v9 = vadd.f32 %v8983_v0, %v11426_v15  ;;  %v5764_v30 = vpop.f32.mrb[99].mxu1 }
 0xf2a   :  { %10616 = vpow2.f32 %v7490_v21  ;;  %v9474_v23 = vadd.f32 %v5764_v30, %v13832_v35 }
 0xf2b   :  { %v7493_v46 = vmul.f32 -1.442695, %v9473_v9 }
 0xf2c   :  { %v7492_v17 = vmul.f32 -1.442695, %v9474_v23  ;;  %v8986_v4 = vpop.f32.mrb[100].mxu1 }
 0xf2d   :  { %10618 = vpow2.f32 %v7493_v46  ;;  %v9475_v27 = vadd.f32 %v8986_v4, %v13833_v32  ;;  %v5774_v45 = vpop.f32.mrb[101].mxu1 }
 0xf2e   :  { %10620 = vpow2.f32 %v7492_v17  ;;  %v9476_v13 = vadd.f32 %v5774_v45, %v11418_v8 }
 0xf2f   :  { %v7495_v10 = vmul.f32 -1.442695, %v9475_v27 }
 0xf30   :  { %v7494_v18 = vmul.f32 -1.442695, %v9476_v13  ;;  %v8989_v33 = vpop.f32.mrb[102].mxu1 }
 0xf31   :  { %10622 = vpow2.f32 %v7495_v10  ;;  %v9477_v16 = vadd.f32 %v8989_v33, %v13758_v47  ;;  %v5784_v14 = vpop.f32.mrb[103].mxu1 }
 0xf32   :  { %10624 = vpow2.f32 %v7494_v18  ;;  %v9478_v29 = vadd.f32 %v5784_v14, %v13819_v40 }
 0xf33   :  { %v10615_v21 = vpop.eup %10614  ;;  %v7497_v0 = vmul.f32 -1.442695, %v9477_v16 }
 0xf34   :  { %v10617_v9 = vpop.eup %10616  ;;  %v5862_v30 = vadd.f32 1.0, %v10615_v21  ;;  %v7496_v23 = vmul.f32 -1.442695, %v9478_v29  ;;  %v8992_v46 = vpop.f32.mrb[104].mxu1 }
 0xf35   :  { %v5861_v4 = vadd.f32 1.0, %v10617_v9  ;;  %10626 = vpow2.f32 %v7497_v0  ;;  %v9479_v17 = vadd.f32 %v8992_v46, %v13820_v24  ;;  %v5794_v27 = vpop.f32.mrb[105].mxu1 }
 0xf36   :  { %10628 = vrcp.f32 %v5862_v30  ;;  %v9480_v18 = vadd.f32 %v5794_v27, %v13821_v22  ;;  %v13834_v30 = vld [vmem:[#allocation16_spill] sm:$0xff] }
 0xf37   :  { %v10619_v45 = vpop.eup %10618  ;;  %10630 = vrcp.f32 %v5861_v4 }
 0xf38   :  { %v10621_v13 = vpop.eup %10620  ;;  %v5864_v10 = vadd.f32 1.0, %v10619_v45  ;;  %10632 = vpow2.f32 %v7496_v23  ;;  %v8995_v33 = vpop.f32.mrb[106].mxu1  ;;  %v13835_v23 = vld [vmem:[#allocation13_spill] sm:$0xff] }
 0xf39   :  { %v5863_v14 = vadd.f32 1.0, %v10621_v13  ;;  %10634 = vtanh.f32 %v9479_v17  ;;  %v9481_v16 = vadd.f32 %v8995_v33, %v13822_v25  ;;  %v5804_v29 = vpop.f32.mrb[107].mxu1  ;;  %v13836_v13 = vld [vmem:[#allocation14_spill] sm:$0xff] }
 0xf3a   :  { %10636 = vrcp.f32 %v5864_v10  ;;  %v9482_v46 = vadd.f32 %v5804_v29, %v13834_v30  ;;  %v13837_v29 = vld [vmem:[#allocation17_spill] sm:$0xff] }
 0xf3b   :  { %v10623_v21 = vpop.eup %10622  ;;  %10638 = vrcp.f32 %v5863_v14 }
 0xf3c   :  { %v10625_v0 = vpop.eup %10624  ;;  %v5886_v9 = vadd.f32 1.0, %v10623_v21  ;;  %10640 = vtanh.f32 %v9480_v18  ;;  %v8998_v4 = vpop.f32.mrb[108].mxu1 }
 0xf3d   :  { %v5885_v24 = vadd.f32 1.0, %v10625_v0  ;;  %10642 = vtanh.f32 %v9481_v16  ;;  %v9483_v45 = vadd.f32 %v8998_v4, %v13835_v23  ;;  %v5814_v27 = vpop.f32.mrb[109].mxu1 }
 0xf3e   :  { %10644 = vrcp.f32 %v5886_v9  ;;  %v9484_v17 = vadd.f32 %v5814_v27, %v13836_v13 }
 0xf3f   :  { %v10627_v22 = vpop.eup %10626  ;;  %10646 = vrcp.f32 %v5885_v24  ;;  %v7499_v33 = vmul.f32 -1.442695, %v9483_v45 }
 0xf40   :  { %v10629_v10 = vpop.eup %10628  ;;  %v5888_v25 = vadd.f32 1.0, %v10627_v22  ;;  %10648 = vtanh.f32 %v9482_v46  ;;  %v7498_v14 = vmul.f32 -1.442695, %v9484_v17  ;;  %v9001_v21 = vpop.f32.mrb[110].mxu1 }
 0xf41   :  { %v10631_v18 = vpop.eup %10630  ;;  %10650 = vpow2.f32 %v7499_v33  ;;  %v9485_v30 = vadd.f32 %v9001_v21, %v13837_v29  ;;  %v5824_v0 = vpop.f32.mrb[111].mxu1 }
 0xf42   :  { %v10633_v16 = vpop.eup %10632  ;;  %10652 = vrcp.f32 %v5888_v25  ;;  %v9486_v4 = vadd.f32 %v5824_v0, %v13757_v49 }
 0xf43   :  { %v10635_v9 = vpop.eup %10634  ;;  %v5887_v23 = vadd.f32 1.0, %v10633_v16  ;;  %10654 = vpow2.f32 %v7498_v14  ;;  %v7501_v27 = vmul.f32 -1.442695, %v9485_v30 }
 0xf44   :  { %v10637_v24 = vpop.eup %10636  ;;  %v5930_v45 = vmul.f32 %v10635_v9, %v10629_v10  ;;  %v7500_v13 = vmul.f32 -1.442695, %v9486_v4 }
 0xf45   :  { %v10639_v22 = vpop.eup %10638  ;;  %10656 = vrcp.f32 %v5887_v23 }
 0xf46   :  { %v10641_v46 = vpop.eup %10640  ;;  %10658 = vpow2.f32 %v7501_v27 }
 0xf47   :  { %v10643_v17 = vpop.eup %10642  ;;  %v5929_v33 = vmul.f32 %v10641_v46, %v10631_v18  ;;  %10660 = vpow2.f32 %v7500_v13 }
 0xf48   :  { %v10645_v21 = vpop.eup %10644  ;;  %v5932_v29 = vmul.f32 %v10643_v17, %v10637_v24 }
 0xf49   :  { %v10647_v40 = vpop.eup %10646  ;;  %v5926_v25 = vmul.f32 %v10645_v21, %v13304_v12 }
 0xf4a   :  { %v10649_v0 = vpop.eup %10648  ;;  %v5925_v16 = vmul.f32 %v10647_v40, %v13306_v7 }
 0xf4b   :  { %v10651_v14 = vpop.eup %10650  ;;  %v13403_v30 = vadd.f32 %v5930_v45, %v5926_v25  ;;  %v5931_v10 = vmul.f32 %v10649_v0, %v10639_v22 }
 0xf4c   :  { %v10653_v4 = vpop.eup %10652  ;;  %v13405_v9 = vadd.f32 %v5929_v33, %v5925_v16  ;;  %v5914_v23 = vadd.f32 1.0, %v10651_v14 }
 0xf4d   :  { %v10655_v27 = vpop.eup %10654  ;;  %v5928_v18 = vmul.f32 %v10653_v4, %v13311_v62  ;;  %10662 = vtanh.f32 %v13403_v30 }
 0xf4e   :  { %10664 = vtanh.f32 %v13405_v9  ;;  %v5913_v13 = vadd.f32 1.0, %v10655_v27 }
 0xf4f   :  { %v10657_v12 = vpop.eup %10656  ;;  %v13410_v24 = vadd.f32 %v5932_v29, %v5928_v18  ;;  %10666 = vrcp.f32 %v5914_v23 }
 0xf50   :  { %v10659_v40 = vpop.eup %10658  ;;  %v5927_v7 = vmul.f32 %v10657_v12, %v13315_v55  ;;  %10668 = vrcp.f32 %v5913_v13  ;;  %v13839_v13 = vld [vmem:[#allocation11_spill] sm:$0xff] }
 0xf51   :  { %v10661_v45 = vpop.eup %10660  ;;  %10670 = vtanh.f32 %v13410_v24  ;;  %v5916_v22 = vadd.f32 1.0, %v10659_v40 }
 0xf52   :  { %v13414_v46 = vadd.f32 %v5931_v10, %v5927_v7  ;;  %v5915_v62 = vadd.f32 1.0, %v10661_v45 }
 0xf53   :  { %10672 = vrcp.f32 %v5916_v22 }
 0xf54   :  { %10674 = vtanh.f32 %v13414_v46 }
 0xf55   :  { %10676 = vrcp.f32 %v5915_v62  ;;  %v13840_v62 = vld [vmem:[#allocation12_spill] sm:$0xff] }
 0xf57   :  { %v10663_v17 = vpop.eup %10662 }
 0xf58   :  { %v10665_v33 = vpop.eup %10664 }
 0xf59   :  { %v10667_v29 = vpop.eup %10666 }
 0xf5a   :  { %v10669_v21 = vpop.eup %10668  ;;  %v5942_v25 = vmul.f32 %v10667_v29, %v10663_v17 }
 0xf5b   :  { %v10671_v0 = vpop.eup %10670  ;;  %v5941_v16 = vmul.f32 %v10669_v21, %v10665_v33  ;;  %v13841_v21 = vld [vmem:[#allocation15_spill] sm:$0xff] }
 0xf5d   :  { %v10673_v55 = vpop.eup %10672  ;;  %v9241_v14 = vpack.c.bf16 %v5942_v25, %v5941_v16 }
 0xf5e   :  { %v10675_v4 = vpop.eup %10674  ;;  %v5944_v23 = vmul.f32 %v10673_v55, %v10671_v0 }
 0xf5f   :  { %v10677_v27 = vpop.eup %10676  ;;  %9242 = vmatprep.subr.bf16.mxu0 %v9241_v14 }
 0xf60   :  { %9244 = vmatpush3.bf16.msra.mxu0 %v9241_v14  ;;  %v5943_v10 = vmul.f32 %v10677_v27, %v10675_v4  ;;  %v13842_v4 = vld [vmem:[#allocation16_spill] sm:$0xff] }
 0xf62   :  { %v9245_v18 = vpack.c.bf16 %v5944_v23, %v5943_v10 }
 0xf64   :  { %9246 = vmatprep.subr.bf16.mxu0 %v9245_v18 }
 0xf65   :  { %9248 = vmatpush3.bf16.msra.mxu0 %v9245_v18  ;;  %v13843_v18 = vld [vmem:[#allocation13_spill] sm:$0xff] }
 0xf68   :  { %9037 = vmatmul.mubr.msk.f32.vlgmr.msra.gmra.mrb[112].mxu0 %vm387_vm2, %v13062_v60  ;;  %v7547_v60 = vld [vmem:[%s13644_s0 + $0x78] sm:$0xff] }
 0xf69   :  { %9039 = vmatprep.mubr.msk.f32.mxu0 %vm387_vm2, %v13069_v2  ;;  %9060 = vmatprep.subr.mxu1 %v7547_v60 }
 0xf6a   :  { %9061 = vmatpush3.msra.mxu1 %v7547_v60 }
 0xf6b   :  { %9063 = vmatmul.mubr.msk.f32.vlgmr.msra.gmra.mrb[112].mxu1 %vm193_vm0, %v13177_v5 }
 0xf6c   :  { %9040 = vmatmul.mubr.msk.f32.gmra.mrb[114].mxu0 %vm387_vm2, %v13076_v61  ;;  %9065 = vmatprep.mubr.msk.f32.mxu1 %vm193_vm0, %v13184_v38 }
 0xf6d   :  { %9042 = vmatprep.mubr.msk.f32.mxu0 %vm387_vm2, %v13083_v58 }
 0xf6f   :  { %9066 = vmatmul.mubr.msk.f32.gmra.mrb[114].mxu1 %vm193_vm0, %v13191_v63 }
 0xf70   :  { %9043 = vmatmul.mubr.msk.f32.gmra.mrb[116].mxu0 %vm387_vm2, %v13090_v26  ;;  %9068 = vmatprep.mubr.msk.f32.mxu1 %vm193_vm0, %v13198_v37 }
 0xf71   :  { %9045 = vmatprep.mubr.msk.f32.mxu0 %vm387_vm2, %v13097_v54 }
 0xf73   :  { %9069 = vmatmul.mubr.msk.f32.gmra.mrb[116].mxu1 %vm193_vm0, %v13205_v57 }
 0xf74   :  { %9046 = vmatmul.mubr.msk.f32.gmra.mrb[118].mxu0 %vm387_vm2, %v13104_v53  ;;  %9071 = vmatprep.mubr.msk.f32.mxu1 %vm193_vm0, %v13212_v20 }
 0xf75   :  { %9048 = vmatprep.mubr.msk.f32.mxu0 %vm387_vm2, %v13111_v59 }
 0xf77   :  { %9072 = vmatmul.mubr.msk.f32.gmra.mrb[118].mxu1 %vm193_vm0, %v13219_v41 }
 0xf78   :  { %9049 = vmatmul.mubr.msk.f32.gmra.mrb[120].mxu0 %vm387_vm2, %v13118_v51  ;;  %9074 = vmatprep.mubr.msk.f32.mxu1 %vm193_vm0, %v13226_v6  ;;  %v13838_v6 = vld [vmem:[#allocation10_spill] sm:$0xff] }
 0xf79   :  { %9051 = vmatprep.mubr.msk.f32.mxu0 %vm387_vm2, %v13125_v56 }
 0xf7b   :  { %9075 = vmatmul.mubr.msk.f32.gmra.mrb[120].mxu1 %vm193_vm0, %v13233_v42 }
 0xf7c   :  { %9052 = vmatmul.mubr.msk.f32.gmra.mrb[122].mxu0 %vm387_vm2, %v13132_v1  ;;  %9077 = vmatprep.mubr.msk.f32.mxu1 %vm193_vm0, %v13240_v52 }
 0xf7d   :  { %9054 = vmatprep.mubr.msk.f32.mxu0 %vm387_vm2, %v13139_v3 }
 0xf7f   :  { %9078 = vmatmul.mubr.msk.f32.gmra.mrb[122].mxu1 %vm193_vm0, %v13247_v28 }
 0xf80   :  { %9055 = vmatmul.mubr.msk.f32.gmra.mrb[124].mxu0 %vm387_vm2, %v13146_v44  ;;  %9080 = vmatprep.mubr.msk.f32.mxu1 %vm193_vm0, %v13254_v34 }
 0xf81   :  { %9057 = vmatprep.mubr.msk.f32.mxu0 %vm387_vm2, %v13153_v50 }
 0xf83   :  { %9081 = vmatmul.mubr.msk.f32.gmra.mrb[124].mxu1 %vm193_vm0, %v13261_v39 }
 0xf84   :  { %9058 = vmatmul.mubr.msk.f32.gmra.mrb[126].mxu0 %vm387_vm2, %v13160_v43  ;;  %9083 = vmatprep.mubr.msk.f32.mxu1 %vm193_vm0, %v13268_v31 }
 0xf87   :  { %9084 = vmatmul.mubr.msk.f32.gmra.mrb[126].mxu1 %vm193_vm0, %v13829_v36 }
 0xf88   :  { %9094 = vmatprep.mubr.msk.f32.mxu1 %vm387_vm2, %v13830_v48 }
0x103b   :  { %v9038_v2 = vpop.f32.mrb[112].mxu0 }
0x103c   :  { %v9487_v61 = vadd.f32 %v9038_v2, %v11424_v11  ;;  %v6158_v58 = vpop.f32.mrb[113].mxu0 }
0x103d   :  { %v9488_v26 = vadd.f32 %v6158_v58, %v13831_v19 }
0x103e   :  { %v7536_v54 = vmul.f32 -1.442695, %v9487_v61  ;;  %v13844_v61 = vld [vmem:[#allocation14_spill] sm:$0xff] }
0x103f   :  { %v7535_v53 = vmul.f32 -1.442695, %v9488_v26  ;;  %v9041_v59 = vpop.f32.mrb[114].mxu0 }
0x1040   :  { %10678 = vpow2.f32 %v7536_v54  ;;  %v9489_v51 = vadd.f32 %v9041_v59, %v11426_v15  ;;  %v6168_v56 = vpop.f32.mrb[115].mxu0 }
0x1041   :  { %10680 = vpow2.f32 %v7535_v53  ;;  %v9490_v1 = vadd.f32 %v6168_v56, %v13832_v35 }
0x1042   :  { %v7538_v3 = vmul.f32 -1.442695, %v9489_v51 }
0x1043   :  { %v7537_v44 = vmul.f32 -1.442695, %v9490_v1  ;;  %v9044_v50 = vpop.f32.mrb[116].mxu0 }
0x1044   :  { %10682 = vpow2.f32 %v7538_v3  ;;  %v9491_v43 = vadd.f32 %v9044_v50, %v13833_v32  ;;  %v6178_v5 = vpop.f32.mrb[117].mxu0  ;;  %v13845_v3 = vld [vmem:[#allocation17_spill] sm:$0xff] }
0x1045   :  { %10684 = vpow2.f32 %v7537_v44  ;;  %v9492_v38 = vadd.f32 %v6178_v5, %v11418_v8 }
0x1046   :  { %v7540_v63 = vmul.f32 -1.442695, %v9491_v43 }
0x1047   :  { %v7539_v37 = vmul.f32 -1.442695, %v9492_v38  ;;  %v9047_v57 = vpop.f32.mrb[118].mxu0 }
0x1048   :  { %10686 = vpow2.f32 %v7540_v63  ;;  %v9493_v20 = vadd.f32 %v9047_v57, %v13758_v47  ;;  %v6188_v41 = vpop.f32.mrb[119].mxu0 }
0x1049   :  { %10688 = vpow2.f32 %v7539_v37  ;;  %v9494_v42 = vadd.f32 %v6188_v41, %v13838_v6 }
0x104a   :  { %v10679_v52 = vpop.eup %10678  ;;  %v7542_v28 = vmul.f32 -1.442695, %v9493_v20 }
0x104b   :  { %v10681_v34 = vpop.eup %10680  ;;  %v6266_v39 = vadd.f32 1.0, %v10679_v52  ;;  %v7541_v31 = vmul.f32 -1.442695, %v9494_v42  ;;  %v9050_v36 = vpop.f32.mrb[120].mxu0 }
0x104c   :  { %v6265_v48 = vadd.f32 1.0, %v10681_v34  ;;  %10690 = vpow2.f32 %v7542_v28  ;;  %v9495_v12 = vadd.f32 %v9050_v36, %v13839_v13  ;;  %v6198_v40 = vpop.f32.mrb[121].mxu0 }
0x104d   :  { %10692 = vrcp.f32 %v6266_v39  ;;  %v9496_v17 = vadd.f32 %v6198_v40, %v13840_v62 }
0x104e   :  { %v10683_v7 = vpop.eup %10682  ;;  %10694 = vrcp.f32 %v6265_v48 }
0x104f   :  { %v10685_v45 = vpop.eup %10684  ;;  %v6268_v22 = vadd.f32 1.0, %v10683_v7  ;;  %10696 = vpow2.f32 %v7541_v31  ;;  %v9053_v33 = vpop.f32.mrb[122].mxu0 }
0x1050   :  { %v6267_v29 = vadd.f32 1.0, %v10685_v45  ;;  %10698 = vtanh.f32 %v9495_v12  ;;  %v9497_v25 = vadd.f32 %v9053_v33, %v13841_v21  ;;  %v6208_v0 = vpop.f32.mrb[123].mxu0 }
0x1051   :  { %10700 = vrcp.f32 %v6268_v22  ;;  %v9498_v23 = vadd.f32 %v6208_v0, %v13842_v4 }
0x1052   :  { %v10687_v16 = vpop.eup %10686  ;;  %10702 = vrcp.f32 %v6267_v29 }
0x1053   :  { %v10689_v55 = vpop.eup %10688  ;;  %v6290_v14 = vadd.f32 1.0, %v10687_v16  ;;  %10704 = vtanh.f32 %v9496_v17  ;;  %v9056_v27 = vpop.f32.mrb[124].mxu0 }
0x1054   :  { %v6289_v10 = vadd.f32 1.0, %v10689_v55  ;;  %10706 = vtanh.f32 %v9497_v25  ;;  %v9499_v60 = vadd.f32 %v9056_v27, %v13843_v18  ;;  %v6218_v2 = vpop.f32.mrb[125].mxu0 }
0x1055   :  { %10708 = vrcp.f32 %v6290_v14  ;;  %v9500_v58 = vadd.f32 %v6218_v2, %v13844_v61 }
0x1056   :  { %v10691_v26 = vpop.eup %10690  ;;  %10710 = vrcp.f32 %v6289_v10  ;;  %v7544_v54 = vmul.f32 -1.442695, %v9499_v60 }
0x1057   :  { %v10693_v53 = vpop.eup %10692  ;;  %v6292_v59 = vadd.f32 1.0, %v10691_v26  ;;  %10712 = vtanh.f32 %v9498_v23  ;;  %v7543_v51 = vmul.f32 -1.442695, %v9500_v58  ;;  %v9059_v56 = vpop.f32.mrb[126].mxu0 }
0x1058   :  { %v10695_v1 = vpop.eup %10694  ;;  %10714 = vpow2.f32 %v7544_v54  ;;  %v9501_v44 = vadd.f32 %v9059_v56, %v13845_v3  ;;  %v6228_v50 = vpop.f32.mrb[127].mxu0 }
0x1059   :  { %v10697_v43 = vpop.eup %10696  ;;  %10716 = vrcp.f32 %v6292_v59  ;;  %v9502_v5 = vadd.f32 %v6228_v50, %v13757_v49 }
0x105a   :  { %v10699_v38 = vpop.eup %10698  ;;  %v6291_v63 = vadd.f32 1.0, %v10697_v43  ;;  %10718 = vpow2.f32 %v7543_v51  ;;  %v7546_v37 = vmul.f32 -1.442695, %v9501_v44 }
0x105b   :  { %v10701_v57 = vpop.eup %10700  ;;  %v6334_v20 = vmul.f32 %v10699_v38, %v10693_v53  ;;  %v7545_v41 = vmul.f32 -1.442695, %v9502_v5  ;;  %v10934_v5 = vld [vmem:[%s13649_s5 + $0x8] sm:$0xff]  ;;  %v10935_v38 = vld [vmem:[%s13649_s5 + $0x10] sm:$0xff] }
0x105c   :  { %v10703_v42 = vpop.eup %10702  ;;  %10720 = vrcp.f32 %v6291_v63  ;;  %v10936_v63 = vld [vmem:[%s13649_s5 + $0x18] sm:$0xff] }
0x105d   :  { %v10705_v52 = vpop.eup %10704  ;;  %10722 = vpow2.f32 %v7546_v37  ;;  %v10937_v37 = vld [vmem:[%s13649_s5 + $0x20] sm:$0xff] }
0x105e   :  { %v10707_v28 = vpop.eup %10706  ;;  %v6333_v34 = vmul.f32 %v10705_v52, %v10695_v1  ;;  %10724 = vpow2.f32 %v7545_v41  ;;  %v10940_v41 = vld [vmem:[%s13649_s5 + $0x38] sm:$0xff]  ;;  %v10942_v52 = vld [vmem:[%s13649_s5 + $0x48] sm:$0xff] }
0x105f   :  { %v10709_v39 = vpop.eup %10708  ;;  %v6336_v31 = vmul.f32 %v10707_v28, %v10701_v57  ;;  %v10938_v57 = vld [vmem:[%s13649_s5 + $0x28] sm:$0xff]  ;;  %v10943_v28 = vld [vmem:[%s13649_s5 + $0x50] sm:$0xff] }
0x1060   :  { %v10711_v36 = vpop.eup %10710  ;;  %v6330_v48 = vmul.f32 %v10709_v39, %v13403_v30  ;;  %v10945_v39 = vld [vmem:[%s13649_s5 + $0x60] sm:$0xff] }
0x1061   :  { %v10713_v12 = vpop.eup %10712  ;;  %v6329_v40 = vmul.f32 %v10711_v36, %v13405_v9  ;;  %v10947_v36 = vld [vmem:[%s13649_s5 + $0x70] sm:$0xff] }
0x1062   :  { %v10715_v7 = vpop.eup %10714  ;;  %v13500_v45 = vadd.f32 %v6334_v20, %v6330_v48  ;;  %v6335_v22 = vmul.f32 %v10713_v12, %v10703_v42  ;;  %v10939_v20 = vld [vmem:[%s13649_s5 + $0x30] sm:$0xff]  ;;  %v10941_v42 = vld [vmem:[%s13649_s5 + $0x40] sm:$0xff]  ;;  %v10948_v48 = vld [vmem:[%s13649_s5 + $0x78] sm:$0xff]  ;;  %v10974_v12 = vmov 0.0|0.0  }
0x1063   :  { %v10717_v17 = vpop.eup %10716  ;;  %v13502_v33 = vadd.f32 %v6333_v34, %v6329_v40  ;;  %v6318_v29 = vadd.f32 1.0, %v10715_v7  ;;  %v10944_v34 = vld [vmem:[%s13649_s5 + $0x58] sm:$0xff]  ;;  %9257 = vmatprep.subr.bf16.mxu0 %v10974_v12  ;;  %v10976_v40 = vmov 0.0  }
0x1064   :  { %v10719_v25 = vpop.eup %10718  ;;  %v6332_v0 = vmul.f32 %v10717_v17, %v13410_v24  ;;  %10726 = vtanh.f32 %v13500_v45  ;;  %9126 = vmatprep.mubr.msk.f32.mxu0 %vm10975_vm3, %v10976_v40 }
0x1065   :  { %10728 = vtanh.f32 %v13502_v33  ;;  %v6317_v16 = vadd.f32 1.0, %v10719_v25 }
0x1066   :  { %v10721_v30 = vpop.eup %10720  ;;  %v13507_v55 = vadd.f32 %v6336_v31, %v6332_v0  ;;  %10730 = vrcp.f32 %v6318_v29  ;;  %v10946_v31 = vld [vmem:[%s13649_s5 + $0x68] sm:$0xff] }
0x1067   :  { %v10723_v9 = vpop.eup %10722  ;;  %v6331_v14 = vmul.f32 %v10721_v30, %v13414_v46  ;;  %10732 = vrcp.f32 %v6317_v16 }
0x1068   :  { %v10725_v23 = vpop.eup %10724  ;;  %10734 = vtanh.f32 %v13507_v55  ;;  %v6320_v27 = vadd.f32 1.0, %v10723_v9 }
0x1069   :  { %v13511_v10 = vadd.f32 %v6335_v22, %v6331_v14  ;;  %v6319_v24 = vadd.f32 1.0, %v10725_v23 }
0x106a   :  { %10736 = vrcp.f32 %v6320_v27 }
0x106b   :  { %10738 = vtanh.f32 %v13511_v10 }
0x106c   :  { %10740 = vrcp.f32 %v6319_v24 }
0x106e   :  { %v10727_v60 = vpop.eup %10726 }
0x106f   :  { %v10729_v2 = vpop.eup %10728 }
0x1070   :  { %v10731_v58 = vpop.eup %10730 }
0x1071   :  { %v10733_v26 = vpop.eup %10732  ;;  %v6346_v54 = vmul.f32 %v10731_v58, %v10727_v60 }
0x1072   :  { %v10735_v53 = vpop.eup %10734  ;;  %v6345_v59 = vmul.f32 %v10733_v26, %v10729_v2 }
0x1074   :  { %v10737_v46 = vpop.eup %10736  ;;  %v9249_v51 = vpack.c.bf16 %v6346_v54, %v6345_v59 }
0x1075   :  { %v10739_v56 = vpop.eup %10738  ;;  %v6348_v1 = vmul.f32 %v10737_v46, %v10735_v53 }
0x1076   :  { %v10741_v44 = vpop.eup %10740  ;;  %9250 = vmatprep.subr.bf16.mxu1 %v9249_v51 }
0x1077   :  { %9252 = vmatpush3.bf16.msra.mxu1 %v9249_v51  ;;  %v6347_v50 = vmul.f32 %v10741_v44, %v10739_v56 }
0x1079   :  { %v9253_v43 = vpack.c.bf16 %v6348_v1, %v6347_v50 }
0x107b   :  { %9254 = vmatprep.subr.bf16.mxu1 %v9253_v43 }
0x107c   :  { %9256 = vmatpush3.bf16.msra.mxu1 %v9253_v43 }
0x107f   :  { %9095 = vmatmul.mubr.msk.f32.vlgmr.msra.gmra.mrb[112].mxu1 %vm387_vm2, %v10934_v5 }
0x1080   :  { %9097 = vmatprep.mubr.msk.f32.mxu1 %vm387_vm2, %v10935_v38 }
0x1083   :  { %9098 = vmatmul.mubr.msk.f32.gmra.mrb[114].mxu1 %vm387_vm2, %v10936_v63 }
0x1084   :  { %9100 = vmatprep.mubr.msk.f32.mxu1 %vm387_vm2, %v10937_v37 }
0x1087   :  { %9101 = vmatmul.mubr.msk.f32.gmra.mrb[116].mxu1 %vm387_vm2, %v10938_v57 }
0x1088   :  { %9103 = vmatprep.mubr.msk.f32.mxu1 %vm387_vm2, %v10939_v20 }
0x108b   :  { %9104 = vmatmul.mubr.msk.f32.gmra.mrb[118].mxu1 %vm387_vm2, %v10940_v41 }
0x108c   :  { %9106 = vmatprep.mubr.msk.f32.mxu1 %vm387_vm2, %v10941_v42 }
0x108f   :  { %9107 = vmatmul.mubr.msk.f32.gmra.mrb[120].mxu1 %vm387_vm2, %v10942_v52 }
0x1090   :  { %9109 = vmatprep.mubr.msk.f32.mxu1 %vm387_vm2, %v10943_v28 }
0x1093   :  { %9110 = vmatmul.mubr.msk.f32.gmra.mrb[122].mxu1 %vm387_vm2, %v10944_v34 }
0x1094   :  { %9112 = vmatprep.mubr.msk.f32.mxu1 %vm387_vm2, %v10945_v39 }
0x1097   :  { %9113 = vmatmul.mubr.msk.f32.gmra.mrb[124].mxu1 %vm387_vm2, %v10946_v31 }
0x1098   :  { %9115 = vmatprep.mubr.msk.f32.mxu1 %vm387_vm2, %v10947_v36 }
0x109b   :  { %9116 = vmatmul.mubr.msk.f32.gmra.mrb[126].mxu1 %vm387_vm2, %v10948_v48 }
0x1152   :  { %v9096_v7 = vpop.f32.mrb[112].mxu1 }
0x1153   :  { %v9503_v22 = vadd.f32 %v9096_v7, %v11424_v11  ;;  %v6562_v17 = vpop.f32.mrb[113].mxu1 }
0x1154   :  { %v9504_v29 = vadd.f32 %v6562_v17, %v13831_v19 }
0x1155   :  { %v7581_v25 = vmul.f32 -1.442695, %v9503_v22 }
0x1156   :  { %v7580_v0 = vmul.f32 -1.442695, %v9504_v29  ;;  %v9099_v16 = vpop.f32.mrb[114].mxu1 }
0x1157   :  { %10742 = vpow2.f32 %v7581_v25  ;;  %v9505_v30 = vadd.f32 %v9099_v16, %v11426_v15  ;;  %v6572_v9 = vpop.f32.mrb[115].mxu1 }
0x1158   :  { %10744 = vpow2.f32 %v7580_v0  ;;  %v9506_v14 = vadd.f32 %v6572_v9, %v13832_v35 }
0x1159   :  { %v7583_v23 = vmul.f32 -1.442695, %v9505_v30 }
0x115a   :  { %v7582_v27 = vmul.f32 -1.442695, %v9506_v14  ;;  %v9102_v24 = vpop.f32.mrb[116].mxu1 }
0x115b   :  { %10746 = vpow2.f32 %v7583_v23  ;;  %v9507_v60 = vadd.f32 %v9102_v24, %v13833_v32  ;;  %v6582_v11 = vpop.f32.mrb[117].mxu1 }
0x115c   :  { %10748 = vpow2.f32 %v7582_v27  ;;  %v9508_v19 = vadd.f32 %v6582_v11, %v11418_v8 }
0x115d   :  { %v7585_v2 = vmul.f32 -1.442695, %v9507_v60 }
0x115e   :  { %v7584_v58 = vmul.f32 -1.442695, %v9508_v19  ;;  %v9105_v26 = vpop.f32.mrb[118].mxu1 }
0x115f   :  { %10750 = vpow2.f32 %v7585_v2  ;;  %v9509_v15 = vadd.f32 %v9105_v26, %v13758_v47  ;;  %v6592_v54 = vpop.f32.mrb[119].mxu1 }
0x1160   :  { %10752 = vpow2.f32 %v7584_v58  ;;  %v9510_v35 = vadd.f32 %v6592_v54, %v13838_v6 }
0x1161   :  { %v10743_v53 = vpop.eup %10742  ;;  %v7587_v59 = vmul.f32 -1.442695, %v9509_v15 }
0x1162   :  { %v10745_v46 = vpop.eup %10744  ;;  %v6670_v51 = vadd.f32 1.0, %v10743_v53  ;;  %v7586_v56 = vmul.f32 -1.442695, %v9510_v35  ;;  %v9108_v32 = vpop.f32.mrb[120].mxu1 }
0x1163   :  { %v6669_v1 = vadd.f32 1.0, %v10745_v46  ;;  %10754 = vpow2.f32 %v7587_v59  ;;  %v9511_v8 = vadd.f32 %v9108_v32, %v13839_v13  ;;  %v6602_v44 = vpop.f32.mrb[121].mxu1 }
0x1164   :  { %10756 = vrcp.f32 %v6670_v51  ;;  %v9512_v5 = vadd.f32 %v6602_v44, %v13840_v62 }
0x1165   :  { %v10747_v50 = vpop.eup %10746  ;;  %10758 = vrcp.f32 %v6669_v1 }
0x1166   :  { %v10749_v43 = vpop.eup %10748  ;;  %v6672_v47 = vadd.f32 1.0, %v10747_v50  ;;  %10760 = vpow2.f32 %v7586_v56  ;;  %v9111_v6 = vpop.f32.mrb[122].mxu1 }
0x1167   :  { %v6671_v38 = vadd.f32 1.0, %v10749_v43  ;;  %10762 = vtanh.f32 %v9511_v8  ;;  %v9513_v63 = vadd.f32 %v9111_v6, %v13841_v21  ;;  %v6612_v37 = vpop.f32.mrb[123].mxu1 }
0x1168   :  { %10764 = vrcp.f32 %v6672_v47  ;;  %v9514_v41 = vadd.f32 %v6612_v37, %v13842_v4 }
0x1169   :  { %v10751_v57 = vpop.eup %10750  ;;  %10766 = vrcp.f32 %v6671_v38 }
0x116a   :  { %v10753_v20 = vpop.eup %10752  ;;  %v6694_v13 = vadd.f32 1.0, %v10751_v57  ;;  %10768 = vtanh.f32 %v9512_v5  ;;  %v9114_v42 = vpop.f32.mrb[124].mxu1 }
0x116b   :  { %v6693_v52 = vadd.f32 1.0, %v10753_v20  ;;  %10770 = vtanh.f32 %v9513_v63  ;;  %v9515_v28 = vadd.f32 %v9114_v42, %v13843_v18  ;;  %v6622_v62 = vpop.f32.mrb[125].mxu1  ;;  %v6765_v42 = vld [vmem:[%s13650_s6] sm:$0x1] }
0x116c   :  { %10772 = vrcp.f32 %v6694_v13  ;;  %v9516_v34 = vadd.f32 %v6622_v62, %v13844_v61  ;;  %v6770_v62 = vpop.permute.xlu0 %6769 }
0x116d   :  { %v10755_v39 = vpop.eup %10754  ;;  %10774 = vrcp.f32 %v6693_v52  ;;  %v7589_v21 = vmul.f32 -1.442695, %v9515_v28 }
0x116e   :  { %v10757_v31 = vpop.eup %10756  ;;  %v6696_v36 = vadd.f32 1.0, %v10755_v39  ;;  %10776 = vtanh.f32 %v9514_v41  ;;  %v7588_v48 = vmul.f32 -1.442695, %v9516_v34  ;;  %v9117_v40 = vpop.f32.mrb[126].mxu1 }
0x116f   :  { %v10759_v7 = vpop.eup %10758  ;;  %10778 = vpow2.f32 %v7589_v21  ;;  %v9517_v4 = vadd.f32 %v9117_v40, %v13845_v3  ;;  %v6632_v22 = vpop.f32.mrb[127].mxu1 }
0x1170   :  { %v10761_v17 = vpop.eup %10760  ;;  %10780 = vrcp.f32 %v6696_v36  ;;  %v9518_v18 = vadd.f32 %v6632_v22, %v13757_v49 }
0x1171   :  { %v10763_v29 = vpop.eup %10762  ;;  %v6695_v25 = vadd.f32 1.0, %v10761_v17  ;;  %10782 = vpow2.f32 %v7588_v48  ;;  %v7591_v61 = vmul.f32 -1.442695, %v9517_v4 }
0x1172   :  { %v10765_v0 = vpop.eup %10764  ;;  %v6738_v16 = vmul.f32 %v10763_v29, %v10757_v31  ;;  %v7590_v30 = vmul.f32 -1.442695, %v9518_v18 }
0x1173   :  { %v10767_v9 = vpop.eup %10766  ;;  %10784 = vrcp.f32 %v6695_v25 }
0x1174   :  { %v10769_v14 = vpop.eup %10768  ;;  %10786 = vpow2.f32 %v7591_v61 }
0x1175   :  { %v10771_v23 = vpop.eup %10770  ;;  %v6737_v27 = vmul.f32 %v10769_v14, %v10759_v7  ;;  %10788 = vpow2.f32 %v7590_v30 }
0x1176   :  { %v10773_v3 = vpop.eup %10772  ;;  %v6740_v24 = vmul.f32 %v10771_v23, %v10765_v0 }
0x1177   :  { %v10775_v60 = vpop.eup %10774  ;;  %v6734_v11 = vmul.f32 %v10773_v3, %v13500_v45 }
0x1178   :  { %v10777_v49 = vpop.eup %10776  ;;  %v6733_v19 = vmul.f32 %v10775_v60, %v13502_v33 }
0x1179   :  { %v10779_v2 = vpop.eup %10778  ;;  %v6742_v58 = vadd.f32 %v6738_v16, %v6734_v11  ;;  %v6739_v26 = vmul.f32 %v10777_v49, %v10767_v9 }
0x117a   :  { %v10781_v15 = vpop.eup %10780  ;;  %v6741_v54 = vadd.f32 %v6737_v27, %v6733_v19  ;;  %v6722_v35 = vadd.f32 1.0, %v10779_v2 }
0x117b   :  { %v10783_v53 = vpop.eup %10782  ;;  %v6736_v59 = vmul.f32 %v10781_v15, %v13507_v55  ;;  %10790 = vtanh.f32 %v6742_v58  ;;  %6759 = vst.msk [vmem:[%s13654_s10 + $0x8] sm:$0xff] %vm43_vm1, %v6742_v58 }
0x117c   :  { %10792 = vtanh.f32 %v6741_v54  ;;  %6758 = vst.msk [vmem:[%s13654_s10] sm:$0xff] %vm43_vm1, %v6741_v54  ;;  %v6721_v45 = vadd.f32 1.0, %v10783_v53 }
0x117d   :  { %v10785_v33 = vpop.eup %10784  ;;  %v6744_v46 = vadd.f32 %v6740_v24, %v6736_v59  ;;  %10794 = vrcp.f32 %v6722_v35 }
0x117e   :  { %v10787_v51 = vpop.eup %10786  ;;  %v6735_v56 = vmul.f32 %v10785_v33, %v13511_v10  ;;  %10796 = vrcp.f32 %v6721_v45 }
0x117f   :  { %v10789_v55 = vpop.eup %10788  ;;  %10798 = vtanh.f32 %v6744_v46  ;;  %6761 = vst.msk [vmem:[%s13654_s10 + $0x18] sm:$0xff] %vm43_vm1, %v6744_v46  ;;  %v6724_v32 = vadd.f32 1.0, %v10787_v51 }
0x1180   :  { %v6743_v1 = vadd.f32 %v6739_v26, %v6735_v56  ;;  %v6723_v8 = vadd.f32 1.0, %v10789_v55 }
0x1181   :  { %10800 = vrcp.f32 %v6724_v32 }
0x1182   :  { %10802 = vtanh.f32 %v6743_v1  ;;  %6760 = vst.msk [vmem:[%s13654_s10 + $0x10] sm:$0xff] %vm43_vm1, %v6743_v1 }
0x1183   :  { %10804 = vrcp.f32 %v6723_v8 }
0x1185   :  { %v10791_v10 = vpop.eup %10790 }
0x1186   :  { %v10793_v44 = vpop.eup %10792 }
0x1187   :  { %v10795_v50 = vpop.eup %10794 }
0x1188   :  { %v10797_v43 = vpop.eup %10796  ;;  %v6750_v47 = vmul.f32 %v10795_v50, %v10791_v10 }
0x1189   :  { %v10799_v5 = vpop.eup %10798  ;;  %v6749_v6 = vmul.f32 %v10797_v43, %v10793_v44 }
0x118a   :  { %6755 = vst.msk [vmem:[%s13653_s9 + $0x8] sm:$0xff] %vm43_vm1, %v6750_v47 }
0x118b   :  { %v10801_v38 = vpop.eup %10800  ;;  %6754 = vst.msk [vmem:[%s13653_s9] sm:$0xff] %vm43_vm1, %v6749_v6  ;;  %v9258_v63 = vpack.c.bf16 %v6750_v47, %v6749_v6 }
0x118c   :  { %v10803_v37 = vpop.eup %10802  ;;  %v6752_v57 = vmul.f32 %v10801_v38, %v10799_v5 }
0x118d   :  { %v10805_v20 = vpop.eup %10804  ;;  %9259 = vmatpush3.bf16.msra.mxu0 %v9258_v63 }
0x118e   :  { %9260 = vmatprep.subr.bf16.mxu0 %v10974_v12  ;;  %v6751_v13 = vmul.f32 %v10805_v20, %v10803_v37  ;;  %6757 = vst.msk [vmem:[%s13653_s9 + $0x18] sm:$0xff] %vm43_vm1, %v6752_v57  ;;  %v6772_v12 = vlaneseq }
0x1190   :  { %6756 = vst.msk [vmem:[%s13653_s9 + $0x10] sm:$0xff] %vm43_vm1, %v6751_v13  ;;  %v9261_v41 = vpack.c.bf16 %v6752_v57, %v6751_v13  ;;  %v6773_v52 = vshrl.u32 %v6772_v12, 7  ;;  %s10949_s9 = scalar_lea.vmem %s6858_s7, 16 }
0x1191   :  { %p10950_p0 = scmp.ne.s32.totalorder %s6858_s7, %s10949_s9  ;;  %p10955_p2 = scmp.lt.s32.totalorder %s10953_s3, %s10949_s9 }
0x1192   :  { %9262 = vmatpush3.bf16.msra.mxu0 %v9261_v41  ;;  %v6774_v28 = vsub.s32 0, %v6773_v52 }
0x1193   :  { %p10956_p3 = por %p10955_p2, %p10954_p1 }
0x1194   :  { %v6775_v34 = vrot.slane %v6770_v62, %v6774_v28 }
0x1195   :  { %9127 = vmatmul.mubr.msk.f32.vlgmr.msra.gmra.mrb[128].mxu0 %vm387_vm2, %v6765_v42  ;;  %p10957_p4 = pnand %p10956_p3, %p10950_p0 }
0x1268   :  { %v6845_v39 = vpop.f32.mrb[128].mxu0 }
0x1269   :  { %v6846_v21 = vadd.f32 %v6845_v39, %v6775_v34  ;;  %v9128_v31 = vpop.f32.mrb[129].mxu0 }
0x126b   :  { %6850 = vst.msk [vmem:[#allocation3] sm:$0x1] %vm6849_vm4, %v6846_v21 }
0x126c   :  { %10960 = shalt.err (!%p10957_p4)
}
0x126d   :  { %s10961_s21 = scalar_lea.hbm %s13652_s8, 16 }
0x126e   :  { %p10962_p5 = scmp.ne.s32.totalorder %s13652_s8, %s10961_s21  ;;  %p10965_p6 = scmp.lt.u32.totalorder %s10961_s21, %s13652_s8 }
0x1270   :  { %p10967_p7 = pnand %p10965_p6, %p10962_p5 }
0x1272   :  { %10970 = shalt.err (!%p10967_p7)
}
0x1273   :  { %6860 = dma.vmem_to_hbm [thread:$0]  %s6858_s7, 16, %s13652_s8, [#allocation4]  }
0x1274   :  { %10971 = dma.done.wait [#allocation4], 16  }
0x1275   :  { %10972 = vsyncadd [#allocation4], 4294967280 }
0x1276   :  { %6872 = vsyncpa [#allocation4], 1 }

</bundles_post_ra>
